<compile_context>
chip_gen: v7x
topology: tpu7x:2x2x1
jax: 0.10.0
libtpu: 0.0.40
codegen_flags: <defaults>
</compile_context>

<pallas_src>
import numpy as np
import jax
import jax.numpy as jnp
from jax import lax
from jax.experimental import pallas as pl
from jax.experimental.pallas import tpu as pltpu

_LN_EPS = 1e-5                      # torch.nn.LayerNorm default eps
_A_DTYPE = jnp.bfloat16             # adjacency / edge-probability storage dtype


# -----------------------------------------------------------------------------
# hardware-aware sizing helpers
# -----------------------------------------------------------------------------
def _vmem_capacity_bytes():
    try:
        return int(pltpu.get_tpu_info().vmem_capacity_bytes)
    except Exception:               # conservative default (v7x per-core VMEM)
        return 64 << 20


def _compiler_params(dims):
    cap = _vmem_capacity_bytes()
    return pltpu.CompilerParams(
        dimension_semantics=dims,
        vmem_limit_bytes=min(int(cap * 3 // 4), 112 << 20))


def _pick_edge_row_tile(N, H):
    """Rows (i) of A processed per edge-kernel grid step.

    Keeps ~3 live [TI, H, N] f32 intermediates within a quarter of physical VMEM,
    prefers multiples of 16 (bf16 sublane tile), and always divides N.
    """
    if N <= 256:
        return N
    budget = _vmem_capacity_bytes() // 4
    per_row = H * N * 4 * 3 + N * 2 * 4       # f32 intermediates + double-buffered bf16 A/out
    ti_max = max(16, min(128, budget // max(per_row, 1)))
    best = 0
    for cand in range(16, ti_max + 1, 16):
        if N % cand == 0:
            best = cand
    if best == 0:
        for cand in range(8, ti_max + 1, 8):
            if N % cand == 0:
                best = cand
    # TODO(synk): for awkward N (no multiple-of-8 divisor <= 128) pad N instead of using TI=N.
    return best if best else N


# -----------------------------------------------------------------------------
# in-kernel building blocks (channel-first: tensors are [H, M] with H on sublanes)
# -----------------------------------------------------------------------------
def _ln_cf(z, gamma_col, beta_col):
    """LayerNorm over the channel (sublane) axis of a [H, M] tensor.

    Statistics via a ones-vector matmul on the MXU (review: avoid masked 8-wide reduces)."""
    c = z.shape[0]
    ones_row = jnp.ones((1, c), jnp.float32)
    mu = jnp.dot(ones_row, z, preferred_element_type=jnp.float32) * (1.0 / c)
    zc = z - mu
    var = jnp.dot(ones_row, zc * zc, preferred_element_type=jnp.float32) * (1.0 / c)
    return zc * lax.rsqrt(var + _LN_EPS) * gamma_col + beta_col


def _vp_net_cf(v, vp_W, vp_P):
    """vp_net: 3x (Linear + LayerNorm + Tanh) on a channel-first column v: [H, 1]."""
    for k in range(3):
        z = jnp.dot(vp_W[k], v, preferred_element_type=jnp.float32) + vp_P[k][:, 0:1]
        v = jnp.tanh(_ln_cf(z, vp_P[k][:, 1:2], vp_P[k][:, 2:3]))
    return v


# -----------------------------------------------------------------------------
# input_net + initial vp (one kernel, per graph)
# -----------------------------------------------------------------------------
def _make_input_kernel(N, F, H):
    inv_n = 1.0 / N

    def kernel(x_ref, Wi_ref, Pi_ref, vpW_ref, vpP_ref, xcf_ref, vp0_ref):
        x_g = x_ref[0].astype(jnp.float32)                       # [N, F]
        Wi = Wi_ref[...]                                         # [H, F]
        Pi = Pi_ref[...]                                         # [H, 3]: b, gamma, beta
        # input_net Linear+LN+Tanh, channel-first so LN/tanh are lane-dense on N
        z = lax.dot_general(Wi, x_g, (((1,), (1,)), ((), ())),
                            preferred_element_type=jnp.float32) + Pi[:, 0:1]   # [H, N]
        h = jnp.tanh(_ln_cf(z, Pi[:, 1:2], Pi[:, 2:3]))
        xcf_ref[0] = h.astype(xcf_ref.dtype)
        # initial vp = vp_net(mean over nodes), fused into the same kernel
        m = jnp.sum(h, axis=1, keepdims=True) * inv_n            # [H, 1]
        v = _vp_net_cf(m, vpW_ref[...], vpP_ref[...])
        vp0_ref[0] = v.reshape(1, H).astype(vp0_ref.dtype)

    return kernel


def input_net_forward(p, x):
    B, N, F = x.shape
    H = p["in_W"].shape[0]
    return pl.pallas_call(
        _make_input_kernel(N, F, H),
        out_shape=(jax.ShapeDtypeStruct((B, H, N), jnp.float32),
                   jax.ShapeDtypeStruct((B, 1, H), jnp.float32)),
        grid=(B,),
        in_specs=[
            pl.BlockSpec((1, N, F), lambda b: (b, 0, 0)),
            pl.BlockSpec((H, F), lambda b: (0, 0)),
            pl.BlockSpec((H, 3), lambda b: (0, 0)),
            pl.BlockSpec((3, H, H), lambda b: (0, 0, 0)),
            pl.BlockSpec((3, H, 3), lambda b: (0, 0, 0)),
        ],
        out_specs=(pl.BlockSpec((1, H, N), lambda b: (b, 0, 0)),
                   pl.BlockSpec((1, 1, H), lambda b: (b, 0, 0))),
        compiler_params=_compiler_params(("parallel",)),
    )(x, p["in_W"], p["in_P"], p["vp_W"], p["vp_P"])


# -----------------------------------------------------------------------------
# NodeNetwork + vp_net(mean) + residual  (one fused kernel, one graph per step)
# -----------------------------------------------------------------------------
def _make_node_kernel(N, H):
    inv_n = 1.0 / N

    def kernel(x_ref, A_ref, vp_ref, W1_ref, Wh_ref, P_ref, vpW_ref, vpP_ref,
               xnew_ref, xres_ref, vpn_ref):
        x_cf = x_ref[0].astype(jnp.float32)                      # [H, N]  (this is x0 too)
        A = A_ref[0].astype(jnp.float32)                         # [N, N]
        vp_col = vp_ref[0].reshape(H, 1).astype(jnp.float32)     # [H, 1]
        W1 = W1_ref[...]                                         # [H, 4H], input order [mi|mo|x|vp]
        Wh = Wh_ref[...]                                         # [3, H, H]
        P = P_ref[...]                                           # [4, H, 3]: b, gamma, beta

        # adjacency aggregation, channel-first:
        #   mi = A^T x  ->  mi_cf = x_cf @ A
        #   mo = A   x  ->  mo_cf[h, n] = sum_k x_cf[h, k] * A[n, k]
        mi = jnp.dot(x_cf, A, preferred_element_type=jnp.float32)               # [H, N]
        mo = lax.dot_general(x_cf, A, (((1,), (1,)), ((), ())),
                             preferred_element_type=jnp.float32)                # [H, N]

        # layer 1 (split by linearity; vp contribution computed once per graph -- no vp_rep)
        z = (jnp.dot(W1[:, 0:H], mi, preferred_element_type=jnp.float32)
             + jnp.dot(W1[:, H:2 * H], mo, preferred_element_type=jnp.float32)
             + jnp.dot(W1[:, 2 * H:3 * H], x_cf, preferred_element_type=jnp.float32)
             + jnp.dot(W1[:, 3 * H:4 * H], vp_col, preferred_element_type=jnp.float32)
             + P[0][:, 0:1])
        h = jnp.tanh(_ln_cf(z, P[0][:, 1:2], P[0][:, 2:3]))

        # layers 2..4
        for k in range(3):
            z = jnp.dot(Wh[k], h, preferred_element_type=jnp.float32) + P[k + 1][:, 0:1]
            h = jnp.tanh(_ln_cf(z, P[k + 1][:, 1:2], P[k + 1][:, 2:3]))

        xnew_ref[0] = h.astype(xnew_ref.dtype)                   # new x (pre-residual) for edge net
        xres_ref[0] = (h + x_cf).astype(xres_ref.dtype)          # x + x0 for the next iteration

        # vp for the next graph iteration: vp_net(mean over nodes of the pre-residual new x)
        m = jnp.sum(h, axis=1, keepdims=True) * inv_n            # [H, 1]
        v = _vp_net_cf(m, vpW_ref[...], vpP_ref[...])
        vpn_ref[0] = v.reshape(1, H).astype(vpn_ref.dtype)

    return kernel


def node_net_forward(p, x_cf, A, vp):
    B, H, N = x_cf.shape
    return pl.pallas_call(
        _make_node_kernel(N, H),
        out_shape=(jax.ShapeDtypeStruct((B, H, N), jnp.float32),
                   jax.ShapeDtypeStruct((B, H, N), jnp.float32),
                   jax.ShapeDtypeStruct((B, 1, H), jnp.float32)),
        grid=(B,),
        in_specs=[
            pl.BlockSpec((1, H, N), lambda b: (b, 0, 0)),
            pl.BlockSpec((1, N, N), lambda b: (b, 0, 0)),
            pl.BlockSpec((1, 1, H), lambda b: (b, 0, 0)),
            pl.BlockSpec((H, 4 * H), lambda b: (0, 0)),
            pl.BlockSpec((3, H, H), lambda b: (0, 0, 0)),
            pl.BlockSpec((4, H, 3), lambda b: (0, 0, 0)),
            pl.BlockSpec((3, H, H), lambda b: (0, 0, 0)),
            pl.BlockSpec((3, H, 3), lambda b: (0, 0, 0)),
        ],
        out_specs=(pl.BlockSpec((1, H, N), lambda b: (b, 0, 0)),
                   pl.BlockSpec((1, H, N), lambda b: (b, 0, 0)),
                   pl.BlockSpec((1, 1, H), lambda b: (b, 0, 0))),
        compiler_params=_compiler_params(("parallel",)),
    )(x_cf, A, vp, p["node_W1"], p["node_Wh"], p["node_P"], p["vp_W"], p["vp_P"])


# -----------------------------------------------------------------------------
# EdgeNetwork (fused, lane-dense [TI, H, N] intermediates, sigmoid in-kernel)
# -----------------------------------------------------------------------------
def _make_edge_kernel(TI, N, H):
    def kernel(x_ref, A_ref, vp_ref, W1_ref, Wh_ref, P_ref, o_ref):
        x_cf = x_ref[0].astype(jnp.float32)                      # [H, N]  all nodes j
        A_t = A_ref[0].astype(jnp.float32)                       # [TI, N] row tile of A
        vp = vp_ref[0].astype(jnp.float32)                       # [1, H]
        W1 = W1_ref[...]                                         # [H, 3H+1]: [x_j | x_i | vp | A]
        Wh = Wh_ref[...]                                         # [3, H, H]
        P = P_ref[...]                                           # [H, 8]: b1 b2 b3 b4 w5 b5 - -

        # column-node (j) contribution u[c, j]
        u = jnp.dot(W1[:, 0:H], x_cf, preferred_element_type=jnp.float32)        # [H, N]
        # per-graph vp + bias contribution (row vector over channels)
        vp_c = (lax.dot_general(vp, W1[:, 2 * H:3 * H], (((1,), (1,)), ((), ())),
                                preferred_element_type=jnp.float32)
                + P[:, 0:1].reshape(1, H))                                       # [1, H]
        # row-node (i) contribution: slice the row tile in-kernel (no extra xt operand / DMA)
        x_rm = jnp.transpose(x_cf)                                               # [N, H]
        if TI == N:
            xt = x_rm
        else:
            i0 = pl.multiple_of(pl.program_id(1) * TI, 8)
            xt = lax.dynamic_slice(x_rm, (i0, 0), (TI, H))                       # [TI, H]
        v_rows = lax.dot_general(xt, W1[:, H:2 * H], (((1,), (1,)), ((), ())),
                                 preferred_element_type=jnp.float32) + vp_c      # [TI, H]

        wA = W1[:, 3 * H:3 * H + 1].reshape(1, H, 1)
        # layer 1, built lane-dense as [TI, H, N] (never materialize [B, 3H+1, N, N])
        z1 = u[None, :, :] + v_rows[:, :, None] + A_t[:, None, :] * wA
        h = jnp.tanh(z1)                                                         # [TI, H, N]

        # layers 2..4: batched [H,H]@[H,N] MXU matmuls, keep N on lanes
        bn = (((2,), (1,)), ((0,), (0,)))
        for k in range(3):
            Wb = jnp.broadcast_to(Wh[k], (TI, H, H))
            h = jnp.tanh(lax.dot_general(Wb, h, bn, preferred_element_type=jnp.float32)
                         + P[:, k + 1:k + 2].reshape(1, H, 1))

        # layer 5 (H -> 1) as a batched matmul against w5 (no masked 8-lane reduce)
        w5b = jnp.broadcast_to(P[:, 4:5].reshape(1, 1, H), (TI, 1, H))
        logits = lax.dot_general(w5b, h, bn, preferred_element_type=jnp.float32)  # [TI, 1, N]
        logits = logits.reshape(TI, N) + P[0:1, 5:6]
        o_ref[0] = jax.nn.sigmoid(logits).astype(o_ref.dtype)

    return kernel


def edge_net_forward(p, x_cf, A, vp):
    B, H, N = x_cf.shape
    TI = _pick_edge_row_tile(N, H)
    return pl.pallas_call(
        _make_edge_kernel(TI, N, H),
        out_shape=jax.ShapeDtypeStruct((B, N, N), _A_DTYPE),
        grid=(B, N // TI),
        in_specs=[
            pl.BlockSpec((1, H, N), lambda b, i: (b, 0, 0)),
            pl.BlockSpec((1, TI, N), lambda b, i: (b, i, 0)),
            pl.BlockSpec((1, 1, H), lambda b, i: (b, 0, 0)),
            pl.BlockSpec((H, 3 * H + 1), lambda b, i: (0, 0)),
            pl.BlockSpec((3, H, H), lambda b, i: (0, 0, 0)),
            pl.BlockSpec((H, 8), lambda b, i: (0, 0)),
        ],
        out_specs=pl.BlockSpec((1, TI, N), lambda b, i: (b, i, 0)),
        compiler_params=_compiler_params(("parallel", "parallel")),
    )(x_cf, A, vp, p["edge_W1"], p["edge_Wh"], p["edge_P"])


# -----------------------------------------------------------------------------
# GNN forward (matches the PyTorch GNN module semantics)
# -----------------------------------------------------------------------------
def gnn_forward(p, x, A, n_graph_iters=3):
    x_cf, vp = input_net_forward(p, x)             # [B,H,N] channel-first, [B,1,H]
    A = A.astype(_A_DTYPE)
    for _ in range(n_graph_iters):
        x_new, x_res, vp_next = node_net_forward(p, x_cf, A, vp)
        A = edge_net_forward(p, x_new, A, vp)      # edge net uses the PREVIOUS vp (torch order)
        x_cf, vp = x_res, vp_next                  # residual + vp refresh were fused in the node kernel
    nodes = jnp.transpose(x_cf, (0, 2, 1))         # back to [B, N, H]
    return nodes, A.astype(jnp.float32)


# -----------------------------------------------------------------------------
# DenseGNNDiffpool forward (adjacency construction + GNN)
# -----------------------------------------------------------------------------
def dense_gnn_diffpool_forward(params, x_flat, edge_index, batch, batch_size,
                               n_graph_iters=3):
    n_hits = x_flat.shape[0] // batch_size
    x = x_flat.reshape(batch_size, n_hits, x_flat.shape[1])
    A = jnp.zeros((batch_size, n_hits, n_hits), jnp.float32)
    start, end = edge_index[0], edge_index[1]
    bidx = batch[start]
    A = A.at[bidx, start - n_hits * bidx, end - n_hits * bidx].set(1.0)
    nodes, A = gnn_forward(params, x, A, n_graph_iters)
    # TODO(synk): SoftPoolingGcnEncoder (diffpool head producing ip_pred) is not defined in the
    # reference source; returning the GNN node features and edge probabilities instead.
    return nodes, A


# -----------------------------------------------------------------------------
# Deterministic parameter init (torch default Linear/Conv init), packed layouts
# -----------------------------------------------------------------------------
def init_params(key, input_dim=3, hidden_dim=8):
    H = hidden_dim
    kit = iter(jax.random.split(key, 64))

    def w(fan_in, fan_out):
        bound = 1.0 / np.sqrt(fan_in)
        return jax.random.uniform(next(kit), (fan_out, fan_in), jnp.float32, -bound, bound)

    def bias(fan_in, fan_out):
        bound = 1.0 / np.sqrt(fan_in)
        return jax.random.uniform(next(kit), (fan_out,), jnp.float32, -bound, bound)

    def pcols(bvec, n):
        # columns: bias, gamma(=1), beta(=0)  -> [n, 3]
        return jnp.stack([bvec, jnp.ones((n,), jnp.float32),
                          jnp.zeros((n,), jnp.float32)], axis=1)

    # input_net: make_mlp(3, [H], output_activation=Tanh, layer_norm=True)
    in_W = w(input_dim, H)
    in_P = pcols(bias(input_dim, H), H)
    # vp_net: make_mlp(H, [H]*3, Tanh, Tanh, layer_norm=True)
    vp_W = jnp.stack([w(H, H) for _ in range(3)])
    vp_P = jnp.stack([pcols(bias(H, H), H) for _ in range(3)])
    # node_net: make_mlp(4H, [H]*4, Tanh, Tanh, layer_norm=True); input order [mi, mo, x, vp]
    node_W1 = w(4 * H, H)
    node_P = jnp.stack([pcols(bias(4 * H, H), H)] + [pcols(bias(H, H), H) for _ in range(3)])
    node_Wh = jnp.stack([w(H, H) for _ in range(3)])
    # edge_net: Conv2d(3H+1,H,1)+Tanh, 3x(Conv2d(H,H,1)+Tanh), Conv2d(H,1,1); sigmoid at GNN level
    edge_W1 = w(3 * H + 1, H)
    edge_b1 = bias(3 * H + 1, H)
    edge_Wh = jnp.stack([w(H, H) for _ in range(3)])
    edge_bh = [bias(H, H) for _ in range(3)]
    w5 = w(H, 1).reshape(H)
    b5 = bias(H, 1)
    edge_P = jnp.stack(
        [edge_b1, edge_bh[0], edge_bh[1], edge_bh[2], w5,
         jnp.full((H,), b5[0], jnp.float32),
         jnp.zeros((H,), jnp.float32), jnp.zeros((H,), jnp.float32)], axis=1)   # [H, 8]

    return {
        "in_W": in_W, "in_P": in_P,
        "vp_W": vp_W, "vp_P": vp_P,
        "node_W1": node_W1, "node_Wh": node_Wh, "node_P": node_P,
        "edge_W1": edge_W1, "edge_Wh": edge_Wh, "edge_P": edge_P,
    }


if __name__ == "__main__":
    key = jax.random.PRNGKey(0)
    k_param, k_x = jax.random.split(key)

    batch_size = 2     # graphs per batch
    n_hits = 8         # nodes per graph
    hidden_dim = 8     # GNN hidden dim
    in_dim = 3         # hit features (GNN input_dim=3)

    params = init_params(k_param, input_dim=in_dim, hidden_dim=hidden_dim)

    # flattened hits, as in the PyTorch forward: x is [batch_size * n_hits, 3]
    x_flat = jax.random.normal(k_x, (batch_size * n_hits, in_dim), jnp.float32)

    # deterministic edge_index: chain edges inside each graph (global node ids)
    starts, ends = [], []
    for g in range(batch_size):
        for i in range(n_hits - 1):
            starts.append(g * n_hits + i)
            ends.append(g * n_hits + i + 1)
    edge_index = jnp.array([starts, ends], dtype=jnp.int32)   # [2, E]
    batch = jnp.repeat(jnp.arange(batch_size, dtype=jnp.int32), n_hits)

    fwd = jax.jit(dense_gnn_diffpool_forward,
                  static_argnames=("batch_size", "n_graph_iters"))
    nodes, A_out = fwd(params, x_flat, edge_index, batch,
                       batch_size=batch_size, n_graph_iters=3)
    jax.block_until_ready((nodes, A_out))

    assert nodes.shape == (batch_size, n_hits, hidden_dim)
    assert A_out.shape == (batch_size, n_hits, n_hits)
    assert bool(jnp.all(jnp.isfinite(nodes))) and bool(jnp.all(jnp.isfinite(A_out)))
    assert bool(jnp.all(A_out >= 0.0)) and bool(jnp.all(A_out <= 1.0))
    print("KERNEL_OK")
</pallas_src>

<mosaic_0001>
module attributes {stable_mosaic.version = 11 : i64} {
  func.func @kernel(%arg0: i32, %arg1: memref<1x8x3xf32, #tpu.memory_space<vmem>>, %arg2: memref<8x3xf32, #tpu.memory_space<vmem>>, %arg3: memref<8x3xf32, #tpu.memory_space<vmem>>, %arg4: memref<3x8x8xf32, #tpu.memory_space<vmem>>, %arg5: memref<3x8x3xf32, #tpu.memory_space<vmem>>, %arg6: memref<1x8x8xf32, #tpu.memory_space<vmem>>, %arg7: memref<1x1x8xf32, #tpu.memory_space<vmem>>) attributes {dimension_semantics = [#tpu.dimension_semantics<parallel>], iteration_bounds = array<i64: 2>, scalar_prefetch = 0 : i64, scratch_operands = 0 : i64, tpu.core_type = #tpu.core_type<tc>, window_params = [{transform_indices = @transform_0, window_bounds = array<i64: 1, 8, 3>}, {pipeline_mode = #tpu.pipeline_mode<synchronous>, transform_indices = @transform_1, window_bounds = array<i64: 8, 3>}, {pipeline_mode = #tpu.pipeline_mode<synchronous>, transform_indices = @transform_2, window_bounds = array<i64: 8, 3>}, {pipeline_mode = #tpu.pipeline_mode<synchronous>, transform_indices = @transform_3, window_bounds = array<i64: 3, 8, 8>}, {pipeline_mode = #tpu.pipeline_mode<synchronous>, transform_indices = @transform_4, window_bounds = array<i64: 3, 8, 3>}, {transform_indices = @transform_5, window_bounds = array<i64: 1, 8, 8>}, {transform_indices = @transform_6, window_bounds = array<i64: 1, 1, 8>}]} {
    %c0 = arith.constant 0 : index
    %c0_0 = arith.constant 0 : index
    %c0_1 = arith.constant 0 : index
    %0 = vector.load %arg1[%c0, %c0_0, %c0_1] : memref<1x8x3xf32, #tpu.memory_space<vmem>>, vector<1x8x3xf32>
    %1 = vector.shape_cast %0 : vector<1x8x3xf32> to vector<8x3xf32>
    %c0_2 = arith.constant 0 : index
    %c0_3 = arith.constant 0 : index
    %2 = vector.load %arg2[%c0_2, %c0_3] : memref<8x3xf32, #tpu.memory_space<vmem>>, vector<8x3xf32>
    %c0_4 = arith.constant 0 : index
    %c0_5 = arith.constant 0 : index
    %3 = vector.load %arg3[%c0_4, %c0_5] : memref<8x3xf32, #tpu.memory_space<vmem>>, vector<8x3xf32>
    %cst = arith.constant dense<0.000000e+00> : vector<8x8xf32>
    %4 = tpu.matmul %2, %1, %cst {dimension_numbers = #tpu.dot_dimension_numbers<[1], [1], [0], [0], [0, 0, 1, 0], [], []>} : vector<8x3xf32>, vector<8x3xf32>, vector<8x8xf32> -> vector<8x8xf32>
    %5 = vector.extract_strided_slice %3 {offsets = [0, 0], sizes = [8, 1], strides = [1, 1]} : vector<8x3xf32> to vector<8x1xf32>
    %6 = vector.broadcast %5 : vector<8x1xf32> to vector<8x8xf32>
    %7 = arith.addf %4, %6 : vector<8x8xf32>
    %8 = vector.extract_strided_slice %3 {offsets = [0, 1], sizes = [8, 1], strides = [1, 1]} : vector<8x3xf32> to vector<8x1xf32>
    %9 = vector.extract_strided_slice %3 {offsets = [0, 2], sizes = [8, 1], strides = [1, 1]} : vector<8x3xf32> to vector<8x1xf32>
    %cst_6 = arith.constant 1.000000e+00 : f32
    %10 = vector.broadcast %cst_6 : f32 to vector<1x8xf32>
    %cst_7 = arith.constant dense<0.000000e+00> : vector<1x8xf32>
    %11 = tpu.matmul %10, %7, %cst_7 {dimension_numbers = #tpu.dot_dimension_numbers<[1], [0], [0], [1], [0, 0, 1, 1], [], []>} : vector<1x8xf32>, vector<8x8xf32>, vector<1x8xf32> -> vector<1x8xf32>
    %cst_8 = arith.constant 1.250000e-01 : f32
    %12 = vector.broadcast %cst_8 : f32 to vector<1x8xf32>
    %13 = arith.mulf %11, %12 : vector<1x8xf32>
    %14 = vector.broadcast %13 : vector<1x8xf32> to vector<8x8xf32>
    %15 = arith.subf %7, %14 : vector<8x8xf32>
    %16 = arith.mulf %15, %15 : vector<8x8xf32>
    %cst_9 = arith.constant dense<0.000000e+00> : vector<1x8xf32>
    %17 = tpu.matmul %10, %16, %cst_9 {dimension_numbers = #tpu.dot_dimension_numbers<[1], [0], [0], [1], [0, 0, 1, 1], [], []>} : vector<1x8xf32>, vector<8x8xf32>, vector<1x8xf32> -> vector<1x8xf32>
    %cst_10 = arith.constant 1.250000e-01 : f32
    %18 = vector.broadcast %cst_10 : f32 to vector<1x8xf32>
    %19 = arith.mulf %17, %18 : vector<1x8xf32>
    %cst_11 = arith.constant 9.99999974E-6 : f32
    %20 = vector.broadcast %cst_11 : f32 to vector<1x8xf32>
    %21 = arith.addf %19, %20 : vector<1x8xf32>
    %22 = math.rsqrt %21 : vector<1x8xf32>
    %23 = vector.broadcast %22 : vector<1x8xf32> to vector<8x8xf32>
    %24 = arith.mulf %15, %23 : vector<8x8xf32>
    %25 = vector.broadcast %8 : vector<8x1xf32> to vector<8x8xf32>
    %26 = arith.mulf %24, %25 : vector<8x8xf32>
    %27 = vector.broadcast %9 : vector<8x1xf32> to vector<8x8xf32>
    %28 = arith.addf %26, %27 : vector<8x8xf32>
    %29 = math.tanh %28 : vector<8x8xf32>
    %c0_12 = arith.constant 0 : index
    %c0_13 = arith.constant 0 : index
    %c0_14 = arith.constant 0 : index
    %30 = vector.load %arg6[%c0_12, %c0_13, %c0_14] : memref<1x8x8xf32, #tpu.memory_space<vmem>>, vector<1x8x8xf32>
    %31 = vector.shape_cast %30 : vector<1x8x8xf32> to vector<8x8xf32>
    %32 = vector.shape_cast %29 : vector<8x8xf32> to vector<1x8x8xf32>
    tpu.vector_store %arg6[%c0_12, %c0_13, %c0_14], %32 {strides = array<i32>} : memref<1x8x8xf32, #tpu.memory_space<vmem>>, vector<1x8x8xf32>,
    %cst_15 = arith.constant dense<0.000000e+00> : vector<8xf32>
    %33 = vector.multi_reduction <add>, %29, %cst_15 [1] : vector<8x8xf32> to vector<8xf32>
    %34 = vector.shape_cast %33 : vector<8xf32> to vector<8x1xf32>
    %cst_16 = arith.constant 1.250000e-01 : f32
    %35 = vector.broadcast %cst_16 : f32 to vector<8x1xf32>
    %36 = arith.mulf %34, %35 : vector<8x1xf32>
    %c0_17 = arith.constant 0 : index
    %c0_18 = arith.constant 0 : index
    %c0_19 = arith.constant 0 : index
    %37 = vector.load %arg4[%c0_17, %c0_18, %c0_19] : memref<3x8x8xf32, #tpu.memory_space<vmem>>, vector<3x8x8xf32>
    %c0_20 = arith.constant 0 : index
    %c0_21 = arith.constant 0 : index
    %c0_22 = arith.constant 0 : index
    %38 = vector.load %arg5[%c0_20, %c0_21, %c0_22] : memref<3x8x3xf32, #tpu.memory_space<vmem>>, vector<3x8x3xf32>
    %39 = vector.extract_strided_slice %37 {offsets = [0, 0, 0], sizes = [1, 8, 8], strides = [1, 1, 1]} : vector<3x8x8xf32> to vector<1x8x8xf32>
    %40 = vector.shape_cast %39 : vector<1x8x8xf32> to vector<8x8xf32>
    %cst_23 = arith.constant dense<0.000000e+00> : vector<8x1xf32>
    %41 = tpu.matmul %40, %36, %cst_23 {dimension_numbers = #tpu.dot_dimension_numbers<[1], [0], [0], [1], [0, 0, 1, 1], [], []>} : vector<8x8xf32>, vector<8x1xf32>, vector<8x1xf32> -> vector<8x1xf32>
    %42 = vector.extract_strided_slice %38 {offsets = [0, 0, 0], sizes = [1, 8, 3], strides = [1, 1, 1]} : vector<3x8x3xf32> to vector<1x8x3xf32>
    %43 = vector.shape_cast %42 : vector<1x8x3xf32> to vector<8x3xf32>
    %44 = vector.extract_strided_slice %43 {offsets = [0, 0], sizes = [8, 1], strides = [1, 1]} : vector<8x3xf32> to vector<8x1xf32>
    %45 = arith.addf %41, %44 : vector<8x1xf32>
    %46 = vector.extract_strided_slice %38 {offsets = [0, 0, 0], sizes = [1, 8, 3], strides = [1, 1, 1]} : vector<3x8x3xf32> to vector<1x8x3xf32>
    %47 = vector.shape_cast %46 : vector<1x8x3xf32> to vector<8x3xf32>
    %48 = vector.extract_strided_slice %47 {offsets = [0, 1], sizes = [8, 1], strides = [1, 1]} : vector<8x3xf32> to vector<8x1xf32>
    %49 = vector.extract_strided_slice %38 {offsets = [0, 0, 0], sizes = [1, 8, 3], strides = [1, 1, 1]} : vector<3x8x3xf32> to vector<1x8x3xf32>
    %50 = vector.shape_cast %49 : vector<1x8x3xf32> to vector<8x3xf32>
    %51 = vector.extract_strided_slice %50 {offsets = [0, 2], sizes = [8, 1], strides = [1, 1]} : vector<8x3xf32> to vector<8x1xf32>
    %cst_24 = arith.constant 1.000000e+00 : f32
    %52 = vector.broadcast %cst_24 : f32 to vector<1x8xf32>
    %cst_25 = arith.constant dense<0.000000e+00> : vector<1x1xf32>
    %53 = tpu.matmul %52, %45, %cst_25 {dimension_numbers = #tpu.dot_dimension_numbers<[1], [0], [0], [1], [0, 0, 1, 1], [], []>} : vector<1x8xf32>, vector<8x1xf32>, vector<1x1xf32> -> vector<1x1xf32>
    %cst_26 = arith.constant 1.250000e-01 : f32
    %54 = vector.broadcast %cst_26 : f32 to vector<1x1xf32>
    %55 = arith.mulf %53, %54 : vector<1x1xf32>
    %56 = vector.broadcast %55 : vector<1x1xf32> to vector<8x1xf32>
    %57 = arith.subf %45, %56 : vector<8x1xf32>
    %58 = arith.mulf %57, %57 : vector<8x1xf32>
    %cst_27 = arith.constant dense<0.000000e+00> : vector<1x1xf32>
    %59 = tpu.matmul %52, %58, %cst_27 {dimension_numbers = #tpu.dot_dimension_numbers<[1], [0], [0], [1], [0, 0, 1, 1], [], []>} : vector<1x8xf32>, vector<8x1xf32>, vector<1x1xf32> -> vector<1x1xf32>
    %cst_28 = arith.constant 1.250000e-01 : f32
    %60 = vector.broadcast %cst_28 : f32 to vector<1x1xf32>
    %61 = arith.mulf %59, %60 : vector<1x1xf32>
    %cst_29 = arith.constant 9.99999974E-6 : f32
    %62 = vector.broadcast %cst_29 : f32 to vector<1x1xf32>
    %63 = arith.addf %61, %62 : vector<1x1xf32>
    %64 = math.rsqrt %63 : vector<1x1xf32>
    %65 = vector.broadcast %64 : vector<1x1xf32> to vector<8x1xf32>
    %66 = arith.mulf %57, %65 : vector<8x1xf32>
    %67 = arith.mulf %66, %48 : vector<8x1xf32>
    %68 = arith.addf %67, %51 : vector<8x1xf32>
    %69 = math.tanh %68 : vector<8x1xf32>
    %70 = vector.extract_strided_slice %37 {offsets = [1, 0, 0], sizes = [1, 8, 8], strides = [1, 1, 1]} : vector<3x8x8xf32> to vector<1x8x8xf32>
    %71 = vector.shape_cast %70 : vector<1x8x8xf32> to vector<8x8xf32>
    %cst_30 = arith.constant dense<0.000000e+00> : vector<8x1xf32>
    %72 = tpu.matmul %71, %69, %cst_30 {dimension_numbers = #tpu.dot_dimension_numbers<[1], [0], [0], [1], [0, 0, 1, 1], [], []>} : vector<8x8xf32>, vector<8x1xf32>, vector<8x1xf32> -> vector<8x1xf32>
    %73 = vector.extract_strided_slice %38 {offsets = [1, 0, 0], sizes = [1, 8, 3], strides = [1, 1, 1]} : vector<3x8x3xf32> to vector<1x8x3xf32>
    %74 = vector.shape_cast %73 : vector<1x8x3xf32> to vector<8x3xf32>
    %75 = vector.extract_strided_slice %74 {offsets = [0, 0], sizes = [8, 1], strides = [1, 1]} : vector<8x3xf32> to vector<8x1xf32>
    %76 = arith.addf %72, %75 : vector<8x1xf32>
    %77 = vector.extract_strided_slice %38 {offsets = [1, 0, 0], sizes = [1, 8, 3], strides = [1, 1, 1]} : vector<3x8x3xf32> to vector<1x8x3xf32>
    %78 = vector.shape_cast %77 : vector<1x8x3xf32> to vector<8x3xf32>
    %79 = vector.extract_strided_slice %78 {offsets = [0, 1], sizes = [8, 1], strides = [1, 1]} : vector<8x3xf32> to vector<8x1xf32>
    %80 = vector.extract_strided_slice %38 {offsets = [1, 0, 0], sizes = [1, 8, 3], strides = [1, 1, 1]} : vector<3x8x3xf32> to vector<1x8x3xf32>
    %81 = vector.shape_cast %80 : vector<1x8x3xf32> to vector<8x3xf32>
    %82 = vector.extract_strided_slice %81 {offsets = [0, 2], sizes = [8, 1], strides = [1, 1]} : vector<8x3xf32> to vector<8x1xf32>
    %cst_31 = arith.constant 1.000000e+00 : f32
    %83 = vector.broadcast %cst_31 : f32 to vector<1x8xf32>
    %cst_32 = arith.constant dense<0.000000e+00> : vector<1x1xf32>
    %84 = tpu.matmul %83, %76, %cst_32 {dimension_numbers = #tpu.dot_dimension_numbers<[1], [0], [0], [1], [0, 0, 1, 1], [], []>} : vector<1x8xf32>, vector<8x1xf32>, vector<1x1xf32> -> vector<1x1xf32>
    %cst_33 = arith.constant 1.250000e-01 : f32
    %85 = vector.broadcast %cst_33 : f32 to vector<1x1xf32>
    %86 = arith.mulf %84, %85 : vector<1x1xf32>
    %87 = vector.broadcast %86 : vector<1x1xf32> to vector<8x1xf32>
    %88 = arith.subf %76, %87 : vector<8x1xf32>
    %89 = arith.mulf %88, %88 : vector<8x1xf32>
    %cst_34 = arith.constant dense<0.000000e+00> : vector<1x1xf32>
    %90 = tpu.matmul %83, %89, %cst_34 {dimension_numbers = #tpu.dot_dimension_numbers<[1], [0], [0], [1], [0, 0, 1, 1], [], []>} : vector<1x8xf32>, vector<8x1xf32>, vector<1x1xf32> -> vector<1x1xf32>
    %cst_35 = arith.constant 1.250000e-01 : f32
    %91 = vector.broadcast %cst_35 : f32 to vector<1x1xf32>
    %92 = arith.mulf %90, %91 : vector<1x1xf32>
    %cst_36 = arith.constant 9.99999974E-6 : f32
    %93 = vector.broadcast %cst_36 : f32 to vector<1x1xf32>
    %94 = arith.addf %92, %93 : vector<1x1xf32>
    %95 = math.rsqrt %94 : vector<1x1xf32>
    %96 = vector.broadcast %95 : vector<1x1xf32> to vector<8x1xf32>
    %97 = arith.mulf %88, %96 : vector<8x1xf32>
    %98 = arith.mulf %97, %79 : vector<8x1xf32>
    %99 = arith.addf %98, %82 : vector<8x1xf32>
    %100 = math.tanh %99 : vector<8x1xf32>
    %101 = vector.extract_strided_slice %37 {offsets = [2, 0, 0], sizes = [1, 8, 8], strides = [1, 1, 1]} : vector<3x8x8xf32> to vector<1x8x8xf32>
    %102 = vector.shape_cast %101 : vector<1x8x8xf32> to vector<8x8xf32>
    %cst_37 = arith.constant dense<0.000000e+00> : vector<8x1xf32>
    %103 = tpu.matmul %102, %100, %cst_37 {dimension_numbers = #tpu.dot_dimension_numbers<[1], [0], [0], [1], [0, 0, 1, 1], [], []>} : vector<8x8xf32>, vector<8x1xf32>, vector<8x1xf32> -> vector<8x1xf32>
    %104 = vector.extract_strided_slice %38 {offsets = [2, 0, 0], sizes = [1, 8, 3], strides = [1, 1, 1]} : vector<3x8x3xf32> to vector<1x8x3xf32>
    %105 = vector.shape_cast %104 : vector<1x8x3xf32> to vector<8x3xf32>
    %106 = vector.extract_strided_slice %105 {offsets = [0, 0], sizes = [8, 1], strides = [1, 1]} : vector<8x3xf32> to vector<8x1xf32>
    %107 = arith.addf %103, %106 : vector<8x1xf32>
    %108 = vector.extract_strided_slice %38 {offsets = [2, 0, 0], sizes = [1, 8, 3], strides = [1, 1, 1]} : vector<3x8x3xf32> to vector<1x8x3xf32>
    %109 = vector.shape_cast %108 : vector<1x8x3xf32> to vector<8x3xf32>
    %110 = vector.extract_strided_slice %109 {offsets = [0, 1], sizes = [8, 1], strides = [1, 1]} : vector<8x3xf32> to vector<8x1xf32>
    %111 = vector.extract_strided_slice %38 {offsets = [2, 0, 0], sizes = [1, 8, 3], strides = [1, 1, 1]} : vector<3x8x3xf32> to vector<1x8x3xf32>
    %112 = vector.shape_cast %111 : vector<1x8x3xf32> to vector<8x3xf32>
    %113 = vector.extract_strided_slice %112 {offsets = [0, 2], sizes = [8, 1], strides = [1, 1]} : vector<8x3xf32> to vector<8x1xf32>
    %cst_38 = arith.constant 1.000000e+00 : f32
    %114 = vector.broadcast %cst_38 : f32 to vector<1x8xf32>
    %cst_39 = arith.constant dense<0.000000e+00> : vector<1x1xf32>
    %115 = tpu.matmul %114, %107, %cst_39 {dimension_numbers = #tpu.dot_dimension_numbers<[1], [0], [0], [1], [0, 0, 1, 1], [], []>} : vector<1x8xf32>, vector<8x1xf32>, vector<1x1xf32> -> vector<1x1xf32>
    %cst_40 = arith.constant 1.250000e-01 : f32
    %116 = vector.broadcast %cst_40 : f32 to vector<1x1xf32>
    %117 = arith.mulf %115, %116 : vector<1x1xf32>
    %118 = vector.broadcast %117 : vector<1x1xf32> to vector<8x1xf32>
    %119 = arith.subf %107, %118 : vector<8x1xf32>
    %120 = arith.mulf %119, %119 : vector<8x1xf32>
    %cst_41 = arith.constant dense<0.000000e+00> : vector<1x1xf32>
    %121 = tpu.matmul %114, %120, %cst_41 {dimension_numbers = #tpu.dot_dimension_numbers<[1], [0], [0], [1], [0, 0, 1, 1], [], []>} : vector<1x8xf32>, vector<8x1xf32>, vector<1x1xf32> -> vector<1x1xf32>
    %cst_42 = arith.constant 1.250000e-01 : f32
    %122 = vector.broadcast %cst_42 : f32 to vector<1x1xf32>
    %123 = arith.mulf %121, %122 : vector<1x1xf32>
    %cst_43 = arith.constant 9.99999974E-6 : f32
    %124 = vector.broadcast %cst_43 : f32 to vector<1x1xf32>
    %125 = arith.addf %123, %124 : vector<1x1xf32>
    %126 = math.rsqrt %125 : vector<1x1xf32>
    %127 = vector.broadcast %126 : vector<1x1xf32> to vector<8x1xf32>
    %128 = arith.mulf %119, %127 : vector<8x1xf32>
    %129 = arith.mulf %128, %110 : vector<8x1xf32>
    %130 = arith.addf %129, %113 : vector<8x1xf32>
    %131 = math.tanh %130 : vector<8x1xf32>
    %132 = vector.shape_cast %131 : vector<8x1xf32> to vector<1x8xf32>
    %c0_44 = arith.constant 0 : index
    %c0_45 = arith.constant 0 : index
    %c0_46 = arith.constant 0 : index
    %133 = vector.load %arg7[%c0_44, %c0_45, %c0_46] : memref<1x1x8xf32, #tpu.memory_space<vmem>>, vector<1x1x8xf32>
    %134 = vector.shape_cast %133 : vector<1x1x8xf32> to vector<1x8xf32>
    %135 = vector.shape_cast %132 : vector<1x8xf32> to vector<1x1x8xf32>
    tpu.vector_store %arg7[%c0_44, %c0_45, %c0_46], %135 {strides = array<i32>} : memref<1x1x8xf32, #tpu.memory_space<vmem>>, vector<1x1x8xf32>,
    return
  }
  func.func @transform_0(%arg0: i32) -> (i32, i32, i32) {
    %c0_i32 = arith.constant 0 : i32
    %c0_i32_0 = arith.constant 0 : i32
    %c0_i32_1 = arith.constant 0 : i32
    return %arg0, %c0_i32, %c0_i32_0 : i32, i32, i32
  }
  func.func @transform_1(%arg0: i32) -> (i32, i32) {
    %c0_i32 = arith.constant 0 : i32
    %c0_i32_0 = arith.constant 0 : i32
    %c0_i32_1 = arith.constant 0 : i32
    return %c0_i32, %c0_i32_0 : i32, i32
  }
  func.func @transform_2(%arg0: i32) -> (i32, i32) {
    %c0_i32 = arith.constant 0 : i32
    %c0_i32_0 = arith.constant 0 : i32
    %c0_i32_1 = arith.constant 0 : i32
    return %c0_i32, %c0_i32_0 : i32, i32
  }
  func.func @transform_3(%arg0: i32) -> (i32, i32, i32) {
    %c0_i32 = arith.constant 0 : i32
    %c0_i32_0 = arith.constant 0 : i32
    %c0_i32_1 = arith.constant 0 : i32
    %c0_i32_2 = arith.constant 0 : i32
    return %c0_i32, %c0_i32_0, %c0_i32_1 : i32, i32, i32
  }
  func.func @transform_4(%arg0: i32) -> (i32, i32, i32) {
    %c0_i32 = arith.constant 0 : i32
    %c0_i32_0 = arith.constant 0 : i32
    %c0_i32_1 = arith.constant 0 : i32
    %c0_i32_2 = arith.constant 0 : i32
    return %c0_i32, %c0_i32_0, %c0_i32_1 : i32, i32, i32
  }
  func.func @transform_5(%arg0: i32) -> (i32, i32, i32) {
    %c0_i32 = arith.constant 0 : i32
    %c0_i32_0 = arith.constant 0 : i32
    %c0_i32_1 = arith.constant 0 : i32
    return %arg0, %c0_i32, %c0_i32_0 : i32, i32, i32
  }
  func.func @transform_6(%arg0: i32) -> (i32, i32, i32) {
    %c0_i32 = arith.constant 0 : i32
    %c0_i32_0 = arith.constant 0 : i32
    %c0_i32_1 = arith.constant 0 : i32
    return %arg0, %c0_i32, %c0_i32_0 : i32, i32, i32
  }
}

module attributes {stable_mosaic.version = 11 : i64} {
  func.func @kernel(%arg0: i32, %arg1: i32, %arg2: memref<1x8x8xf32, #tpu.memory_space<vmem>>, %arg3: memref<1x8x8xbf16, #tpu.memory_space<vmem>>, %arg4: memref<1x1x8xf32, #tpu.memory_space<vmem>>, %arg5: memref<8x25xf32, #tpu.memory_space<vmem>>, %arg6: memref<3x8x8xf32, #tpu.memory_space<vmem>>, %arg7: memref<8x8xf32, #tpu.memory_space<vmem>>, %arg8: memref<1x8x8xbf16, #tpu.memory_space<vmem>>) attributes {dimension_semantics = [#tpu.dimension_semantics<parallel>, #tpu.dimension_semantics<parallel>], iteration_bounds = array<i64: 2, 1>, scalar_prefetch = 0 : i64, scratch_operands = 0 : i64, tpu.core_type = #tpu.core_type<tc>, window_params = [{transform_indices = @transform_0, window_bounds = array<i64: 1, 8, 8>}, {transform_indices = @transform_1, window_bounds = array<i64: 1, 8, 8>}, {transform_indices = @transform_2, window_bounds = array<i64: 1, 1, 8>}, {pipeline_mode = #tpu.pipeline_mode<synchronous>, transform_indices = @transform_3, window_bounds = array<i64: 8, 25>}, {pipeline_mode = #tpu.pipeline_mode<synchronous>, transform_indices = @transform_4, window_bounds = array<i64: 3, 8, 8>}, {pipeline_mode = #tpu.pipeline_mode<synchronous>, transform_indices = @transform_5, window_bounds = array<i64: 8, 8>}, {transform_indices = @transform_6, window_bounds = array<i64: 1, 8, 8>}]} {
    %c0 = arith.constant 0 : index
    %c0_0 = arith.constant 0 : index
    %c0_1 = arith.constant 0 : index
    %0 = vector.load %arg2[%c0, %c0_0, %c0_1] : memref<1x8x8xf32, #tpu.memory_space<vmem>>, vector<1x8x8xf32>
    %1 = vector.shape_cast %0 : vector<1x8x8xf32> to vector<8x8xf32>
    %c0_2 = arith.constant 0 : index
    %c0_3 = arith.constant 0 : index
    %c0_4 = arith.constant 0 : index
    %2 = vector.load %arg3[%c0_2, %c0_3, %c0_4] : memref<1x8x8xbf16, #tpu.memory_space<vmem>>, vector<1x8x8xbf16>
    %3 = vector.shape_cast %2 : vector<1x8x8xbf16> to vector<8x8xbf16>
    %4 = arith.extf %3 : vector<8x8xbf16> to vector<8x8xf32>
    %c0_5 = arith.constant 0 : index
    %c0_6 = arith.constant 0 : index
    %c0_7 = arith.constant 0 : index
    %5 = vector.load %arg4[%c0_5, %c0_6, %c0_7] : memref<1x1x8xf32, #tpu.memory_space<vmem>>, vector<1x1x8xf32>
    %6 = vector.shape_cast %5 : vector<1x1x8xf32> to vector<1x8xf32>
    %c0_8 = arith.constant 0 : index
    %c0_9 = arith.constant 0 : index
    %7 = vector.load %arg5[%c0_8, %c0_9] : memref<8x25xf32, #tpu.memory_space<vmem>>, vector<8x25xf32>
    %c0_10 = arith.constant 0 : index
    %c0_11 = arith.constant 0 : index
    %c0_12 = arith.constant 0 : index
    %8 = vector.load %arg6[%c0_10, %c0_11, %c0_12] : memref<3x8x8xf32, #tpu.memory_space<vmem>>, vector<3x8x8xf32>
    %c0_13 = arith.constant 0 : index
    %c0_14 = arith.constant 0 : index
    %9 = vector.load %arg7[%c0_13, %c0_14] : memref<8x8xf32, #tpu.memory_space<vmem>>, vector<8x8xf32>
    %10 = vector.extract_strided_slice %7 {offsets = [0, 0], sizes = [8, 8], strides = [1, 1]} : vector<8x25xf32> to vector<8x8xf32>
    %cst = arith.constant dense<0.000000e+00> : vector<8x8xf32>
    %11 = tpu.matmul %10, %1, %cst {dimension_numbers = #tpu.dot_dimension_numbers<[1], [0], [0], [1], [0, 0, 1, 1], [], []>} : vector<8x8xf32>, vector<8x8xf32>, vector<8x8xf32> -> vector<8x8xf32>
    %12 = vector.extract_strided_slice %7 {offsets = [0, 16], sizes = [8, 8], strides = [1, 1]} : vector<8x25xf32> to vector<8x8xf32>
    %cst_15 = arith.constant dense<0.000000e+00> : vector<1x8xf32>
    %13 = tpu.matmul %6, %12, %cst_15 {dimension_numbers = #tpu.dot_dimension_numbers<[1], [1], [0], [0], [0, 0, 1, 0], [], []>} : vector<1x8xf32>, vector<8x8xf32>, vector<1x8xf32> -> vector<1x8xf32>
    %14 = vector.extract_strided_slice %9 {offsets = [0, 0], sizes = [8, 1], strides = [1, 1]} : vector<8x8xf32> to vector<8x1xf32>
    %15 = vector.shape_cast %14 : vector<8x1xf32> to vector<1x8xf32>
    %16 = arith.addf %13, %15 : vector<1x8xf32>
    %17 = tpu.transpose %1, [1, 0] : vector<8x8xf32> -> vector<8x8xf32>
    %18 = vector.extract_strided_slice %7 {offsets = [0, 8], sizes = [8, 8], strides = [1, 1]} : vector<8x25xf32> to vector<8x8xf32>
    %cst_16 = arith.constant dense<0.000000e+00> : vector<8x8xf32>
    %19 = tpu.matmul %17, %18, %cst_16 {dimension_numbers = #tpu.dot_dimension_numbers<[1], [1], [0], [0], [0, 0, 1, 0], [], []>} : vector<8x8xf32>, vector<8x8xf32>, vector<8x8xf32> -> vector<8x8xf32>
    %20 = vector.broadcast %16 : vector<1x8xf32> to vector<8x8xf32>
    %21 = arith.addf %19, %20 : vector<8x8xf32>
    %22 = vector.extract_strided_slice %7 {offsets = [0, 24], sizes = [8, 1], strides = [1, 1]} : vector<8x25xf32> to vector<8x1xf32>
    %23 = vector.shape_cast %22 : vector<8x1xf32> to vector<1x8x1xf32>
    %24 = vector.shape_cast %11 : vector<8x8xf32> to vector<1x8x8xf32>
    %25 = vector.shape_cast %21 : vector<8x8xf32> to vector<8x8x1xf32>
    %26 = vector.broadcast %24 : vector<1x8x8xf32> to vector<8x8x8xf32>
    %27 = vector.broadcast %25 : vector<8x8x1xf32> to vector<8x8x8xf32>
    %28 = arith.addf %26, %27 : vector<8x8x8xf32>
    %29 = vector.shape_cast %4 : vector<8x8xf32> to vector<8x1x8xf32>
    %30 = vector.broadcast %29 : vector<8x1x8xf32> to vector<8x8x8xf32>
    %31 = vector.broadcast %23 : vector<1x8x1xf32> to vector<8x8x8xf32>
    %32 = arith.mulf %30, %31 : vector<8x8x8xf32>
    %33 = arith.addf %28, %32 : vector<8x8x8xf32>
    %34 = math.tanh %33 : vector<8x8x8xf32>
    %35 = vector.extract_strided_slice %8 {offsets = [0, 0, 0], sizes = [1, 8, 8], strides = [1, 1, 1]} : vector<3x8x8xf32> to vector<1x8x8xf32>
    %36 = vector.shape_cast %35 : vector<1x8x8xf32> to vector<8x8xf32>
    %37 = vector.shape_cast %36 : vector<8x8xf32> to vector<1x8x8xf32>
    %38 = vector.broadcast %37 : vector<1x8x8xf32> to vector<8x8x8xf32>
    %cst_17 = arith.constant dense<0.000000e+00> : vector<8x8x8xf32>
    %39 = tpu.matmul %38, %34, %cst_17 {dimension_numbers = #tpu.dot_dimension_numbers<[2], [1], [1], [2], [0, 0, 0, 1, 1, 2], [0], [0]>} : vector<8x8x8xf32>, vector<8x8x8xf32>, vector<8x8x8xf32> -> vector<8x8x8xf32>
    %40 = vector.extract_strided_slice %9 {offsets = [0, 1], sizes = [8, 1], strides = [1, 1]} : vector<8x8xf32> to vector<8x1xf32>
    %41 = vector.shape_cast %40 : vector<8x1xf32> to vector<1x8x1xf32>
    %42 = vector.broadcast %41 : vector<1x8x1xf32> to vector<8x8x8xf32>
    %43 = arith.addf %39, %42 : vector<8x8x8xf32>
    %44 = math.tanh %43 : vector<8x8x8xf32>
    %45 = vector.extract_strided_slice %8 {offsets = [1, 0, 0], sizes = [1, 8, 8], strides = [1, 1, 1]} : vector<3x8x8xf32> to vector<1x8x8xf32>
    %46 = vector.shape_cast %45 : vector<1x8x8xf32> to vector<8x8xf32>
    %47 = vector.shape_cast %46 : vector<8x8xf32> to vector<1x8x8xf32>
    %48 = vector.broadcast %47 : vector<1x8x8xf32> to vector<8x8x8xf32>
    %cst_18 = arith.constant dense<0.000000e+00> : vector<8x8x8xf32>
    %49 = tpu.matmul %48, %44, %cst_18 {dimension_numbers = #tpu.dot_dimension_numbers<[2], [1], [1], [2], [0, 0, 0, 1, 1, 2], [0], [0]>} : vector<8x8x8xf32>, vector<8x8x8xf32>, vector<8x8x8xf32> -> vector<8x8x8xf32>
    %50 = vector.extract_strided_slice %9 {offsets = [0, 2], sizes = [8, 1], strides = [1, 1]} : vector<8x8xf32> to vector<8x1xf32>
    %51 = vector.shape_cast %50 : vector<8x1xf32> to vector<1x8x1xf32>
    %52 = vector.broadcast %51 : vector<1x8x1xf32> to vector<8x8x8xf32>
    %53 = arith.addf %49, %52 : vector<8x8x8xf32>
    %54 = math.tanh %53 : vector<8x8x8xf32>
    %55 = vector.extract_strided_slice %8 {offsets = [2, 0, 0], sizes = [1, 8, 8], strides = [1, 1, 1]} : vector<3x8x8xf32> to vector<1x8x8xf32>
    %56 = vector.shape_cast %55 : vector<1x8x8xf32> to vector<8x8xf32>
    %57 = vector.shape_cast %56 : vector<8x8xf32> to vector<1x8x8xf32>
    %58 = vector.broadcast %57 : vector<1x8x8xf32> to vector<8x8x8xf32>
    %cst_19 = arith.constant dense<0.000000e+00> : vector<8x8x8xf32>
    %59 = tpu.matmul %58, %54, %cst_19 {dimension_numbers = #tpu.dot_dimension_numbers<[2], [1], [1], [2], [0, 0, 0, 1, 1, 2], [0], [0]>} : vector<8x8x8xf32>, vector<8x8x8xf32>, vector<8x8x8xf32> -> vector<8x8x8xf32>
    %60 = vector.extract_strided_slice %9 {offsets = [0, 3], sizes = [8, 1], strides = [1, 1]} : vector<8x8xf32> to vector<8x1xf32>
    %61 = vector.shape_cast %60 : vector<8x1xf32> to vector<1x8x1xf32>
    %62 = vector.broadcast %61 : vector<1x8x1xf32> to vector<8x8x8xf32>
    %63 = arith.addf %59, %62 : vector<8x8x8xf32>
    %64 = math.tanh %63 : vector<8x8x8xf32>
    %65 = vector.extract_strided_slice %9 {offsets = [0, 4], sizes = [8, 1], strides = [1, 1]} : vector<8x8xf32> to vector<8x1xf32>
    %66 = vector.shape_cast %65 : vector<8x1xf32> to vector<1x1x8xf32>
    %67 = vector.shape_cast %66 : vector<1x1x8xf32> to vector<1x1x8xf32>
    %68 = vector.broadcast %67 : vector<1x1x8xf32> to vector<8x1x8xf32>
    %cst_20 = arith.constant dense<0.000000e+00> : vector<8x1x8xf32>
    %69 = tpu.matmul %68, %64, %cst_20 {dimension_numbers = #tpu.dot_dimension_numbers<[2], [1], [1], [2], [0, 0, 0, 1, 1, 2], [0], [0]>} : vector<8x1x8xf32>, vector<8x8x8xf32>, vector<8x1x8xf32> -> vector<8x1x8xf32>
    %70 = vector.shape_cast %69 : vector<8x1x8xf32> to vector<8x8xf32>
    %71 = vector.extract_strided_slice %9 {offsets = [0, 5], sizes = [1, 1], strides = [1, 1]} : vector<8x8xf32> to vector<1x1xf32>
    %72 = vector.broadcast %71 : vector<1x1xf32> to vector<8x8xf32>
    %73 = arith.addf %70, %72 : vector<8x8xf32>
    %74 = arith.negf %73 : vector<8x8xf32>
    %75 = math.exp %74 : vector<8x8xf32>
    %cst_21 = arith.constant 1.000000e+00 : f32
    %76 = vector.broadcast %cst_21 : f32 to vector<8x8xf32>
    %77 = arith.addf %76, %75 : vector<8x8xf32>
    %78 = arith.divf %76, %77 : vector<8x8xf32>
    %79 = arith.truncf %78 : vector<8x8xf32> to vector<8x8xbf16>
    %c0_22 = arith.constant 0 : index
    %c0_23 = arith.constant 0 : index
    %c0_24 = arith.constant 0 : index
    %80 = vector.load %arg8[%c0_22, %c0_23, %c0_24] : memref<1x8x8xbf16, #tpu.memory_space<vmem>>, vector<1x8x8xbf16>
    %81 = vector.shape_cast %80 : vector<1x8x8xbf16> to vector<8x8xbf16>
    %82 = vector.shape_cast %79 : vector<8x8xbf16> to vector<1x8x8xbf16>
    tpu.vector_store %arg8[%c0_22, %c0_23, %c0_24], %82 {strides = array<i32>} : memref<1x8x8xbf16, #tpu.memory_space<vmem>>, vector<1x8x8xbf16>,
    return
  }
  func.func @transform_0(%arg0: i32, %arg1: i32) -> (i32, i32, i32) {
    %c0_i32 = arith.constant 0 : i32
    %c0_i32_0 = arith.constant 0 : i32
    %c0_i32_1 = arith.constant 0 : i32
    return %arg0, %c0_i32, %c0_i32_0 : i32, i32, i32
  }
  func.func @transform_1(%arg0: i32, %arg1: i32) -> (i32, i32, i32) {
    %c0_i32 = arith.constant 0 : i32
    %c0_i32_0 = arith.constant 0 : i32
    return %arg0, %arg1, %c0_i32 : i32, i32, i32
  }
  func.func @transform_2(%arg0: i32, %arg1: i32) -> (i32, i32, i32) {
    %c0_i32 = arith.constant 0 : i32
    %c0_i32_0 = arith.constant 0 : i32
    %c0_i32_1 = arith.constant 0 : i32
    return %arg0, %c0_i32, %c0_i32_0 : i32, i32, i32
  }
  func.func @transform_3(%arg0: i32, %arg1: i32) -> (i32, i32) {
    %c0_i32 = arith.constant 0 : i32
    %c0_i32_0 = arith.constant 0 : i32
    %c0_i32_1 = arith.constant 0 : i32
    return %c0_i32, %c0_i32_0 : i32, i32
  }
  func.func @transform_4(%arg0: i32, %arg1: i32) -> (i32, i32, i32) {
    %c0_i32 = arith.constant 0 : i32
    %c0_i32_0 = arith.constant 0 : i32
    %c0_i32_1 = arith.constant 0 : i32
    %c0_i32_2 = arith.constant 0 : i32
    return %c0_i32, %c0_i32_0, %c0_i32_1 : i32, i32, i32
  }
  func.func @transform_5(%arg0: i32, %arg1: i32) -> (i32, i32) {
    %c0_i32 = arith.constant 0 : i32
    %c0_i32_0 = arith.constant 0 : i32
    %c0_i32_1 = arith.constant 0 : i32
    return %c0_i32, %c0_i32_0 : i32, i32
  }
  func.func @transform_6(%arg0: i32, %arg1: i32) -> (i32, i32, i32) {
    %c0_i32 = arith.constant 0 : i32
    %c0_i32_0 = arith.constant 0 : i32
    return %arg0, %arg1, %c0_i32 : i32, i32, i32
  }
}

module attributes {stable_mosaic.version = 11 : i64} {
  func.func @kernel(%arg0: i32, %arg1: memref<1x8x8xf32, #tpu.memory_space<vmem>>, %arg2: memref<1x8x8xbf16, #tpu.memory_space<vmem>>, %arg3: memref<1x1x8xf32, #tpu.memory_space<vmem>>, %arg4: memref<8x32xf32, #tpu.memory_space<vmem>>, %arg5: memref<3x8x8xf32, #tpu.memory_space<vmem>>, %arg6: memref<4x8x3xf32, #tpu.memory_space<vmem>>, %arg7: memref<3x8x8xf32, #tpu.memory_space<vmem>>, %arg8: memref<3x8x3xf32, #tpu.memory_space<vmem>>, %arg9: memref<1x8x8xf32, #tpu.memory_space<vmem>>, %arg10: memref<1x8x8xf32, #tpu.memory_space<vmem>>, %arg11: memref<1x1x8xf32, #tpu.memory_space<vmem>>) attributes {dimension_semantics = [#tpu.dimension_semantics<parallel>], iteration_bounds = array<i64: 2>, scalar_prefetch = 0 : i64, scratch_operands = 0 : i64, tpu.core_type = #tpu.core_type<tc>, window_params = [{transform_indices = @transform_0, window_bounds = array<i64: 1, 8, 8>}, {transform_indices = @transform_1, window_bounds = array<i64: 1, 8, 8>}, {transform_indices = @transform_2, window_bounds = array<i64: 1, 1, 8>}, {pipeline_mode = #tpu.pipeline_mode<synchronous>, transform_indices = @transform_3, window_bounds = array<i64: 8, 32>}, {pipeline_mode = #tpu.pipeline_mode<synchronous>, transform_indices = @transform_4, window_bounds = array<i64: 3, 8, 8>}, {pipeline_mode = #tpu.pipeline_mode<synchronous>, transform_indices = @transform_5, window_bounds = array<i64: 4, 8, 3>}, {pipeline_mode = #tpu.pipeline_mode<synchronous>, transform_indices = @transform_6, window_bounds = array<i64: 3, 8, 8>}, {pipeline_mode = #tpu.pipeline_mode<synchronous>, transform_indices = @transform_7, window_bounds = array<i64: 3, 8, 3>}, {transform_indices = @transform_8, window_bounds = array<i64: 1, 8, 8>}, {transform_indices = @transform_9, window_bounds = array<i64: 1, 8, 8>}, {transform_indices = @transform_10, window_bounds = array<i64: 1, 1, 8>}]} {
    %c0 = arith.constant 0 : index
    %c0_0 = arith.constant 0 : index
    %c0_1 = arith.constant 0 : index
    %0 = vector.load %arg1[%c0, %c0_0, %c0_1] : memref<1x8x8xf32, #tpu.memory_space<vmem>>, vector<1x8x8xf32>
    %1 = vector.shape_cast %0 : vector<1x8x8xf32> to vector<8x8xf32>
    %c0_2 = arith.constant 0 : index
    %c0_3 = arith.constant 0 : index
    %c0_4 = arith.constant 0 : index
    %2 = vector.load %arg2[%c0_2, %c0_3, %c0_4] : memref<1x8x8xbf16, #tpu.memory_space<vmem>>, vector<1x8x8xbf16>
    %3 = vector.shape_cast %2 : vector<1x8x8xbf16> to vector<8x8xbf16>
    %4 = arith.extf %3 : vector<8x8xbf16> to vector<8x8xf32>
    %c0_5 = arith.constant 0 : index
    %c0_6 = arith.constant 0 : index
    %c0_7 = arith.constant 0 : index
    %5 = vector.load %arg3[%c0_5, %c0_6, %c0_7] : memref<1x1x8xf32, #tpu.memory_space<vmem>>, vector<1x1x8xf32>
    %6 = vector.shape_cast %5 : vector<1x1x8xf32> to vector<1x8xf32>
    %7 = vector.shape_cast %6 : vector<1x8xf32> to vector<8x1xf32>
    %c0_8 = arith.constant 0 : index
    %c0_9 = arith.constant 0 : index
    %8 = vector.load %arg4[%c0_8, %c0_9] : memref<8x32xf32, #tpu.memory_space<vmem>>, vector<8x32xf32>
    %c0_10 = arith.constant 0 : index
    %c0_11 = arith.constant 0 : index
    %c0_12 = arith.constant 0 : index
    %9 = vector.load %arg5[%c0_10, %c0_11, %c0_12] : memref<3x8x8xf32, #tpu.memory_space<vmem>>, vector<3x8x8xf32>
    %c0_13 = arith.constant 0 : index
    %c0_14 = arith.constant 0 : index
    %c0_15 = arith.constant 0 : index
    %10 = vector.load %arg6[%c0_13, %c0_14, %c0_15] : memref<4x8x3xf32, #tpu.memory_space<vmem>>, vector<4x8x3xf32>
    %cst = arith.constant dense<0.000000e+00> : vector<8x8xf32>
    %11 = tpu.matmul %1, %4, %cst {dimension_numbers = #tpu.dot_dimension_numbers<[1], [0], [0], [1], [0, 0, 1, 1], [], []>} : vector<8x8xf32>, vector<8x8xf32>, vector<8x8xf32> -> vector<8x8xf32>
    %cst_16 = arith.constant dense<0.000000e+00> : vector<8x8xf32>
    %12 = tpu.matmul %1, %4, %cst_16 {dimension_numbers = #tpu.dot_dimension_numbers<[1], [1], [0], [0], [0, 0, 1, 0], [], []>} : vector<8x8xf32>, vector<8x8xf32>, vector<8x8xf32> -> vector<8x8xf32>
    %13 = vector.extract_strided_slice %8 {offsets = [0, 0], sizes = [8, 8], strides = [1, 1]} : vector<8x32xf32> to vector<8x8xf32>
    %cst_17 = arith.constant dense<0.000000e+00> : vector<8x8xf32>
    %14 = tpu.matmul %13, %11, %cst_17 {dimension_numbers = #tpu.dot_dimension_numbers<[1], [0], [0], [1], [0, 0, 1, 1], [], []>} : vector<8x8xf32>, vector<8x8xf32>, vector<8x8xf32> -> vector<8x8xf32>
    %15 = vector.extract_strided_slice %8 {offsets = [0, 8], sizes = [8, 8], strides = [1, 1]} : vector<8x32xf32> to vector<8x8xf32>
    %cst_18 = arith.constant dense<0.000000e+00> : vector<8x8xf32>
    %16 = tpu.matmul %15, %12, %cst_18 {dimension_numbers = #tpu.dot_dimension_numbers<[1], [0], [0], [1], [0, 0, 1, 1], [], []>} : vector<8x8xf32>, vector<8x8xf32>, vector<8x8xf32> -> vector<8x8xf32>
    %17 = arith.addf %14, %16 : vector<8x8xf32>
    %18 = vector.extract_strided_slice %8 {offsets = [0, 16], sizes = [8, 8], strides = [1, 1]} : vector<8x32xf32> to vector<8x8xf32>
    %cst_19 = arith.constant dense<0.000000e+00> : vector<8x8xf32>
    %19 = tpu.matmul %18, %1, %cst_19 {dimension_numbers = #tpu.dot_dimension_numbers<[1], [0], [0], [1], [0, 0, 1, 1], [], []>} : vector<8x8xf32>, vector<8x8xf32>, vector<8x8xf32> -> vector<8x8xf32>
    %20 = arith.addf %17, %19 : vector<8x8xf32>
    %21 = vector.extract_strided_slice %8 {offsets = [0, 24], sizes = [8, 8], strides = [1, 1]} : vector<8x32xf32> to vector<8x8xf32>
    %cst_20 = arith.constant dense<0.000000e+00> : vector<8x1xf32>
    %22 = tpu.matmul %21, %7, %cst_20 {dimension_numbers = #tpu.dot_dimension_numbers<[1], [0], [0], [1], [0, 0, 1, 1], [], []>} : vector<8x8xf32>, vector<8x1xf32>, vector<8x1xf32> -> vector<8x1xf32>
    %23 = vector.broadcast %22 : vector<8x1xf32> to vector<8x8xf32>
    %24 = arith.addf %20, %23 : vector<8x8xf32>
    %25 = vector.extract_strided_slice %10 {offsets = [0, 0, 0], sizes = [1, 8, 3], strides = [1, 1, 1]} : vector<4x8x3xf32> to vector<1x8x3xf32>
    %26 = vector.shape_cast %25 : vector<1x8x3xf32> to vector<8x3xf32>
    %27 = vector.extract_strided_slice %26 {offsets = [0, 0], sizes = [8, 1], strides = [1, 1]} : vector<8x3xf32> to vector<8x1xf32>
    %28 = vector.broadcast %27 : vector<8x1xf32> to vector<8x8xf32>
    %29 = arith.addf %24, %28 : vector<8x8xf32>
    %30 = vector.extract_strided_slice %10 {offsets = [0, 0, 0], sizes = [1, 8, 3], strides = [1, 1, 1]} : vector<4x8x3xf32> to vector<1x8x3xf32>
    %31 = vector.shape_cast %30 : vector<1x8x3xf32> to vector<8x3xf32>
    %32 = vector.extract_strided_slice %31 {offsets = [0, 1], sizes = [8, 1], strides = [1, 1]} : vector<8x3xf32> to vector<8x1xf32>
    %33 = vector.extract_strided_slice %10 {offsets = [0, 0, 0], sizes = [1, 8, 3], strides = [1, 1, 1]} : vector<4x8x3xf32> to vector<1x8x3xf32>
    %34 = vector.shape_cast %33 : vector<1x8x3xf32> to vector<8x3xf32>
    %35 = vector.extract_strided_slice %34 {offsets = [0, 2], sizes = [8, 1], strides = [1, 1]} : vector<8x3xf32> to vector<8x1xf32>
    %cst_21 = arith.constant 1.000000e+00 : f32
    %36 = vector.broadcast %cst_21 : f32 to vector<1x8xf32>
    %cst_22 = arith.constant dense<0.000000e+00> : vector<1x8xf32>
    %37 = tpu.matmul %36, %29, %cst_22 {dimension_numbers = #tpu.dot_dimension_numbers<[1], [0], [0], [1], [0, 0, 1, 1], [], []>} : vector<1x8xf32>, vector<8x8xf32>, vector<1x8xf32> -> vector<1x8xf32>
    %cst_23 = arith.constant 1.250000e-01 : f32
    %38 = vector.broadcast %cst_23 : f32 to vector<1x8xf32>
    %39 = arith.mulf %37, %38 : vector<1x8xf32>
    %40 = vector.broadcast %39 : vector<1x8xf32> to vector<8x8xf32>
    %41 = arith.subf %29, %40 : vector<8x8xf32>
    %42 = arith.mulf %41, %41 : vector<8x8xf32>
    %cst_24 = arith.constant dense<0.000000e+00> : vector<1x8xf32>
    %43 = tpu.matmul %36, %42, %cst_24 {dimension_numbers = #tpu.dot_dimension_numbers<[1], [0], [0], [1], [0, 0, 1, 1], [], []>} : vector<1x8xf32>, vector<8x8xf32>, vector<1x8xf32> -> vector<1x8xf32>
    %cst_25 = arith.constant 1.250000e-01 : f32
    %44 = vector.broadcast %cst_25 : f32 to vector<1x8xf32>
    %45 = arith.mulf %43, %44 : vector<1x8xf32>
    %cst_26 = arith.constant 9.99999974E-6 : f32
    %46 = vector.broadcast %cst_26 : f32 to vector<1x8xf32>
    %47 = arith.addf %45, %46 : vector<1x8xf32>
    %48 = math.rsqrt %47 : vector<1x8xf32>
    %49 = vector.broadcast %48 : vector<1x8xf32> to vector<8x8xf32>
    %50 = arith.mulf %41, %49 : vector<8x8xf32>
    %51 = vector.broadcast %32 : vector<8x1xf32> to vector<8x8xf32>
    %52 = arith.mulf %50, %51 : vector<8x8xf32>
    %53 = vector.broadcast %35 : vector<8x1xf32> to vector<8x8xf32>
    %54 = arith.addf %52, %53 : vector<8x8xf32>
    %55 = math.tanh %54 : vector<8x8xf32>
    %56 = vector.extract_strided_slice %9 {offsets = [0, 0, 0], sizes = [1, 8, 8], strides = [1, 1, 1]} : vector<3x8x8xf32> to vector<1x8x8xf32>
    %57 = vector.shape_cast %56 : vector<1x8x8xf32> to vector<8x8xf32>
    %cst_27 = arith.constant dense<0.000000e+00> : vector<8x8xf32>
    %58 = tpu.matmul %57, %55, %cst_27 {dimension_numbers = #tpu.dot_dimension_numbers<[1], [0], [0], [1], [0, 0, 1, 1], [], []>} : vector<8x8xf32>, vector<8x8xf32>, vector<8x8xf32> -> vector<8x8xf32>
    %59 = vector.extract_strided_slice %10 {offsets = [1, 0, 0], sizes = [1, 8, 3], strides = [1, 1, 1]} : vector<4x8x3xf32> to vector<1x8x3xf32>
    %60 = vector.shape_cast %59 : vector<1x8x3xf32> to vector<8x3xf32>
    %61 = vector.extract_strided_slice %60 {offsets = [0, 0], sizes = [8, 1], strides = [1, 1]} : vector<8x3xf32> to vector<8x1xf32>
    %62 = vector.broadcast %61 : vector<8x1xf32> to vector<8x8xf32>
    %63 = arith.addf %58, %62 : vector<8x8xf32>
    %64 = vector.extract_strided_slice %10 {offsets = [1, 0, 0], sizes = [1, 8, 3], strides = [1, 1, 1]} : vector<4x8x3xf32> to vector<1x8x3xf32>
    %65 = vector.shape_cast %64 : vector<1x8x3xf32> to vector<8x3xf32>
    %66 = vector.extract_strided_slice %65 {offsets = [0, 1], sizes = [8, 1], strides = [1, 1]} : vector<8x3xf32> to vector<8x1xf32>
    %67 = vector.extract_strided_slice %10 {offsets = [1, 0, 0], sizes = [1, 8, 3], strides = [1, 1, 1]} : vector<4x8x3xf32> to vector<1x8x3xf32>
    %68 = vector.shape_cast %67 : vector<1x8x3xf32> to vector<8x3xf32>
    %69 = vector.extract_strided_slice %68 {offsets = [0, 2], sizes = [8, 1], strides = [1, 1]} : vector<8x3xf32> to vector<8x1xf32>
    %cst_28 = arith.constant 1.000000e+00 : f32
    %70 = vector.broadcast %cst_28 : f32 to vector<1x8xf32>
    %cst_29 = arith.constant dense<0.000000e+00> : vector<1x8xf32>
    %71 = tpu.matmul %70, %63, %cst_29 {dimension_numbers = #tpu.dot_dimension_numbers<[1], [0], [0], [1], [0, 0, 1, 1], [], []>} : vector<1x8xf32>, vector<8x8xf32>, vector<1x8xf32> -> vector<1x8xf32>
    %cst_30 = arith.constant 1.250000e-01 : f32
    %72 = vector.broadcast %cst_30 : f32 to vector<1x8xf32>
    %73 = arith.mulf %71, %72 : vector<1x8xf32>
    %74 = vector.broadcast %73 : vector<1x8xf32> to vector<8x8xf32>
    %75 = arith.subf %63, %74 : vector<8x8xf32>
    %76 = arith.mulf %75, %75 : vector<8x8xf32>
    %cst_31 = arith.constant dense<0.000000e+00> : vector<1x8xf32>
    %77 = tpu.matmul %70, %76, %cst_31 {dimension_numbers = #tpu.dot_dimension_numbers<[1], [0], [0], [1], [0, 0, 1, 1], [], []>} : vector<1x8xf32>, vector<8x8xf32>, vector<1x8xf32> -> vector<1x8xf32>
    %cst_32 = arith.constant 1.250000e-01 : f32
    %78 = vector.broadcast %cst_32 : f32 to vector<1x8xf32>
    %79 = arith.mulf %77, %78 : vector<1x8xf32>
    %cst_33 = arith.constant 9.99999974E-6 : f32
    %80 = vector.broadcast %cst_33 : f32 to vector<1x8xf32>
    %81 = arith.addf %79, %80 : vector<1x8xf32>
    %82 = math.rsqrt %81 : vector<1x8xf32>
    %83 = vector.broadcast %82 : vector<1x8xf32> to vector<8x8xf32>
    %84 = arith.mulf %75, %83 : vector<8x8xf32>
    %85 = vector.broadcast %66 : vector<8x1xf32> to vector<8x8xf32>
    %86 = arith.mulf %84, %85 : vector<8x8xf32>
    %87 = vector.broadcast %69 : vector<8x1xf32> to vector<8x8xf32>
    %88 = arith.addf %86, %87 : vector<8x8xf32>
    %89 = math.tanh %88 : vector<8x8xf32>
    %90 = vector.extract_strided_slice %9 {offsets = [1, 0, 0], sizes = [1, 8, 8], strides = [1, 1, 1]} : vector<3x8x8xf32> to vector<1x8x8xf32>
    %91 = vector.shape_cast %90 : vector<1x8x8xf32> to vector<8x8xf32>
    %cst_34 = arith.constant dense<0.000000e+00> : vector<8x8xf32>
    %92 = tpu.matmul %91, %89, %cst_34 {dimension_numbers = #tpu.dot_dimension_numbers<[1], [0], [0], [1], [0, 0, 1, 1], [], []>} : vector<8x8xf32>, vector<8x8xf32>, vector<8x8xf32> -> vector<8x8xf32>
    %93 = vector.extract_strided_slice %10 {offsets = [2, 0, 0], sizes = [1, 8, 3], strides = [1, 1, 1]} : vector<4x8x3xf32> to vector<1x8x3xf32>
    %94 = vector.shape_cast %93 : vector<1x8x3xf32> to vector<8x3xf32>
    %95 = vector.extract_strided_slice %94 {offsets = [0, 0], sizes = [8, 1], strides = [1, 1]} : vector<8x3xf32> to vector<8x1xf32>
    %96 = vector.broadcast %95 : vector<8x1xf32> to vector<8x8xf32>
    %97 = arith.addf %92, %96 : vector<8x8xf32>
    %98 = vector.extract_strided_slice %10 {offsets = [2, 0, 0], sizes = [1, 8, 3], strides = [1, 1, 1]} : vector<4x8x3xf32> to vector<1x8x3xf32>
    %99 = vector.shape_cast %98 : vector<1x8x3xf32> to vector<8x3xf32>
    %100 = vector.extract_strided_slice %99 {offsets = [0, 1], sizes = [8, 1], strides = [1, 1]} : vector<8x3xf32> to vector<8x1xf32>
    %101 = vector.extract_strided_slice %10 {offsets = [2, 0, 0], sizes = [1, 8, 3], strides = [1, 1, 1]} : vector<4x8x3xf32> to vector<1x8x3xf32>
    %102 = vector.shape_cast %101 : vector<1x8x3xf32> to vector<8x3xf32>
    %103 = vector.extract_strided_slice %102 {offsets = [0, 2], sizes = [8, 1], strides = [1, 1]} : vector<8x3xf32> to vector<8x1xf32>
    %cst_35 = arith.constant 1.000000e+00 : f32
    %104 = vector.broadcast %cst_35 : f32 to vector<1x8xf32>
    %cst_36 = arith.constant dense<0.000000e+00> : vector<1x8xf32>
    %105 = tpu.matmul %104, %97, %cst_36 {dimension_numbers = #tpu.dot_dimension_numbers<[1], [0], [0], [1], [0, 0, 1, 1], [], []>} : vector<1x8xf32>, vector<8x8xf32>, vector<1x8xf32> -> vector<1x8xf32>
    %cst_37 = arith.constant 1.250000e-01 : f32
    %106 = vector.broadcast %cst_37 : f32 to vector<1x8xf32>
    %107 = arith.mulf %105, %106 : vector<1x8xf32>
    %108 = vector.broadcast %107 : vector<1x8xf32> to vector<8x8xf32>
    %109 = arith.subf %97, %108 : vector<8x8xf32>
    %110 = arith.mulf %109, %109 : vector<8x8xf32>
    %cst_38 = arith.constant dense<0.000000e+00> : vector<1x8xf32>
    %111 = tpu.matmul %104, %110, %cst_38 {dimension_numbers = #tpu.dot_dimension_numbers<[1], [0], [0], [1], [0, 0, 1, 1], [], []>} : vector<1x8xf32>, vector<8x8xf32>, vector<1x8xf32> -> vector<1x8xf32>
    %cst_39 = arith.constant 1.250000e-01 : f32
    %112 = vector.broadcast %cst_39 : f32 to vector<1x8xf32>
    %113 = arith.mulf %111, %112 : vector<1x8xf32>
    %cst_40 = arith.constant 9.99999974E-6 : f32
    %114 = vector.broadcast %cst_40 : f32 to vector<1x8xf32>
    %115 = arith.addf %113, %114 : vector<1x8xf32>
    %116 = math.rsqrt %115 : vector<1x8xf32>
    %117 = vector.broadcast %116 : vector<1x8xf32> to vector<8x8xf32>
    %118 = arith.mulf %109, %117 : vector<8x8xf32>
    %119 = vector.broadcast %100 : vector<8x1xf32> to vector<8x8xf32>
    %120 = arith.mulf %118, %119 : vector<8x8xf32>
    %121 = vector.broadcast %103 : vector<8x1xf32> to vector<8x8xf32>
    %122 = arith.addf %120, %121 : vector<8x8xf32>
    %123 = math.tanh %122 : vector<8x8xf32>
    %124 = vector.extract_strided_slice %9 {offsets = [2, 0, 0], sizes = [1, 8, 8], strides = [1, 1, 1]} : vector<3x8x8xf32> to vector<1x8x8xf32>
    %125 = vector.shape_cast %124 : vector<1x8x8xf32> to vector<8x8xf32>
    %cst_41 = arith.constant dense<0.000000e+00> : vector<8x8xf32>
    %126 = tpu.matmul %125, %123, %cst_41 {dimension_numbers = #tpu.dot_dimension_numbers<[1], [0], [0], [1], [0, 0, 1, 1], [], []>} : vector<8x8xf32>, vector<8x8xf32>, vector<8x8xf32> -> vector<8x8xf32>
    %127 = vector.extract_strided_slice %10 {offsets = [3, 0, 0], sizes = [1, 8, 3], strides = [1, 1, 1]} : vector<4x8x3xf32> to vector<1x8x3xf32>
    %128 = vector.shape_cast %127 : vector<1x8x3xf32> to vector<8x3xf32>
    %129 = vector.extract_strided_slice %128 {offsets = [0, 0], sizes = [8, 1], strides = [1, 1]} : vector<8x3xf32> to vector<8x1xf32>
    %130 = vector.broadcast %129 : vector<8x1xf32> to vector<8x8xf32>
    %131 = arith.addf %126, %130 : vector<8x8xf32>
    %132 = vector.extract_strided_slice %10 {offsets = [3, 0, 0], sizes = [1, 8, 3], strides = [1, 1, 1]} : vector<4x8x3xf32> to vector<1x8x3xf32>
    %133 = vector.shape_cast %132 : vector<1x8x3xf32> to vector<8x3xf32>
    %134 = vector.extract_strided_slice %133 {offsets = [0, 1], sizes = [8, 1], strides = [1, 1]} : vector<8x3xf32> to vector<8x1xf32>
    %135 = vector.extract_strided_slice %10 {offsets = [3, 0, 0], sizes = [1, 8, 3], strides = [1, 1, 1]} : vector<4x8x3xf32> to vector<1x8x3xf32>
    %136 = vector.shape_cast %135 : vector<1x8x3xf32> to vector<8x3xf32>
    %137 = vector.extract_strided_slice %136 {offsets = [0, 2], sizes = [8, 1], strides = [1, 1]} : vector<8x3xf32> to vector<8x1xf32>
    %cst_42 = arith.constant 1.000000e+00 : f32
    %138 = vector.broadcast %cst_42 : f32 to vector<1x8xf32>
    %cst_43 = arith.constant dense<0.000000e+00> : vector<1x8xf32>
    %139 = tpu.matmul %138, %131, %cst_43 {dimension_numbers = #tpu.dot_dimension_numbers<[1], [0], [0], [1], [0, 0, 1, 1], [], []>} : vector<1x8xf32>, vector<8x8xf32>, vector<1x8xf32> -> vector<1x8xf32>
    %cst_44 = arith.constant 1.250000e-01 : f32
    %140 = vector.broadcast %cst_44 : f32 to vector<1x8xf32>
    %141 = arith.mulf %139, %140 : vector<1x8xf32>
    %142 = vector.broadcast %141 : vector<1x8xf32> to vector<8x8xf32>
    %143 = arith.subf %131, %142 : vector<8x8xf32>
    %144 = arith.mulf %143, %143 : vector<8x8xf32>
    %cst_45 = arith.constant dense<0.000000e+00> : vector<1x8xf32>
    %145 = tpu.matmul %138, %144, %cst_45 {dimension_numbers = #tpu.dot_dimension_numbers<[1], [0], [0], [1], [0, 0, 1, 1], [], []>} : vector<1x8xf32>, vector<8x8xf32>, vector<1x8xf32> -> vector<1x8xf32>
    %cst_46 = arith.constant 1.250000e-01 : f32
    %146 = vector.broadcast %cst_46 : f32 to vector<1x8xf32>
    %147 = arith.mulf %145, %146 : vector<1x8xf32>
    %cst_47 = arith.constant 9.99999974E-6 : f32
    %148 = vector.broadcast %cst_47 : f32 to vector<1x8xf32>
    %149 = arith.addf %147, %148 : vector<1x8xf32>
    %150 = math.rsqrt %149 : vector<1x8xf32>
    %151 = vector.broadcast %150 : vector<1x8xf32> to vector<8x8xf32>
    %152 = arith.mulf %143, %151 : vector<8x8xf32>
    %153 = vector.broadcast %134 : vector<8x1xf32> to vector<8x8xf32>
    %154 = arith.mulf %152, %153 : vector<8x8xf32>
    %155 = vector.broadcast %137 : vector<8x1xf32> to vector<8x8xf32>
    %156 = arith.addf %154, %155 : vector<8x8xf32>
    %157 = math.tanh %156 : vector<8x8xf32>
    %c0_48 = arith.constant 0 : index
    %c0_49 = arith.constant 0 : index
    %c0_50 = arith.constant 0 : index
    %158 = vector.load %arg9[%c0_48, %c0_49, %c0_50] : memref<1x8x8xf32, #tpu.memory_space<vmem>>, vector<1x8x8xf32>
    %159 = vector.shape_cast %158 : vector<1x8x8xf32> to vector<8x8xf32>
    %160 = vector.shape_cast %157 : vector<8x8xf32> to vector<1x8x8xf32>
    tpu.vector_store %arg9[%c0_48, %c0_49, %c0_50], %160 {strides = array<i32>} : memref<1x8x8xf32, #tpu.memory_space<vmem>>, vector<1x8x8xf32>,
    %161 = arith.addf %157, %1 : vector<8x8xf32>
    %c0_51 = arith.constant 0 : index
    %c0_52 = arith.constant 0 : index
    %c0_53 = arith.constant 0 : index
    %162 = vector.load %arg10[%c0_51, %c0_52, %c0_53] : memref<1x8x8xf32, #tpu.memory_space<vmem>>, vector<1x8x8xf32>
    %163 = vector.shape_cast %162 : vector<1x8x8xf32> to vector<8x8xf32>
    %164 = vector.shape_cast %161 : vector<8x8xf32> to vector<1x8x8xf32>
    tpu.vector_store %arg10[%c0_51, %c0_52, %c0_53], %164 {strides = array<i32>} : memref<1x8x8xf32, #tpu.memory_space<vmem>>, vector<1x8x8xf32>,
    %cst_54 = arith.constant dense<0.000000e+00> : vector<8xf32>
    %165 = vector.multi_reduction <add>, %157, %cst_54 [1] : vector<8x8xf32> to vector<8xf32>
    %166 = vector.shape_cast %165 : vector<8xf32> to vector<8x1xf32>
    %cst_55 = arith.constant 1.250000e-01 : f32
    %167 = vector.broadcast %cst_55 : f32 to vector<8x1xf32>
    %168 = arith.mulf %166, %167 : vector<8x1xf32>
    %c0_56 = arith.constant 0 : index
    %c0_57 = arith.constant 0 : index
    %c0_58 = arith.constant 0 : index
    %169 = vector.load %arg7[%c0_56, %c0_57, %c0_58] : memref<3x8x8xf32, #tpu.memory_space<vmem>>, vector<3x8x8xf32>
    %c0_59 = arith.constant 0 : index
    %c0_60 = arith.constant 0 : index
    %c0_61 = arith.constant 0 : index
    %170 = vector.load %arg8[%c0_59, %c0_60, %c0_61] : memref<3x8x3xf32, #tpu.memory_space<vmem>>, vector<3x8x3xf32>
    %171 = vector.extract_strided_slice %169 {offsets = [0, 0, 0], sizes = [1, 8, 8], strides = [1, 1, 1]} : vector<3x8x8xf32> to vector<1x8x8xf32>
    %172 = vector.shape_cast %171 : vector<1x8x8xf32> to vector<8x8xf32>
    %cst_62 = arith.constant dense<0.000000e+00> : vector<8x1xf32>
    %173 = tpu.matmul %172, %168, %cst_62 {dimension_numbers = #tpu.dot_dimension_numbers<[1], [0], [0], [1], [0, 0, 1, 1], [], []>} : vector<8x8xf32>, vector<8x1xf32>, vector<8x1xf32> -> vector<8x1xf32>
    %174 = vector.extract_strided_slice %170 {offsets = [0, 0, 0], sizes = [1, 8, 3], strides = [1, 1, 1]} : vector<3x8x3xf32> to vector<1x8x3xf32>
    %175 = vector.shape_cast %174 : vector<1x8x3xf32> to vector<8x3xf32>
    %176 = vector.extract_strided_slice %175 {offsets = [0, 0], sizes = [8, 1], strides = [1, 1]} : vector<8x3xf32> to vector<8x1xf32>
    %177 = arith.addf %173, %176 : vector<8x1xf32>
    %178 = vector.extract_strided_slice %170 {offsets = [0, 0, 0], sizes = [1, 8, 3], strides = [1, 1, 1]} : vector<3x8x3xf32> to vector<1x8x3xf32>
    %179 = vector.shape_cast %178 : vector<1x8x3xf32> to vector<8x3xf32>
    %180 = vector.extract_strided_slice %179 {offsets = [0, 1], sizes = [8, 1], strides = [1, 1]} : vector<8x3xf32> to vector<8x1xf32>
    %181 = vector.extract_strided_slice %170 {offsets = [0, 0, 0], sizes = [1, 8, 3], strides = [1, 1, 1]} : vector<3x8x3xf32> to vector<1x8x3xf32>
    %182 = vector.shape_cast %181 : vector<1x8x3xf32> to vector<8x3xf32>
    %183 = vector.extract_strided_slice %182 {offsets = [0, 2], sizes = [8, 1], strides = [1, 1]} : vector<8x3xf32> to vector<8x1xf32>
    %cst_63 = arith.constant 1.000000e+00 : f32
    %184 = vector.broadcast %cst_63 : f32 to vector<1x8xf32>
    %cst_64 = arith.constant dense<0.000000e+00> : vector<1x1xf32>
    %185 = tpu.matmul %184, %177, %cst_64 {dimension_numbers = #tpu.dot_dimension_numbers<[1], [0], [0], [1], [0, 0, 1, 1], [], []>} : vector<1x8xf32>, vector<8x1xf32>, vector<1x1xf32> -> vector<1x1xf32>
    %cst_65 = arith.constant 1.250000e-01 : f32
    %186 = vector.broadcast %cst_65 : f32 to vector<1x1xf32>
    %187 = arith.mulf %185, %186 : vector<1x1xf32>
    %188 = vector.broadcast %187 : vector<1x1xf32> to vector<8x1xf32>
    %189 = arith.subf %177, %188 : vector<8x1xf32>
    %190 = arith.mulf %189, %189 : vector<8x1xf32>
    %cst_66 = arith.constant dense<0.000000e+00> : vector<1x1xf32>
    %191 = tpu.matmul %184, %190, %cst_66 {dimension_numbers = #tpu.dot_dimension_numbers<[1], [0], [0], [1], [0, 0, 1, 1], [], []>} : vector<1x8xf32>, vector<8x1xf32>, vector<1x1xf32> -> vector<1x1xf32>
    %cst_67 = arith.constant 1.250000e-01 : f32
    %192 = vector.broadcast %cst_67 : f32 to vector<1x1xf32>
    %193 = arith.mulf %191, %192 : vector<1x1xf32>
    %cst_68 = arith.constant 9.99999974E-6 : f32
    %194 = vector.broadcast %cst_68 : f32 to vector<1x1xf32>
    %195 = arith.addf %193, %194 : vector<1x1xf32>
    %196 = math.rsqrt %195 : vector<1x1xf32>
    %197 = vector.broadcast %196 : vector<1x1xf32> to vector<8x1xf32>
    %198 = arith.mulf %189, %197 : vector<8x1xf32>
    %199 = arith.mulf %198, %180 : vector<8x1xf32>
    %200 = arith.addf %199, %183 : vector<8x1xf32>
    %201 = math.tanh %200 : vector<8x1xf32>
    %202 = vector.extract_strided_slice %169 {offsets = [1, 0, 0], sizes = [1, 8, 8], strides = [1, 1, 1]} : vector<3x8x8xf32> to vector<1x8x8xf32>
    %203 = vector.shape_cast %202 : vector<1x8x8xf32> to vector<8x8xf32>
    %cst_69 = arith.constant dense<0.000000e+00> : vector<8x1xf32>
    %204 = tpu.matmul %203, %201, %cst_69 {dimension_numbers = #tpu.dot_dimension_numbers<[1], [0], [0], [1], [0, 0, 1, 1], [], []>} : vector<8x8xf32>, vector<8x1xf32>, vector<8x1xf32> -> vector<8x1xf32>
    %205 = vector.extract_strided_slice %170 {offsets = [1, 0, 0], sizes = [1, 8, 3], strides = [1, 1, 1]} : vector<3x8x3xf32> to vector<1x8x3xf32>
    %206 = vector.shape_cast %205 : vector<1x8x3xf32> to vector<8x3xf32>
    %207 = vector.extract_strided_slice %206 {offsets = [0, 0], sizes = [8, 1], strides = [1, 1]} : vector<8x3xf32> to vector<8x1xf32>
    %208 = arith.addf %204, %207 : vector<8x1xf32>
    %209 = vector.extract_strided_slice %170 {offsets = [1, 0, 0], sizes = [1, 8, 3], strides = [1, 1, 1]} : vector<3x8x3xf32> to vector<1x8x3xf32>
    %210 = vector.shape_cast %209 : vector<1x8x3xf32> to vector<8x3xf32>
    %211 = vector.extract_strided_slice %210 {offsets = [0, 1], sizes = [8, 1], strides = [1, 1]} : vector<8x3xf32> to vector<8x1xf32>
    %212 = vector.extract_strided_slice %170 {offsets = [1, 0, 0], sizes = [1, 8, 3], strides = [1, 1, 1]} : vector<3x8x3xf32> to vector<1x8x3xf32>
    %213 = vector.shape_cast %212 : vector<1x8x3xf32> to vector<8x3xf32>
    %214 = vector.extract_strided_slice %213 {offsets = [0, 2], sizes = [8, 1], strides = [1, 1]} : vector<8x3xf32> to vector<8x1xf32>
    %cst_70 = arith.constant 1.000000e+00 : f32
    %215 = vector.broadcast %cst_70 : f32 to vector<1x8xf32>
    %cst_71 = arith.constant dense<0.000000e+00> : vector<1x1xf32>
    %216 = tpu.matmul %215, %208, %cst_71 {dimension_numbers = #tpu.dot_dimension_numbers<[1], [0], [0], [1], [0, 0, 1, 1], [], []>} : vector<1x8xf32>, vector<8x1xf32>, vector<1x1xf32> -> vector<1x1xf32>
    %cst_72 = arith.constant 1.250000e-01 : f32
    %217 = vector.broadcast %cst_72 : f32 to vector<1x1xf32>
    %218 = arith.mulf %216, %217 : vector<1x1xf32>
    %219 = vector.broadcast %218 : vector<1x1xf32> to vector<8x1xf32>
    %220 = arith.subf %208, %219 : vector<8x1xf32>
    %221 = arith.mulf %220, %220 : vector<8x1xf32>
    %cst_73 = arith.constant dense<0.000000e+00> : vector<1x1xf32>
    %222 = tpu.matmul %215, %221, %cst_73 {dimension_numbers = #tpu.dot_dimension_numbers<[1], [0], [0], [1], [0, 0, 1, 1], [], []>} : vector<1x8xf32>, vector<8x1xf32>, vector<1x1xf32> -> vector<1x1xf32>
    %cst_74 = arith.constant 1.250000e-01 : f32
    %223 = vector.broadcast %cst_74 : f32 to vector<1x1xf32>
    %224 = arith.mulf %222, %223 : vector<1x1xf32>
    %cst_75 = arith.constant 9.99999974E-6 : f32
    %225 = vector.broadcast %cst_75 : f32 to vector<1x1xf32>
    %226 = arith.addf %224, %225 : vector<1x1xf32>
    %227 = math.rsqrt %226 : vector<1x1xf32>
    %228 = vector.broadcast %227 : vector<1x1xf32> to vector<8x1xf32>
    %229 = arith.mulf %220, %228 : vector<8x1xf32>
    %230 = arith.mulf %229, %211 : vector<8x1xf32>
    %231 = arith.addf %230, %214 : vector<8x1xf32>
    %232 = math.tanh %231 : vector<8x1xf32>
    %233 = vector.extract_strided_slice %169 {offsets = [2, 0, 0], sizes = [1, 8, 8], strides = [1, 1, 1]} : vector<3x8x8xf32> to vector<1x8x8xf32>
    %234 = vector.shape_cast %233 : vector<1x8x8xf32> to vector<8x8xf32>
    %cst_76 = arith.constant dense<0.000000e+00> : vector<8x1xf32>
    %235 = tpu.matmul %234, %232, %cst_76 {dimension_numbers = #tpu.dot_dimension_numbers<[1], [0], [0], [1], [0, 0, 1, 1], [], []>} : vector<8x8xf32>, vector<8x1xf32>, vector<8x1xf32> -> vector<8x1xf32>
    %236 = vector.extract_strided_slice %170 {offsets = [2, 0, 0], sizes = [1, 8, 3], strides = [1, 1, 1]} : vector<3x8x3xf32> to vector<1x8x3xf32>
    %237 = vector.shape_cast %236 : vector<1x8x3xf32> to vector<8x3xf32>
    %238 = vector.extract_strided_slice %237 {offsets = [0, 0], sizes = [8, 1], strides = [1, 1]} : vector<8x3xf32> to vector<8x1xf32>
    %239 = arith.addf %235, %238 : vector<8x1xf32>
    %240 = vector.extract_strided_slice %170 {offsets = [2, 0, 0], sizes = [1, 8, 3], strides = [1, 1, 1]} : vector<3x8x3xf32> to vector<1x8x3xf32>
    %241 = vector.shape_cast %240 : vector<1x8x3xf32> to vector<8x3xf32>
    %242 = vector.extract_strided_slice %241 {offsets = [0, 1], sizes = [8, 1], strides = [1, 1]} : vector<8x3xf32> to vector<8x1xf32>
    %243 = vector.extract_strided_slice %170 {offsets = [2, 0, 0], sizes = [1, 8, 3], strides = [1, 1, 1]} : vector<3x8x3xf32> to vector<1x8x3xf32>
    %244 = vector.shape_cast %243 : vector<1x8x3xf32> to vector<8x3xf32>
    %245 = vector.extract_strided_slice %244 {offsets = [0, 2], sizes = [8, 1], strides = [1, 1]} : vector<8x3xf32> to vector<8x1xf32>
    %cst_77 = arith.constant 1.000000e+00 : f32
    %246 = vector.broadcast %cst_77 : f32 to vector<1x8xf32>
    %cst_78 = arith.constant dense<0.000000e+00> : vector<1x1xf32>
    %247 = tpu.matmul %246, %239, %cst_78 {dimension_numbers = #tpu.dot_dimension_numbers<[1], [0], [0], [1], [0, 0, 1, 1], [], []>} : vector<1x8xf32>, vector<8x1xf32>, vector<1x1xf32> -> vector<1x1xf32>
    %cst_79 = arith.constant 1.250000e-01 : f32
    %248 = vector.broadcast %cst_79 : f32 to vector<1x1xf32>
    %249 = arith.mulf %247, %248 : vector<1x1xf32>
    %250 = vector.broadcast %249 : vector<1x1xf32> to vector<8x1xf32>
    %251 = arith.subf %239, %250 : vector<8x1xf32>
    %252 = arith.mulf %251, %251 : vector<8x1xf32>
    %cst_80 = arith.constant dense<0.000000e+00> : vector<1x1xf32>
    %253 = tpu.matmul %246, %252, %cst_80 {dimension_numbers = #tpu.dot_dimension_numbers<[1], [0], [0], [1], [0, 0, 1, 1], [], []>} : vector<1x8xf32>, vector<8x1xf32>, vector<1x1xf32> -> vector<1x1xf32>
    %cst_81 = arith.constant 1.250000e-01 : f32
    %254 = vector.broadcast %cst_81 : f32 to vector<1x1xf32>
    %255 = arith.mulf %253, %254 : vector<1x1xf32>
    %cst_82 = arith.constant 9.99999974E-6 : f32
    %256 = vector.broadcast %cst_82 : f32 to vector<1x1xf32>
    %257 = arith.addf %255, %256 : vector<1x1xf32>
    %258 = math.rsqrt %257 : vector<1x1xf32>
    %259 = vector.broadcast %258 : vector<1x1xf32> to vector<8x1xf32>
    %260 = arith.mulf %251, %259 : vector<8x1xf32>
    %261 = arith.mulf %260, %242 : vector<8x1xf32>
    %262 = arith.addf %261, %245 : vector<8x1xf32>
    %263 = math.tanh %262 : vector<8x1xf32>
    %264 = vector.shape_cast %263 : vector<8x1xf32> to vector<1x8xf32>
    %c0_83 = arith.constant 0 : index
    %c0_84 = arith.constant 0 : index
    %c0_85 = arith.constant 0 : index
    %265 = vector.load %arg11[%c0_83, %c0_84, %c0_85] : memref<1x1x8xf32, #tpu.memory_space<vmem>>, vector<1x1x8xf32>
    %266 = vector.shape_cast %265 : vector<1x1x8xf32> to vector<1x8xf32>
    %267 = vector.shape_cast %264 : vector<1x8xf32> to vector<1x1x8xf32>
    tpu.vector_store %arg11[%c0_83, %c0_84, %c0_85], %267 {strides = array<i32>} : memref<1x1x8xf32, #tpu.memory_space<vmem>>, vector<1x1x8xf32>,
    return
  }
  func.func @transform_0(%arg0: i32) -> (i32, i32, i32) {
    %c0_i32 = arith.constant 0 : i32
    %c0_i32_0 = arith.constant 0 : i32
    %c0_i32_1 = arith.constant 0 : i32
    return %arg0, %c0_i32, %c0_i32_0 : i32, i32, i32
  }
  func.func @transform_1(%arg0: i32) -> (i32, i32, i32) {
    %c0_i32 = arith.constant 0 : i32
    %c0_i32_0 = arith.constant 0 : i32
    %c0_i32_1 = arith.constant 0 : i32
    return %arg0, %c0_i32, %c0_i32_0 : i32, i32, i32
  }
  func.func @transform_2(%arg0: i32) -> (i32, i32, i32) {
    %c0_i32 = arith.constant 0 : i32
    %c0_i32_0 = arith.constant 0 : i32
    %c0_i32_1 = arith.constant 0 : i32
    return %arg0, %c0_i32, %c0_i32_0 : i32, i32, i32
  }
  func.func @transform_3(%arg0: i32) -> (i32, i32) {
    %c0_i32 = arith.constant 0 : i32
    %c0_i32_0 = arith.constant 0 : i32
    %c0_i32_1 = arith.constant 0 : i32
    return %c0_i32, %c0_i32_0 : i32, i32
  }
  func.func @transform_4(%arg0: i32) -> (i32, i32, i32) {
    %c0_i32 = arith.constant 0 : i32
    %c0_i32_0 = arith.constant 0 : i32
    %c0_i32_1 = arith.constant 0 : i32
    %c0_i32_2 = arith.constant 0 : i32
    return %c0_i32, %c0_i32_0, %c0_i32_1 : i32, i32, i32
  }
  func.func @transform_5(%arg0: i32) -> (i32, i32, i32) {
    %c0_i32 = arith.constant 0 : i32
    %c0_i32_0 = arith.constant 0 : i32
    %c0_i32_1 = arith.constant 0 : i32
    %c0_i32_2 = arith.constant 0 : i32
    return %c0_i32, %c0_i32_0, %c0_i32_1 : i32, i32, i32
  }
  func.func @transform_6(%arg0: i32) -> (i32, i32, i32) {
    %c0_i32 = arith.constant 0 : i32
    %c0_i32_0 = arith.constant 0 : i32
    %c0_i32_1 = arith.constant 0 : i32
    %c0_i32_2 = arith.constant 0 : i32
    return %c0_i32, %c0_i32_0, %c0_i32_1 : i32, i32, i32
  }
  func.func @transform_7(%arg0: i32) -> (i32, i32, i32) {
    %c0_i32 = arith.constant 0 : i32
    %c0_i32_0 = arith.constant 0 : i32
    %c0_i32_1 = arith.constant 0 : i32
    %c0_i32_2 = arith.constant 0 : i32
    return %c0_i32, %c0_i32_0, %c0_i32_1 : i32, i32, i32
  }
  func.func @transform_8(%arg0: i32) -> (i32, i32, i32) {
    %c0_i32 = arith.constant 0 : i32
    %c0_i32_0 = arith.constant 0 : i32
    %c0_i32_1 = arith.constant 0 : i32
    return %arg0, %c0_i32, %c0_i32_0 : i32, i32, i32
  }
  func.func @transform_9(%arg0: i32) -> (i32, i32, i32) {
    %c0_i32 = arith.constant 0 : i32
    %c0_i32_0 = arith.constant 0 : i32
    %c0_i32_1 = arith.constant 0 : i32
    return %arg0, %c0_i32, %c0_i32_0 : i32, i32, i32
  }
  func.func @transform_10(%arg0: i32) -> (i32, i32, i32) {
    %c0_i32 = arith.constant 0 : i32
    %c0_i32_0 = arith.constant 0 : i32
    %c0_i32_1 = arith.constant 0 : i32
    return %arg0, %c0_i32, %c0_i32_0 : i32, i32, i32
  }
}

module attributes {stable_mosaic.version = 11 : i64} {
  func.func @kernel(%arg0: i32, %arg1: memref<1x8x8xf32, #tpu.memory_space<vmem>>, %arg2: memref<1x8x8xbf16, #tpu.memory_space<vmem>>, %arg3: memref<1x1x8xf32, #tpu.memory_space<vmem>>, %arg4: memref<8x32xf32, #tpu.memory_space<vmem>>, %arg5: memref<3x8x8xf32, #tpu.memory_space<vmem>>, %arg6: memref<4x8x3xf32, #tpu.memory_space<vmem>>, %arg7: memref<3x8x8xf32, #tpu.memory_space<vmem>>, %arg8: memref<3x8x3xf32, #tpu.memory_space<vmem>>, %arg9: memref<1x8x8xf32, #tpu.memory_space<vmem>>, %arg10: memref<1x8x8xf32, #tpu.memory_space<vmem>>, %arg11: memref<1x1x8xf32, #tpu.memory_space<vmem>>) attributes {dimension_semantics = [#tpu.dimension_semantics<parallel>], iteration_bounds = array<i64: 2>, scalar_prefetch = 0 : i64, scratch_operands = 0 : i64, tpu.core_type = #tpu.core_type<tc>, window_params = [{transform_indices = @transform_0, window_bounds = array<i64: 1, 8, 8>}, {transform_indices = @transform_1, window_bounds = array<i64: 1, 8, 8>}, {transform_indices = @transform_2, window_bounds = array<i64: 1, 1, 8>}, {pipeline_mode = #tpu.pipeline_mode<synchronous>, transform_indices = @transform_3, window_bounds = array<i64: 8, 32>}, {pipeline_mode = #tpu.pipeline_mode<synchronous>, transform_indices = @transform_4, window_bounds = array<i64: 3, 8, 8>}, {pipeline_mode = #tpu.pipeline_mode<synchronous>, transform_indices = @transform_5, window_bounds = array<i64: 4, 8, 3>}, {pipeline_mode = #tpu.pipeline_mode<synchronous>, transform_indices = @transform_6, window_bounds = array<i64: 3, 8, 8>}, {pipeline_mode = #tpu.pipeline_mode<synchronous>, transform_indices = @transform_7, window_bounds = array<i64: 3, 8, 3>}, {transform_indices = @transform_8, window_bounds = array<i64: 1, 8, 8>}, {transform_indices = @transform_9, window_bounds = array<i64: 1, 8, 8>}, {transform_indices = @transform_10, window_bounds = array<i64: 1, 1, 8>}]} {
    %c0 = arith.constant 0 : index
    %c0_0 = arith.constant 0 : index
    %c0_1 = arith.constant 0 : index
    %0 = vector.load %arg1[%c0, %c0_0, %c0_1] : memref<1x8x8xf32, #tpu.memory_space<vmem>>, vector<1x8x8xf32>
    %1 = vector.shape_cast %0 : vector<1x8x8xf32> to vector<8x8xf32>
    %c0_2 = arith.constant 0 : index
    %c0_3 = arith.constant 0 : index
    %c0_4 = arith.constant 0 : index
    %2 = vector.load %arg2[%c0_2, %c0_3, %c0_4] : memref<1x8x8xbf16, #tpu.memory_space<vmem>>, vector<1x8x8xbf16>
    %3 = vector.shape_cast %2 : vector<1x8x8xbf16> to vector<8x8xbf16>
    %4 = arith.extf %3 : vector<8x8xbf16> to vector<8x8xf32>
    %c0_5 = arith.constant 0 : index
    %c0_6 = arith.constant 0 : index
    %c0_7 = arith.constant 0 : index
    %5 = vector.load %arg3[%c0_5, %c0_6, %c0_7] : memref<1x1x8xf32, #tpu.memory_space<vmem>>, vector<1x1x8xf32>
    %6 = vector.shape_cast %5 : vector<1x1x8xf32> to vector<1x8xf32>
    %7 = vector.shape_cast %6 : vector<1x8xf32> to vector<8x1xf32>
    %c0_8 = arith.constant 0 : index
    %c0_9 = arith.constant 0 : index
    %8 = vector.load %arg4[%c0_8, %c0_9] : memref<8x32xf32, #tpu.memory_space<vmem>>, vector<8x32xf32>
    %c0_10 = arith.constant 0 : index
    %c0_11 = arith.constant 0 : index
    %c0_12 = arith.constant 0 : index
    %9 = vector.load %arg5[%c0_10, %c0_11, %c0_12] : memref<3x8x8xf32, #tpu.memory_space<vmem>>, vector<3x8x8xf32>
    %c0_13 = arith.constant 0 : index
    %c0_14 = arith.constant 0 : index
    %c0_15 = arith.constant 0 : index
    %10 = vector.load %arg6[%c0_13, %c0_14, %c0_15] : memref<4x8x3xf32, #tpu.memory_space<vmem>>, vector<4x8x3xf32>
    %cst = arith.constant dense<0.000000e+00> : vector<8x8xf32>
    %11 = tpu.matmul %1, %4, %cst {dimension_numbers = #tpu.dot_dimension_numbers<[1], [0], [0], [1], [0, 0, 1, 1], [], []>} : vector<8x8xf32>, vector<8x8xf32>, vector<8x8xf32> -> vector<8x8xf32>
    %cst_16 = arith.constant dense<0.000000e+00> : vector<8x8xf32>
    %12 = tpu.matmul %1, %4, %cst_16 {dimension_numbers = #tpu.dot_dimension_numbers<[1], [1], [0], [0], [0, 0, 1, 0], [], []>} : vector<8x8xf32>, vector<8x8xf32>, vector<8x8xf32> -> vector<8x8xf32>
    %13 = vector.extract_strided_slice %8 {offsets = [0, 0], sizes = [8, 8], strides = [1, 1]} : vector<8x32xf32> to vector<8x8xf32>
    %cst_17 = arith.constant dense<0.000000e+00> : vector<8x8xf32>
    %14 = tpu.matmul %13, %11, %cst_17 {dimension_numbers = #tpu.dot_dimension_numbers<[1], [0], [0], [1], [0, 0, 1, 1], [], []>} : vector<8x8xf32>, vector<8x8xf32>, vector<8x8xf32> -> vector<8x8xf32>
    %15 = vector.extract_strided_slice %8 {offsets = [0, 8], sizes = [8, 8], strides = [1, 1]} : vector<8x32xf32> to vector<8x8xf32>
    %cst_18 = arith.constant dense<0.000000e+00> : vector<8x8xf32>
    %16 = tpu.matmul %15, %12, %cst_18 {dimension_numbers = #tpu.dot_dimension_numbers<[1], [0], [0], [1], [0, 0, 1, 1], [], []>} : vector<8x8xf32>, vector<8x8xf32>, vector<8x8xf32> -> vector<8x8xf32>
    %17 = arith.addf %14, %16 : vector<8x8xf32>
    %18 = vector.extract_strided_slice %8 {offsets = [0, 16], sizes = [8, 8], strides = [1, 1]} : vector<8x32xf32> to vector<8x8xf32>
    %cst_19 = arith.constant dense<0.000000e+00> : vector<8x8xf32>
    %19 = tpu.matmul %18, %1, %cst_19 {dimension_numbers = #tpu.dot_dimension_numbers<[1], [0], [0], [1], [0, 0, 1, 1], [], []>} : vector<8x8xf32>, vector<8x8xf32>, vector<8x8xf32> -> vector<8x8xf32>
    %20 = arith.addf %17, %19 : vector<8x8xf32>
    %21 = vector.extract_strided_slice %8 {offsets = [0, 24], sizes = [8, 8], strides = [1, 1]} : vector<8x32xf32> to vector<8x8xf32>
    %cst_20 = arith.constant dense<0.000000e+00> : vector<8x1xf32>
    %22 = tpu.matmul %21, %7, %cst_20 {dimension_numbers = #tpu.dot_dimension_numbers<[1], [0], [0], [1], [0, 0, 1, 1], [], []>} : vector<8x8xf32>, vector<8x1xf32>, vector<8x1xf32> -> vector<8x1xf32>
    %23 = vector.broadcast %22 : vector<8x1xf32> to vector<8x8xf32>
    %24 = arith.addf %20, %23 : vector<8x8xf32>
    %25 = vector.extract_strided_slice %10 {offsets = [0, 0, 0], sizes = [1, 8, 3], strides = [1, 1, 1]} : vector<4x8x3xf32> to vector<1x8x3xf32>
    %26 = vector.shape_cast %25 : vector<1x8x3xf32> to vector<8x3xf32>
    %27 = vector.extract_strided_slice %26 {offsets = [0, 0], sizes = [8, 1], strides = [1, 1]} : vector<8x3xf32> to vector<8x1xf32>
    %28 = vector.broadcast %27 : vector<8x1xf32> to vector<8x8xf32>
    %29 = arith.addf %24, %28 : vector<8x8xf32>
    %30 = vector.extract_strided_slice %10 {offsets = [0, 0, 0], sizes = [1, 8, 3], strides = [1, 1, 1]} : vector<4x8x3xf32> to vector<1x8x3xf32>
    %31 = vector.shape_cast %30 : vector<1x8x3xf32> to vector<8x3xf32>
    %32 = vector.extract_strided_slice %31 {offsets = [0, 1], sizes = [8, 1], strides = [1, 1]} : vector<8x3xf32> to vector<8x1xf32>
    %33 = vector.extract_strided_slice %10 {offsets = [0, 0, 0], sizes = [1, 8, 3], strides = [1, 1, 1]} : vector<4x8x3xf32> to vector<1x8x3xf32>
    %34 = vector.shape_cast %33 : vector<1x8x3xf32> to vector<8x3xf32>
    %35 = vector.extract_strided_slice %34 {offsets = [0, 2], sizes = [8, 1], strides = [1, 1]} : vector<8x3xf32> to vector<8x1xf32>
    %cst_21 = arith.constant 1.000000e+00 : f32
    %36 = vector.broadcast %cst_21 : f32 to vector<1x8xf32>
    %cst_22 = arith.constant dense<0.000000e+00> : vector<1x8xf32>
    %37 = tpu.matmul %36, %29, %cst_22 {dimension_numbers = #tpu.dot_dimension_numbers<[1], [0], [0], [1], [0, 0, 1, 1], [], []>} : vector<1x8xf32>, vector<8x8xf32>, vector<1x8xf32> -> vector<1x8xf32>
    %cst_23 = arith.constant 1.250000e-01 : f32
    %38 = vector.broadcast %cst_23 : f32 to vector<1x8xf32>
    %39 = arith.mulf %37, %38 : vector<1x8xf32>
    %40 = vector.broadcast %39 : vector<1x8xf32> to vector<8x8xf32>
    %41 = arith.subf %29, %40 : vector<8x8xf32>
    %42 = arith.mulf %41, %41 : vector<8x8xf32>
    %cst_24 = arith.constant dense<0.000000e+00> : vector<1x8xf32>
    %43 = tpu.matmul %36, %42, %cst_24 {dimension_numbers = #tpu.dot_dimension_numbers<[1], [0], [0], [1], [0, 0, 1, 1], [], []>} : vector<1x8xf32>, vector<8x8xf32>, vector<1x8xf32> -> vector<1x8xf32>
    %cst_25 = arith.constant 1.250000e-01 : f32
    %44 = vector.broadcast %cst_25 : f32 to vector<1x8xf32>
    %45 = arith.mulf %43, %44 : vector<1x8xf32>
    %cst_26 = arith.constant 9.99999974E-6 : f32
    %46 = vector.broadcast %cst_26 : f32 to vector<1x8xf32>
    %47 = arith.addf %45, %46 : vector<1x8xf32>
    %48 = math.rsqrt %47 : vector<1x8xf32>
    %49 = vector.broadcast %48 : vector<1x8xf32> to vector<8x8xf32>
    %50 = arith.mulf %41, %49 : vector<8x8xf32>
    %51 = vector.broadcast %32 : vector<8x1xf32> to vector<8x8xf32>
    %52 = arith.mulf %50, %51 : vector<8x8xf32>
    %53 = vector.broadcast %35 : vector<8x1xf32> to vector<8x8xf32>
    %54 = arith.addf %52, %53 : vector<8x8xf32>
    %55 = math.tanh %54 : vector<8x8xf32>
    %56 = vector.extract_strided_slice %9 {offsets = [0, 0, 0], sizes = [1, 8, 8], strides = [1, 1, 1]} : vector<3x8x8xf32> to vector<1x8x8xf32>
    %57 = vector.shape_cast %56 : vector<1x8x8xf32> to vector<8x8xf32>
    %cst_27 = arith.constant dense<0.000000e+00> : vector<8x8xf32>
    %58 = tpu.matmul %57, %55, %cst_27 {dimension_numbers = #tpu.dot_dimension_numbers<[1], [0], [0], [1], [0, 0, 1, 1], [], []>} : vector<8x8xf32>, vector<8x8xf32>, vector<8x8xf32> -> vector<8x8xf32>
    %59 = vector.extract_strided_slice %10 {offsets = [1, 0, 0], sizes = [1, 8, 3], strides = [1, 1, 1]} : vector<4x8x3xf32> to vector<1x8x3xf32>
    %60 = vector.shape_cast %59 : vector<1x8x3xf32> to vector<8x3xf32>
    %61 = vector.extract_strided_slice %60 {offsets = [0, 0], sizes = [8, 1], strides = [1, 1]} : vector<8x3xf32> to vector<8x1xf32>
    %62 = vector.broadcast %61 : vector<8x1xf32> to vector<8x8xf32>
    %63 = arith.addf %58, %62 : vector<8x8xf32>
    %64 = vector.extract_strided_slice %10 {offsets = [1, 0, 0], sizes = [1, 8, 3], strides = [1, 1, 1]} : vector<4x8x3xf32> to vector<1x8x3xf32>
    %65 = vector.shape_cast %64 : vector<1x8x3xf32> to vector<8x3xf32>
    %66 = vector.extract_strided_slice %65 {offsets = [0, 1], sizes = [8, 1], strides = [1, 1]} : vector<8x3xf32> to vector<8x1xf32>
    %67 = vector.extract_strided_slice %10 {offsets = [1, 0, 0], sizes = [1, 8, 3], strides = [1, 1, 1]} : vector<4x8x3xf32> to vector<1x8x3xf32>
    %68 = vector.shape_cast %67 : vector<1x8x3xf32> to vector<8x3xf32>
    %69 = vector.extract_strided_slice %68 {offsets = [0, 2], sizes = [8, 1], strides = [1, 1]} : vector<8x3xf32> to vector<8x1xf32>
    %cst_28 = arith.constant 1.000000e+00 : f32
    %70 = vector.broadcast %cst_28 : f32 to vector<1x8xf32>
    %cst_29 = arith.constant dense<0.000000e+00> : vector<1x8xf32>
    %71 = tpu.matmul %70, %63, %cst_29 {dimension_numbers = #tpu.dot_dimension_numbers<[1], [0], [0], [1], [0, 0, 1, 1], [], []>} : vector<1x8xf32>, vector<8x8xf32>, vector<1x8xf32> -> vector<1x8xf32>
    %cst_30 = arith.constant 1.250000e-01 : f32
    %72 = vector.broadcast %cst_30 : f32 to vector<1x8xf32>
    %73 = arith.mulf %71, %72 : vector<1x8xf32>
    %74 = vector.broadcast %73 : vector<1x8xf32> to vector<8x8xf32>
    %75 = arith.subf %63, %74 : vector<8x8xf32>
    %76 = arith.mulf %75, %75 : vector<8x8xf32>
    %cst_31 = arith.constant dense<0.000000e+00> : vector<1x8xf32>
    %77 = tpu.matmul %70, %76, %cst_31 {dimension_numbers = #tpu.dot_dimension_numbers<[1], [0], [0], [1], [0, 0, 1, 1], [], []>} : vector<1x8xf32>, vector<8x8xf32>, vector<1x8xf32> -> vector<1x8xf32>
    %cst_32 = arith.constant 1.250000e-01 : f32
    %78 = vector.broadcast %cst_32 : f32 to vector<1x8xf32>
    %79 = arith.mulf %77, %78 : vector<1x8xf32>
    %cst_33 = arith.constant 9.99999974E-6 : f32
    %80 = vector.broadcast %cst_33 : f32 to vector<1x8xf32>
    %81 = arith.addf %79, %80 : vector<1x8xf32>
    %82 = math.rsqrt %81 : vector<1x8xf32>
    %83 = vector.broadcast %82 : vector<1x8xf32> to vector<8x8xf32>
    %84 = arith.mulf %75, %83 : vector<8x8xf32>
    %85 = vector.broadcast %66 : vector<8x1xf32> to vector<8x8xf32>
    %86 = arith.mulf %84, %85 : vector<8x8xf32>
    %87 = vector.broadcast %69 : vector<8x1xf32> to vector<8x8xf32>
    %88 = arith.addf %86, %87 : vector<8x8xf32>
    %89 = math.tanh %88 : vector<8x8xf32>
    %90 = vector.extract_strided_slice %9 {offsets = [1, 0, 0], sizes = [1, 8, 8], strides = [1, 1, 1]} : vector<3x8x8xf32> to vector<1x8x8xf32>
    %91 = vector.shape_cast %90 : vector<1x8x8xf32> to vector<8x8xf32>
    %cst_34 = arith.constant dense<0.000000e+00> : vector<8x8xf32>
    %92 = tpu.matmul %91, %89, %cst_34 {dimension_numbers = #tpu.dot_dimension_numbers<[1], [0], [0], [1], [0, 0, 1, 1], [], []>} : vector<8x8xf32>, vector<8x8xf32>, vector<8x8xf32> -> vector<8x8xf32>
    %93 = vector.extract_strided_slice %10 {offsets = [2, 0, 0], sizes = [1, 8, 3], strides = [1, 1, 1]} : vector<4x8x3xf32> to vector<1x8x3xf32>
    %94 = vector.shape_cast %93 : vector<1x8x3xf32> to vector<8x3xf32>
    %95 = vector.extract_strided_slice %94 {offsets = [0, 0], sizes = [8, 1], strides = [1, 1]} : vector<8x3xf32> to vector<8x1xf32>
    %96 = vector.broadcast %95 : vector<8x1xf32> to vector<8x8xf32>
    %97 = arith.addf %92, %96 : vector<8x8xf32>
    %98 = vector.extract_strided_slice %10 {offsets = [2, 0, 0], sizes = [1, 8, 3], strides = [1, 1, 1]} : vector<4x8x3xf32> to vector<1x8x3xf32>
    %99 = vector.shape_cast %98 : vector<1x8x3xf32> to vector<8x3xf32>
    %100 = vector.extract_strided_slice %99 {offsets = [0, 1], sizes = [8, 1], strides = [1, 1]} : vector<8x3xf32> to vector<8x1xf32>
    %101 = vector.extract_strided_slice %10 {offsets = [2, 0, 0], sizes = [1, 8, 3], strides = [1, 1, 1]} : vector<4x8x3xf32> to vector<1x8x3xf32>
    %102 = vector.shape_cast %101 : vector<1x8x3xf32> to vector<8x3xf32>
    %103 = vector.extract_strided_slice %102 {offsets = [0, 2], sizes = [8, 1], strides = [1, 1]} : vector<8x3xf32> to vector<8x1xf32>
    %cst_35 = arith.constant 1.000000e+00 : f32
    %104 = vector.broadcast %cst_35 : f32 to vector<1x8xf32>
    %cst_36 = arith.constant dense<0.000000e+00> : vector<1x8xf32>
    %105 = tpu.matmul %104, %97, %cst_36 {dimension_numbers = #tpu.dot_dimension_numbers<[1], [0], [0], [1], [0, 0, 1, 1], [], []>} : vector<1x8xf32>, vector<8x8xf32>, vector<1x8xf32> -> vector<1x8xf32>
    %cst_37 = arith.constant 1.250000e-01 : f32
    %106 = vector.broadcast %cst_37 : f32 to vector<1x8xf32>
    %107 = arith.mulf %105, %106 : vector<1x8xf32>
    %108 = vector.broadcast %107 : vector<1x8xf32> to vector<8x8xf32>
    %109 = arith.subf %97, %108 : vector<8x8xf32>
    %110 = arith.mulf %109, %109 : vector<8x8xf32>
    %cst_38 = arith.constant dense<0.000000e+00> : vector<1x8xf32>
    %111 = tpu.matmul %104, %110, %cst_38 {dimension_numbers = #tpu.dot_dimension_numbers<[1], [0], [0], [1], [0, 0, 1, 1], [], []>} : vector<1x8xf32>, vector<8x8xf32>, vector<1x8xf32> -> vector<1x8xf32>
    %cst_39 = arith.constant 1.250000e-01 : f32
    %112 = vector.broadcast %cst_39 : f32 to vector<1x8xf32>
    %113 = arith.mulf %111, %112 : vector<1x8xf32>
    %cst_40 = arith.constant 9.99999974E-6 : f32
    %114 = vector.broadcast %cst_40 : f32 to vector<1x8xf32>
    %115 = arith.addf %113, %114 : vector<1x8xf32>
    %116 = math.rsqrt %115 : vector<1x8xf32>
    %117 = vector.broadcast %116 : vector<1x8xf32> to vector<8x8xf32>
    %118 = arith.mulf %109, %117 : vector<8x8xf32>
    %119 = vector.broadcast %100 : vector<8x1xf32> to vector<8x8xf32>
    %120 = arith.mulf %118, %119 : vector<8x8xf32>
    %121 = vector.broadcast %103 : vector<8x1xf32> to vector<8x8xf32>
    %122 = arith.addf %120, %121 : vector<8x8xf32>
    %123 = math.tanh %122 : vector<8x8xf32>
    %124 = vector.extract_strided_slice %9 {offsets = [2, 0, 0], sizes = [1, 8, 8], strides = [1, 1, 1]} : vector<3x8x8xf32> to vector<1x8x8xf32>
    %125 = vector.shape_cast %124 : vector<1x8x8xf32> to vector<8x8xf32>
    %cst_41 = arith.constant dense<0.000000e+00> : vector<8x8xf32>
    %126 = tpu.matmul %125, %123, %cst_41 {dimension_numbers = #tpu.dot_dimension_numbers<[1], [0], [0], [1], [0, 0, 1, 1], [], []>} : vector<8x8xf32>, vector<8x8xf32>, vector<8x8xf32> -> vector<8x8xf32>
    %127 = vector.extract_strided_slice %10 {offsets = [3, 0, 0], sizes = [1, 8, 3], strides = [1, 1, 1]} : vector<4x8x3xf32> to vector<1x8x3xf32>
    %128 = vector.shape_cast %127 : vector<1x8x3xf32> to vector<8x3xf32>
    %129 = vector.extract_strided_slice %128 {offsets = [0, 0], sizes = [8, 1], strides = [1, 1]} : vector<8x3xf32> to vector<8x1xf32>
    %130 = vector.broadcast %129 : vector<8x1xf32> to vector<8x8xf32>
    %131 = arith.addf %126, %130 : vector<8x8xf32>
    %132 = vector.extract_strided_slice %10 {offsets = [3, 0, 0], sizes = [1, 8, 3], strides = [1, 1, 1]} : vector<4x8x3xf32> to vector<1x8x3xf32>
    %133 = vector.shape_cast %132 : vector<1x8x3xf32> to vector<8x3xf32>
    %134 = vector.extract_strided_slice %133 {offsets = [0, 1], sizes = [8, 1], strides = [1, 1]} : vector<8x3xf32> to vector<8x1xf32>
    %135 = vector.extract_strided_slice %10 {offsets = [3, 0, 0], sizes = [1, 8, 3], strides = [1, 1, 1]} : vector<4x8x3xf32> to vector<1x8x3xf32>
    %136 = vector.shape_cast %135 : vector<1x8x3xf32> to vector<8x3xf32>
    %137 = vector.extract_strided_slice %136 {offsets = [0, 2], sizes = [8, 1], strides = [1, 1]} : vector<8x3xf32> to vector<8x1xf32>
    %cst_42 = arith.constant 1.000000e+00 : f32
    %138 = vector.broadcast %cst_42 : f32 to vector<1x8xf32>
    %cst_43 = arith.constant dense<0.000000e+00> : vector<1x8xf32>
    %139 = tpu.matmul %138, %131, %cst_43 {dimension_numbers = #tpu.dot_dimension_numbers<[1], [0], [0], [1], [0, 0, 1, 1], [], []>} : vector<1x8xf32>, vector<8x8xf32>, vector<1x8xf32> -> vector<1x8xf32>
    %cst_44 = arith.constant 1.250000e-01 : f32
    %140 = vector.broadcast %cst_44 : f32 to vector<1x8xf32>
    %141 = arith.mulf %139, %140 : vector<1x8xf32>
    %142 = vector.broadcast %141 : vector<1x8xf32> to vector<8x8xf32>
    %143 = arith.subf %131, %142 : vector<8x8xf32>
    %144 = arith.mulf %143, %143 : vector<8x8xf32>
    %cst_45 = arith.constant dense<0.000000e+00> : vector<1x8xf32>
    %145 = tpu.matmul %138, %144, %cst_45 {dimension_numbers = #tpu.dot_dimension_numbers<[1], [0], [0], [1], [0, 0, 1, 1], [], []>} : vector<1x8xf32>, vector<8x8xf32>, vector<1x8xf32> -> vector<1x8xf32>
    %cst_46 = arith.constant 1.250000e-01 : f32
    %146 = vector.broadcast %cst_46 : f32 to vector<1x8xf32>
    %147 = arith.mulf %145, %146 : vector<1x8xf32>
    %cst_47 = arith.constant 9.99999974E-6 : f32
    %148 = vector.broadcast %cst_47 : f32 to vector<1x8xf32>
    %149 = arith.addf %147, %148 : vector<1x8xf32>
    %150 = math.rsqrt %149 : vector<1x8xf32>
    %151 = vector.broadcast %150 : vector<1x8xf32> to vector<8x8xf32>
    %152 = arith.mulf %143, %151 : vector<8x8xf32>
    %153 = vector.broadcast %134 : vector<8x1xf32> to vector<8x8xf32>
    %154 = arith.mulf %152, %153 : vector<8x8xf32>
    %155 = vector.broadcast %137 : vector<8x1xf32> to vector<8x8xf32>
    %156 = arith.addf %154, %155 : vector<8x8xf32>
    %157 = math.tanh %156 : vector<8x8xf32>
    %c0_48 = arith.constant 0 : index
    %c0_49 = arith.constant 0 : index
    %c0_50 = arith.constant 0 : index
    %158 = vector.load %arg9[%c0_48, %c0_49, %c0_50] : memref<1x8x8xf32, #tpu.memory_space<vmem>>, vector<1x8x8xf32>
    %159 = vector.shape_cast %158 : vector<1x8x8xf32> to vector<8x8xf32>
    %160 = vector.shape_cast %157 : vector<8x8xf32> to vector<1x8x8xf32>
    tpu.vector_store %arg9[%c0_48, %c0_49, %c0_50], %160 {strides = array<i32>} : memref<1x8x8xf32, #tpu.memory_space<vmem>>, vector<1x8x8xf32>,
    %161 = arith.addf %157, %1 : vector<8x8xf32>
    %c0_51 = arith.constant 0 : index
    %c0_52 = arith.constant 0 : index
    %c0_53 = arith.constant 0 : index
    %162 = vector.load %arg10[%c0_51, %c0_52, %c0_53] : memref<1x8x8xf32, #tpu.memory_space<vmem>>, vector<1x8x8xf32>
    %163 = vector.shape_cast %162 : vector<1x8x8xf32> to vector<8x8xf32>
    %164 = vector.shape_cast %161 : vector<8x8xf32> to vector<1x8x8xf32>
    tpu.vector_store %arg10[%c0_51, %c0_52, %c0_53], %164 {strides = array<i32>} : memref<1x8x8xf32, #tpu.memory_space<vmem>>, vector<1x8x8xf32>,
    %cst_54 = arith.constant dense<0.000000e+00> : vector<8xf32>
    %165 = vector.multi_reduction <add>, %157, %cst_54 [1] : vector<8x8xf32> to vector<8xf32>
    %166 = vector.shape_cast %165 : vector<8xf32> to vector<8x1xf32>
    %cst_55 = arith.constant 1.250000e-01 : f32
    %167 = vector.broadcast %cst_55 : f32 to vector<8x1xf32>
    %168 = arith.mulf %166, %167 : vector<8x1xf32>
    %c0_56 = arith.constant 0 : index
    %c0_57 = arith.constant 0 : index
    %c0_58 = arith.constant 0 : index
    %169 = vector.load %arg7[%c0_56, %c0_57, %c0_58] : memref<3x8x8xf32, #tpu.memory_space<vmem>>, vector<3x8x8xf32>
    %c0_59 = arith.constant 0 : index
    %c0_60 = arith.constant 0 : index
    %c0_61 = arith.constant 0 : index
    %170 = vector.load %arg8[%c0_59, %c0_60, %c0_61] : memref<3x8x3xf32, #tpu.memory_space<vmem>>, vector<3x8x3xf32>
    %171 = vector.extract_strided_slice %169 {offsets = [0, 0, 0], sizes = [1, 8, 8], strides = [1, 1, 1]} : vector<3x8x8xf32> to vector<1x8x8xf32>
    %172 = vector.shape_cast %171 : vector<1x8x8xf32> to vector<8x8xf32>
    %cst_62 = arith.constant dense<0.000000e+00> : vector<8x1xf32>
    %173 = tpu.matmul %172, %168, %cst_62 {dimension_numbers = #tpu.dot_dimension_numbers<[1], [0], [0], [1], [0, 0, 1, 1], [], []>} : vector<8x8xf32>, vector<8x1xf32>, vector<8x1xf32> -> vector<8x1xf32>
    %174 = vector.extract_strided_slice %170 {offsets = [0, 0, 0], sizes = [1, 8, 3], strides = [1, 1, 1]} : vector<3x8x3xf32> to vector<1x8x3xf32>
    %175 = vector.shape_cast %174 : vector<1x8x3xf32> to vector<8x3xf32>
    %176 = vector.extract_strided_slice %175 {offsets = [0, 0], sizes = [8, 1], strides = [1, 1]} : vector<8x3xf32> to vector<8x1xf32>
    %177 = arith.addf %173, %176 : vector<8x1xf32>
    %178 = vector.extract_strided_slice %170 {offsets = [0, 0, 0], sizes = [1, 8, 3], strides = [1, 1, 1]} : vector<3x8x3xf32> to vector<1x8x3xf32>
    %179 = vector.shape_cast %178 : vector<1x8x3xf32> to vector<8x3xf32>
    %180 = vector.extract_strided_slice %179 {offsets = [0, 1], sizes = [8, 1], strides = [1, 1]} : vector<8x3xf32> to vector<8x1xf32>
    %181 = vector.extract_strided_slice %170 {offsets = [0, 0, 0], sizes = [1, 8, 3], strides = [1, 1, 1]} : vector<3x8x3xf32> to vector<1x8x3xf32>
    %182 = vector.shape_cast %181 : vector<1x8x3xf32> to vector<8x3xf32>
    %183 = vector.extract_strided_slice %182 {offsets = [0, 2], sizes = [8, 1], strides = [1, 1]} : vector<8x3xf32> to vector<8x1xf32>
    %cst_63 = arith.constant 1.000000e+00 : f32
    %184 = vector.broadcast %cst_63 : f32 to vector<1x8xf32>
    %cst_64 = arith.constant dense<0.000000e+00> : vector<1x1xf32>
    %185 = tpu.matmul %184, %177, %cst_64 {dimension_numbers = #tpu.dot_dimension_numbers<[1], [0], [0], [1], [0, 0, 1, 1], [], []>} : vector<1x8xf32>, vector<8x1xf32>, vector<1x1xf32> -> vector<1x1xf32>
    %cst_65 = arith.constant 1.250000e-01 : f32
    %186 = vector.broadcast %cst_65 : f32 to vector<1x1xf32>
    %187 = arith.mulf %185, %186 : vector<1x1xf32>
    %188 = vector.broadcast %187 : vector<1x1xf32> to vector<8x1xf32>
    %189 = arith.subf %177, %188 : vector<8x1xf32>
    %190 = arith.mulf %189, %189 : vector<8x1xf32>
    %cst_66 = arith.constant dense<0.000000e+00> : vector<1x1xf32>
    %191 = tpu.matmul %184, %190, %cst_66 {dimension_numbers = #tpu.dot_dimension_numbers<[1], [0], [0], [1], [0, 0, 1, 1], [], []>} : vector<1x8xf32>, vector<8x1xf32>, vector<1x1xf32> -> vector<1x1xf32>
    %cst_67 = arith.constant 1.250000e-01 : f32
    %192 = vector.broadcast %cst_67 : f32 to vector<1x1xf32>
    %193 = arith.mulf %191, %192 : vector<1x1xf32>
    %cst_68 = arith.constant 9.99999974E-6 : f32
    %194 = vector.broadcast %cst_68 : f32 to vector<1x1xf32>
    %195 = arith.addf %193, %194 : vector<1x1xf32>
    %196 = math.rsqrt %195 : vector<1x1xf32>
    %197 = vector.broadcast %196 : vector<1x1xf32> to vector<8x1xf32>
    %198 = arith.mulf %189, %197 : vector<8x1xf32>
    %199 = arith.mulf %198, %180 : vector<8x1xf32>
    %200 = arith.addf %199, %183 : vector<8x1xf32>
    %201 = math.tanh %200 : vector<8x1xf32>
    %202 = vector.extract_strided_slice %169 {offsets = [1, 0, 0], sizes = [1, 8, 8], strides = [1, 1, 1]} : vector<3x8x8xf32> to vector<1x8x8xf32>
    %203 = vector.shape_cast %202 : vector<1x8x8xf32> to vector<8x8xf32>
    %cst_69 = arith.constant dense<0.000000e+00> : vector<8x1xf32>
    %204 = tpu.matmul %203, %201, %cst_69 {dimension_numbers = #tpu.dot_dimension_numbers<[1], [0], [0], [1], [0, 0, 1, 1], [], []>} : vector<8x8xf32>, vector<8x1xf32>, vector<8x1xf32> -> vector<8x1xf32>
    %205 = vector.extract_strided_slice %170 {offsets = [1, 0, 0], sizes = [1, 8, 3], strides = [1, 1, 1]} : vector<3x8x3xf32> to vector<1x8x3xf32>
    %206 = vector.shape_cast %205 : vector<1x8x3xf32> to vector<8x3xf32>
    %207 = vector.extract_strided_slice %206 {offsets = [0, 0], sizes = [8, 1], strides = [1, 1]} : vector<8x3xf32> to vector<8x1xf32>
    %208 = arith.addf %204, %207 : vector<8x1xf32>
    %209 = vector.extract_strided_slice %170 {offsets = [1, 0, 0], sizes = [1, 8, 3], strides = [1, 1, 1]} : vector<3x8x3xf32> to vector<1x8x3xf32>
    %210 = vector.shape_cast %209 : vector<1x8x3xf32> to vector<8x3xf32>
    %211 = vector.extract_strided_slice %210 {offsets = [0, 1], sizes = [8, 1], strides = [1, 1]} : vector<8x3xf32> to vector<8x1xf32>
    %212 = vector.extract_strided_slice %170 {offsets = [1, 0, 0], sizes = [1, 8, 3], strides = [1, 1, 1]} : vector<3x8x3xf32> to vector<1x8x3xf32>
    %213 = vector.shape_cast %212 : vector<1x8x3xf32> to vector<8x3xf32>
    %214 = vector.extract_strided_slice %213 {offsets = [0, 2], sizes = [8, 1], strides = [1, 1]} : vector<8x3xf32> to vector<8x1xf32>
    %cst_70 = arith.constant 1.000000e+00 : f32
    %215 = vector.broadcast %cst_70 : f32 to vector<1x8xf32>
    %cst_71 = arith.constant dense<0.000000e+00> : vector<1x1xf32>
    %216 = tpu.matmul %215, %208, %cst_71 {dimension_numbers = #tpu.dot_dimension_numbers<[1], [0], [0], [1], [0, 0, 1, 1], [], []>} : vector<1x8xf32>, vector<8x1xf32>, vector<1x1xf32> -> vector<1x1xf32>
    %cst_72 = arith.constant 1.250000e-01 : f32
    %217 = vector.broadcast %cst_72 : f32 to vector<1x1xf32>
    %218 = arith.mulf %216, %217 : vector<1x1xf32>
    %219 = vector.broadcast %218 : vector<1x1xf32> to vector<8x1xf32>
    %220 = arith.subf %208, %219 : vector<8x1xf32>
    %221 = arith.mulf %220, %220 : vector<8x1xf32>
    %cst_73 = arith.constant dense<0.000000e+00> : vector<1x1xf32>
    %222 = tpu.matmul %215, %221, %cst_73 {dimension_numbers = #tpu.dot_dimension_numbers<[1], [0], [0], [1], [0, 0, 1, 1], [], []>} : vector<1x8xf32>, vector<8x1xf32>, vector<1x1xf32> -> vector<1x1xf32>
    %cst_74 = arith.constant 1.250000e-01 : f32
    %223 = vector.broadcast %cst_74 : f32 to vector<1x1xf32>
    %224 = arith.mulf %222, %223 : vector<1x1xf32>
    %cst_75 = arith.constant 9.99999974E-6 : f32
    %225 = vector.broadcast %cst_75 : f32 to vector<1x1xf32>
    %226 = arith.addf %224, %225 : vector<1x1xf32>
    %227 = math.rsqrt %226 : vector<1x1xf32>
    %228 = vector.broadcast %227 : vector<1x1xf32> to vector<8x1xf32>
    %229 = arith.mulf %220, %228 : vector<8x1xf32>
    %230 = arith.mulf %229, %211 : vector<8x1xf32>
    %231 = arith.addf %230, %214 : vector<8x1xf32>
    %232 = math.tanh %231 : vector<8x1xf32>
    %233 = vector.extract_strided_slice %169 {offsets = [2, 0, 0], sizes = [1, 8, 8], strides = [1, 1, 1]} : vector<3x8x8xf32> to vector<1x8x8xf32>
    %234 = vector.shape_cast %233 : vector<1x8x8xf32> to vector<8x8xf32>
    %cst_76 = arith.constant dense<0.000000e+00> : vector<8x1xf32>
    %235 = tpu.matmul %234, %232, %cst_76 {dimension_numbers = #tpu.dot_dimension_numbers<[1], [0], [0], [1], [0, 0, 1, 1], [], []>} : vector<8x8xf32>, vector<8x1xf32>, vector<8x1xf32> -> vector<8x1xf32>
    %236 = vector.extract_strided_slice %170 {offsets = [2, 0, 0], sizes = [1, 8, 3], strides = [1, 1, 1]} : vector<3x8x3xf32> to vector<1x8x3xf32>
    %237 = vector.shape_cast %236 : vector<1x8x3xf32> to vector<8x3xf32>
    %238 = vector.extract_strided_slice %237 {offsets = [0, 0], sizes = [8, 1], strides = [1, 1]} : vector<8x3xf32> to vector<8x1xf32>
    %239 = arith.addf %235, %238 : vector<8x1xf32>
    %240 = vector.extract_strided_slice %170 {offsets = [2, 0, 0], sizes = [1, 8, 3], strides = [1, 1, 1]} : vector<3x8x3xf32> to vector<1x8x3xf32>
    %241 = vector.shape_cast %240 : vector<1x8x3xf32> to vector<8x3xf32>
    %242 = vector.extract_strided_slice %241 {offsets = [0, 1], sizes = [8, 1], strides = [1, 1]} : vector<8x3xf32> to vector<8x1xf32>
    %243 = vector.extract_strided_slice %170 {offsets = [2, 0, 0], sizes = [1, 8, 3], strides = [1, 1, 1]} : vector<3x8x3xf32> to vector<1x8x3xf32>
    %244 = vector.shape_cast %243 : vector<1x8x3xf32> to vector<8x3xf32>
    %245 = vector.extract_strided_slice %244 {offsets = [0, 2], sizes = [8, 1], strides = [1, 1]} : vector<8x3xf32> to vector<8x1xf32>
    %cst_77 = arith.constant 1.000000e+00 : f32
    %246 = vector.broadcast %cst_77 : f32 to vector<1x8xf32>
    %cst_78 = arith.constant dense<0.000000e+00> : vector<1x1xf32>
    %247 = tpu.matmul %246, %239, %cst_78 {dimension_numbers = #tpu.dot_dimension_numbers<[1], [0], [0], [1], [0, 0, 1, 1], [], []>} : vector<1x8xf32>, vector<8x1xf32>, vector<1x1xf32> -> vector<1x1xf32>
    %cst_79 = arith.constant 1.250000e-01 : f32
    %248 = vector.broadcast %cst_79 : f32 to vector<1x1xf32>
    %249 = arith.mulf %247, %248 : vector<1x1xf32>
    %250 = vector.broadcast %249 : vector<1x1xf32> to vector<8x1xf32>
    %251 = arith.subf %239, %250 : vector<8x1xf32>
    %252 = arith.mulf %251, %251 : vector<8x1xf32>
    %cst_80 = arith.constant dense<0.000000e+00> : vector<1x1xf32>
    %253 = tpu.matmul %246, %252, %cst_80 {dimension_numbers = #tpu.dot_dimension_numbers<[1], [0], [0], [1], [0, 0, 1, 1], [], []>} : vector<1x8xf32>, vector<8x1xf32>, vector<1x1xf32> -> vector<1x1xf32>
    %cst_81 = arith.constant 1.250000e-01 : f32
    %254 = vector.broadcast %cst_81 : f32 to vector<1x1xf32>
    %255 = arith.mulf %253, %254 : vector<1x1xf32>
    %cst_82 = arith.constant 9.99999974E-6 : f32
    %256 = vector.broadcast %cst_82 : f32 to vector<1x1xf32>
    %257 = arith.addf %255, %256 : vector<1x1xf32>
    %258 = math.rsqrt %257 : vector<1x1xf32>
    %259 = vector.broadcast %258 : vector<1x1xf32> to vector<8x1xf32>
    %260 = arith.mulf %251, %259 : vector<8x1xf32>
    %261 = arith.mulf %260, %242 : vector<8x1xf32>
    %262 = arith.addf %261, %245 : vector<8x1xf32>
    %263 = math.tanh %262 : vector<8x1xf32>
    %264 = vector.shape_cast %263 : vector<8x1xf32> to vector<1x8xf32>
    %c0_83 = arith.constant 0 : index
    %c0_84 = arith.constant 0 : index
    %c0_85 = arith.constant 0 : index
    %265 = vector.load %arg11[%c0_83, %c0_84, %c0_85] : memref<1x1x8xf32, #tpu.memory_space<vmem>>, vector<1x1x8xf32>
    %266 = vector.shape_cast %265 : vector<1x1x8xf32> to vector<1x8xf32>
    %267 = vector.shape_cast %264 : vector<1x8xf32> to vector<1x1x8xf32>
    tpu.vector_store %arg11[%c0_83, %c0_84, %c0_85], %267 {strides = array<i32>} : memref<1x1x8xf32, #tpu.memory_space<vmem>>, vector<1x1x8xf32>,
    return
  }
  func.func @transform_0(%arg0: i32) -> (i32, i32, i32) {
    %c0_i32 = arith.constant 0 : i32
    %c0_i32_0 = arith.constant 0 : i32
    %c0_i32_1 = arith.constant 0 : i32
    return %arg0, %c0_i32, %c0_i32_0 : i32, i32, i32
  }
  func.func @transform_1(%arg0: i32) -> (i32, i32, i32) {
    %c0_i32 = arith.constant 0 : i32
    %c0_i32_0 = arith.constant 0 : i32
    %c0_i32_1 = arith.constant 0 : i32
    return %arg0, %c0_i32, %c0_i32_0 : i32, i32, i32
  }
  func.func @transform_2(%arg0: i32) -> (i32, i32, i32) {
    %c0_i32 = arith.constant 0 : i32
    %c0_i32_0 = arith.constant 0 : i32
    %c0_i32_1 = arith.constant 0 : i32
    return %arg0, %c0_i32, %c0_i32_0 : i32, i32, i32
  }
  func.func @transform_3(%arg0: i32) -> (i32, i32) {
    %c0_i32 = arith.constant 0 : i32
    %c0_i32_0 = arith.constant 0 : i32
    %c0_i32_1 = arith.constant 0 : i32
    return %c0_i32, %c0_i32_0 : i32, i32
  }
  func.func @transform_4(%arg0: i32) -> (i32, i32, i32) {
    %c0_i32 = arith.constant 0 : i32
    %c0_i32_0 = arith.constant 0 : i32
    %c0_i32_1 = arith.constant 0 : i32
    %c0_i32_2 = arith.constant 0 : i32
    return %c0_i32, %c0_i32_0, %c0_i32_1 : i32, i32, i32
  }
  func.func @transform_5(%arg0: i32) -> (i32, i32, i32) {
    %c0_i32 = arith.constant 0 : i32
    %c0_i32_0 = arith.constant 0 : i32
    %c0_i32_1 = arith.constant 0 : i32
    %c0_i32_2 = arith.constant 0 : i32
    return %c0_i32, %c0_i32_0, %c0_i32_1 : i32, i32, i32
  }
  func.func @transform_6(%arg0: i32) -> (i32, i32, i32) {
    %c0_i32 = arith.constant 0 : i32
    %c0_i32_0 = arith.constant 0 : i32
    %c0_i32_1 = arith.constant 0 : i32
    %c0_i32_2 = arith.constant 0 : i32
    return %c0_i32, %c0_i32_0, %c0_i32_1 : i32, i32, i32
  }
  func.func @transform_7(%arg0: i32) -> (i32, i32, i32) {
    %c0_i32 = arith.constant 0 : i32
    %c0_i32_0 = arith.constant 0 : i32
    %c0_i32_1 = arith.constant 0 : i32
    %c0_i32_2 = arith.constant 0 : i32
    return %c0_i32, %c0_i32_0, %c0_i32_1 : i32, i32, i32
  }
  func.func @transform_8(%arg0: i32) -> (i32, i32, i32) {
    %c0_i32 = arith.constant 0 : i32
    %c0_i32_0 = arith.constant 0 : i32
    %c0_i32_1 = arith.constant 0 : i32
    return %arg0, %c0_i32, %c0_i32_0 : i32, i32, i32
  }
  func.func @transform_9(%arg0: i32) -> (i32, i32, i32) {
    %c0_i32 = arith.constant 0 : i32
    %c0_i32_0 = arith.constant 0 : i32
    %c0_i32_1 = arith.constant 0 : i32
    return %arg0, %c0_i32, %c0_i32_0 : i32, i32, i32
  }
  func.func @transform_10(%arg0: i32) -> (i32, i32, i32) {
    %c0_i32 = arith.constant 0 : i32
    %c0_i32_0 = arith.constant 0 : i32
    %c0_i32_1 = arith.constant 0 : i32
    return %arg0, %c0_i32, %c0_i32_0 : i32, i32, i32
  }
}

</mosaic_0001>

<bundles_post_ra>
// kernel: dense_gnn_diffpool_forward.7
= control target key start
LH: loop header
LB: loop body
LE: loop exit
PB: predicated region body
PF: predicated region fallthrough
CT: control target
= control target key end

     0   :  { %s1520_s21 = smov 0   ;;  %s1651_s0 = inlined_call_operand.vmem [shape: f32[2,8,3], index: 0, kind: input, shape index: {}]   ;;  %s1652_s1 = inlined_call_operand.vmem [shape: f32[8,3], index: 1, kind: input, shape index: {}]   ;;  %s1653_s2 = inlined_call_operand.vmem [shape: f32[8,3], index: 2, kind: input, shape index: {}]   ;;  %s1654_s3 = inlined_call_operand.vmem [shape: f32[3,8,8], index: 3, kind: input, shape index: {}]   ;;  %s1655_s4 = inlined_call_operand.vmem [shape: f32[3,8,3], index: 4, kind: input, shape index: {}]   ;;  %s1656_s5 = inlined_call_operand.vmem [shape: f32[2,8,8], index: 5, kind: output, shape index: {0}]   ;;  %s1657_s6 = inlined_call_operand.vmem [shape: f32[2,1,8], index: 6, kind: output, shape index: {1}]  }
   0x1 LB: > { %s1327_s22 = sadd.s32 4294967295, %s1475_s21   ;;  %p1331_p0 = scmp.ge.s32.totalorder %s1475_s21, 1  ;;  %s1475_s21 = sphi %s1520_s21, %s17_s21  }
   0x2   : > { %p214_p1 = scmp.lt.s32.totalorder %s1475_s21, 3 }
   0x4   : > { %p215_p2 = pnand %p1331_p0, %p214_p1 }
   0x5   : > { %p245_p3 = scmp.lt.s32.totalorder (!%p215_p2), %s1327_s22, 1  ;;  %v1477_v0 = vmov (!%p215_p2), 0.0   ;;  %vm1478_vm0 = vmmov (!%p215_p2), 0   ;;  %v258_v1 = vld [vmem:[%s1653_s2] sm:$0xff] (!%p215_p2)  ;;  %v1479_v2 = vmov (!%p215_p2), 0   ;;  %vm264_vm1 = vcmask (!%p215_p2), 23552  }
   0x6   : > { %218 = sbr.rel (%p215_p2) target bundleno = 3027 (0xbd3), region = 40  ;;  %1373 = vmatprep.subr.mxu0 (!%p215_p2), %v1477_v0  ;;  %1375 = vmatprep.mubr.msk.f32.mxu0 (!%p215_p2), %vm1478_vm0, %v1477_v0  ;;  %v257_v4 = vld [vmem:[%s1652_s1] sm:$0xff] (!%p215_p2)  ;;  %vm341_vm2 = vcmask (!%p215_p2), 64512   ;;  %v1480_v9 = vmov (!%p215_p2), 1.0   ;;  %v1481_v10 = vmov (!%p215_p2), 1   ;;  %v1482_v11 = vmov (!%p215_p2), 2  }
   0x7   : > { %1449 = vset.pattern.permute.xlu0 (!%p215_p2), %v1479_v2  ;;  %1378 = vmatprep.subr.mxu1 (!%p215_p2), %v1477_v0  ;;  %v416_v12 = vlaneseq (!%p215_p2)  ;;  %v516_v36 = vld [vmem:[%s1654_s3] sm:$0xff] (!%p215_p2)  ;;  %s1483_s14 = smov (!%p215_p2), 127   ;;  %s1484_s15 = smov (!%p215_p2), 126   ;;  %v520_v47 = vld [vmem:[%s1655_s4 + $0x8] sm:$0xff] (!%p215_p2)  ;;  %vm1247_vm3 = vcmask (!%p215_p2), 57344  }
   0x8   : > { %261 = vperm.xlu0 (!%p215_p2), %1449, %v258_v1   ;;  %1380 = vmatprep.mubr.msk.f32.mxu1 (!%p215_p2), %vm1478_vm0, %v1477_v0  ;;  %v519_v37 = vld [vmem:[%s1655_s4] sm:$0xff] (!%p215_p2)  ;;  %v517_v59 = vld [vmem:[%s1654_s3 + $0x8] sm:$0xff] (!%p215_p2) }
   0x9   : > { %1451 = vset.pattern.permute.xlu1 (!%p215_p2), %v1482_v11  ;;  %v1557_v13 = vshrl.u32 (!%p215_p2), %v416_v12, 7 }
   0xa   : > { %506 = vperm.xlu1 (!%p215_p2), %1451, %v258_v1  }
   0xb   : > { %v1560_v14 = vsub.s32 (!%p215_p2), 0, %v1557_v13 }
   0xc   : > { %1450 = vset.pattern.permute.xlu0 (!%p215_p2), %v1481_v10 }
   0xd   : > { %s1659_s22 = smov (!%p245_p3, %s1327_s22), 1  ;;  %501 = vperm.xlu0 %1450, %v258_v1  }
   0xe   : > { %s1332_s25 = sshll.u32 %s1659_s22, 3 }
   0xf   : > { %s248_s28 = scalar_lea.vmem %s1651_s0, %s1332_s25  ;;  %s252_s9 = scalar_lea.vmem %s1656_s5, %s1332_s25 }
  0x10   : > { %v256_v3 = vld [vmem:[%s248_s28] sm:$0xff]  ;;  %s255_s28 = scalar_lea.vmem %s1657_s6, %s1659_s22 }
  0x11   : > { %1374 = vmatpush3.xpose.msk.msra.mxu0 %vm264_vm1, %v256_v3  ;;  %1452 = vset.pattern.permute.xlu0 %v1479_v2 }
  0x12   : > { %1388 = vmatprep.subr.mxu0 %v1477_v0  ;;  %751 = vrot.lane.b32.xlu0 %v519_v37, %s1483_s14 }
  0x14   : > { %1376 = vmatmul.mubr.msk.f32.vlgmr.msra.gmra.mrb[0].mxu0 %vm264_vm1, %v257_v4 }
  0x15   : > { %1390 = vmatprep.mubr.msk.f32.mxu0 %vm1478_vm0, %v1477_v0 }
  0x16   : > { %755 = vrot.lane.b32.xlu0 %v519_v37, %s1484_s15 }
  0x1a   : > { %989 = vrot.lane.b32.xlu0 %v520_v47, %s1483_s14 }
  0x1e   : > { %993 = vrot.lane.b32.xlu0 %v520_v47, %s1484_s15 }
  0x87   : > { %v262_v5 = vpop.permute.xlu0 %261 }
  0x89   : > { %v507_v29 = vpop.permute.xlu1 %506 }
  0x8c   : > { %v502_v27 = vpop.permute.xlu0 %501 }
  0x90   : > { %v752_v52 = vpop.permute.xlu0 %751 }
  0x94   : > { %v756_v56 = vpop.permute.xlu0 %755 }
  0xe7   : > { %v337_v6 = vpop.f32.mrb[0].mxu0 }
  0xe8   : > { %v338_v7 = vadd.f32 %v337_v6, %v262_v5  ;;  %v1377_v8 = vpop.f32.mrb[1].mxu0 }
  0xea   : > { %1379 = vmatpush3.msra.mxu1 %v338_v7 }
  0xeb   : > { %1381 = vmatmul.mubr.msk.f32.vlgmr.msra.gmra.mrb[0].mxu1 %vm341_vm2, %v1480_v9  ;;  %1383 = vmatprep.subr.mxu1 %v1477_v0 }
  0xec   : > { %1385 = vmatprep.mubr.msk.f32.mxu1 %vm1478_vm0, %v1477_v0 }
 0x1be   : > { %v411_v15 = vpop.f32.mrb[0].mxu1 }
 0x1bf   : > { %v415_v16 = vmul.f32 0.125, %v411_v15  ;;  %v1382_v17 = vpop.f32.mrb[1].mxu1 }
 0x1c1   : > { %v419_v18 = vrot.slane %v415_v16, %v1560_v14  ;;  %v990_v16 = vpop.permute.xlu0 %989 }
 0x1c3   : > { %v420_v19 = vsub.f32 %v338_v7, %v419_v18  ;;  %v521_v7 = vld [vmem:[%s1655_s4 + $0x10] sm:$0xff] }
 0x1c4   : > { %1227 = vrot.lane.b32.xlu0 %v521_v7, %s1483_s14 }
 0x1c5   : > { %v421_v20 = vmul.f32 %v420_v19, %v420_v19 }
 0x1c7   : > { %1384 = vmatpush3.msra.mxu1 %v421_v20  ;;  %v994_v20 = vpop.permute.xlu0 %993 }
 0x1c8   : > { %1386 = vmatmul.mubr.msk.f32.vlgmr.msra.gmra.mrb[2].mxu1 %vm341_vm2, %v1480_v9  ;;  %1393 = vmatprep.subr.mxu1 %v1477_v0 }
 0x1c9   : > { %1395 = vmatprep.mubr.msk.f32.mxu1 %vm1478_vm0, %v1477_v0  ;;  %1231 = vrot.lane.b32.xlu0 %v521_v7, %s1484_s15 }
 0x29b   : > { %v488_v21 = vpop.f32.mrb[2].mxu1 }
 0x29c   : > { %v492_v22 = vmul.f32 0.125, %v488_v21  ;;  %v1387_v23 = vpop.f32.mrb[3].mxu1 }
 0x29d   : > { %v518_v23 = vld [vmem:[%s1654_s3 + $0x10] sm:$0xff] }
 0x29e   : > { %v493_v24 = vadd.f32 1e-05, %v492_v22 }
 0x2a0   : > { %1453 = vrsqrt.f32 %v493_v24 }
 0x2aa   : > { %v1454_v25 = vpop.eup %1453 }
 0x2ab   : > { %v498_v26 = vrot.slane %v1454_v25, %v1560_v14 }
 0x2ad   : > { %v499_v28 = vmul.f32 %v498_v26, %v420_v19 }
 0x2af   : > { %v504_v30 = vmul.f32 %v502_v27, %v499_v28 }
 0x2b1   : > { %v509_v31 = vadd.f32 %v507_v29, %v504_v30 }
 0x2b3   : > { %1455 = vtanh.f32 %v509_v31 }
 0x2bd   : > { %v1456_v32 = vpop.eup %1455 }
 0x2be   : > { %511 = vst.msk [vmem:[%s252_s9] sm:$0xff] %vm341_vm2, %v1456_v32  ;;  %v512_v33 = vsel %vm341_vm2, %v1456_v32, 0.0 }
 0x2bf   : > { %513 = vadd.xlane.f32.xlu1 %v512_v33 }
 0x34c   : > { %v514_v34 = vpop.xlane.xlu1 %513 }
 0x34d   : > { %v515_v35 = vmul.f32 0.125, %v514_v34 }
 0x34f   : > { %1389 = vmatpush3.msra.mxu0 %v515_v35 }
 0x350   : > { %1391 = vmatmul.mubr.msk.f32.vlgmr.msra.gmra.mrb[2].mxu0 %vm341_vm2, %v516_v36  ;;  %1398 = vmatprep.subr.mxu0 %v1477_v0 }
 0x351   : > { %1400 = vmatprep.mubr.msk.f32.mxu0 %vm1478_vm0, %v1477_v0 }
 0x423   : > { %v591_v38 = vpop.f32.mrb[2].mxu0 }
 0x424   : > { %v592_v39 = vadd.f32 %v591_v38, %v519_v37  ;;  %v1392_v40 = vpop.f32.mrb[3].mxu0  ;;  %v1228_v37 = vpop.permute.xlu0 %1227 }
 0x426   : > { %1394 = vmatpush3.msra.mxu1 %v592_v39 }
 0x427   : > { %1396 = vmatmul.mubr.msk.f32.vlgmr.msra.gmra.mrb[4].mxu1 %vm341_vm2, %v1480_v9  ;;  %1403 = vmatprep.subr.mxu1 %v1477_v0 }
 0x428   : > { %1405 = vmatprep.mubr.msk.f32.mxu1 %vm1478_vm0, %v1477_v0 }
 0x4fa   : > { %v661_v41 = vpop.f32.mrb[4].mxu1 }
 0x4fb   : > { %v665_v42 = vmul.f32 0.125, %v661_v41  ;;  %v1397_v43 = vpop.f32.mrb[5].mxu1  ;;  %v1232_v41 = vpop.permute.xlu0 %1231 }
 0x4fd   : > { %v669_v44 = vrot.slane %v665_v42, %v1560_v14 }
 0x4ff   : > { %v670_v45 = vsub.f32 %v592_v39, %v669_v44 }
 0x501   : > { %v671_v46 = vmul.f32 %v670_v45, %v670_v45 }
 0x503   : > { %1399 = vmatpush3.msra.mxu0 %v671_v46 }
 0x504   : > { %1401 = vmatmul.mubr.msk.f32.vlgmr.msra.gmra.mrb[4].mxu0 %vm341_vm2, %v1480_v9  ;;  %1408 = vmatprep.subr.mxu0 %v1477_v0 }
 0x505   : > { %1410 = vmatprep.mubr.msk.f32.mxu0 %vm1478_vm0, %v1477_v0 }
 0x5d7   : > { %v738_v48 = vpop.f32.mrb[4].mxu0 }
 0x5d8   : > { %v742_v49 = vmul.f32 0.125, %v738_v48  ;;  %v1402_v50 = vpop.f32.mrb[5].mxu0 }
 0x5da   : > { %v743_v51 = vadd.f32 1e-05, %v742_v49 }
 0x5dc   : > { %1457 = vrsqrt.f32 %v743_v51 }
 0x5e6   : > { %v1458_v53 = vpop.eup %1457 }
 0x5e7   : > { %v748_v54 = vrot.slane %v1458_v53, %v1560_v14 }
 0x5e9   : > { %v749_v55 = vmul.f32 %v748_v54, %v670_v45  ;;  %v1241_v45 = vand.u32 127, %v416_v12 }
 0x5eb   : > { %v754_v57 = vmul.f32 %v752_v52, %v749_v55 }
 0x5ed   : > { %v758_v58 = vadd.f32 %v756_v56, %v754_v57 }
 0x5ef   : > { %1459 = vtanh.f32 %v758_v58 }
 0x5f9   : > { %v1460_v60 = vpop.eup %1459 }
 0x5fa   : > { %1404 = vmatpush3.msra.mxu1 %v1460_v60 }
 0x5fb   : > { %1406 = vmatmul.mubr.msk.f32.vlgmr.msra.gmra.mrb[6].mxu1 %vm341_vm2, %v517_v59  ;;  %1413 = vmatprep.subr.mxu1 %v1477_v0 }
 0x5fc   : > { %1415 = vmatprep.mubr.msk.f32.mxu1 %vm1478_vm0, %v1477_v0 }
 0x6ce   : > { %v829_v61 = vpop.f32.mrb[6].mxu1 }
 0x6cf   : > { %v830_v62 = vadd.f32 %v829_v61, %v520_v47  ;;  %v1407_v63 = vpop.f32.mrb[7].mxu1 }
 0x6d1   : > { %1409 = vmatpush3.msra.mxu0 %v830_v62 }
 0x6d2   : > { %1411 = vmatmul.mubr.msk.f32.vlgmr.msra.gmra.mrb[6].mxu0 %vm341_vm2, %v1480_v9  ;;  %1418 = vmatprep.subr.mxu0 %v1477_v0 }
 0x6d3   : > { %1420 = vmatprep.mubr.msk.f32.mxu0 %vm1478_vm0, %v1477_v0 }
 0x7a5   : > { %v899_v1 = vpop.f32.mrb[6].mxu0 }
 0x7a6   : > { %v903_v2 = vmul.f32 0.125, %v899_v1  ;;  %v1412_v3 = vpop.f32.mrb[7].mxu0 }
 0x7a8   : > { %v907_v4 = vrot.slane %v903_v2, %v1560_v14 }
 0x7aa   : > { %v908_v5 = vsub.f32 %v830_v62, %v907_v4 }
 0x7ac   : > { %v909_v6 = vmul.f32 %v908_v5, %v908_v5 }
 0x7ae   : > { %1414 = vmatpush3.msra.mxu1 %v909_v6 }
 0x7af   : > { %1416 = vmatmul.mubr.msk.f32.vlgmr.msra.gmra.mrb[8].mxu1 %vm341_vm2, %v1480_v9  ;;  %1423 = vmatprep.subr.mxu1 %v1477_v0 }
 0x7b0   : > { %1425 = vmatprep.mubr.msk.f32.mxu1 %vm1478_vm0, %v1477_v0 }
 0x882   : > { %v976_v8 = vpop.f32.mrb[8].mxu1 }
 0x883   : > { %v980_v10 = vmul.f32 0.125, %v976_v8  ;;  %v1417_v11 = vpop.f32.mrb[9].mxu1 }
 0x885   : > { %v981_v15 = vadd.f32 1e-05, %v980_v10 }
 0x887   : > { %1461 = vrsqrt.f32 %v981_v15 }
 0x891   : > { %v1462_v17 = vpop.eup %1461 }
 0x892   : > { %v986_v18 = vrot.slane %v1462_v17, %v1560_v14 }
 0x894   : > { %v987_v19 = vmul.f32 %v986_v18, %v908_v5 }
 0x896   : > { %v992_v21 = vmul.f32 %v990_v16, %v987_v19 }
 0x898   : > { %v996_v22 = vadd.f32 %v994_v20, %v992_v21 }
 0x89a   : > { %1463 = vtanh.f32 %v996_v22 }
 0x8a4   : > { %v1464_v24 = vpop.eup %1463 }
 0x8a5   : > { %1419 = vmatpush3.msra.mxu0 %v1464_v24 }
 0x8a6   : > { %1421 = vmatmul.mubr.msk.f32.vlgmr.msra.gmra.mrb[8].mxu0 %vm341_vm2, %v518_v23  ;;  %1428 = vmatprep.subr.mxu0 %v1477_v0 }
 0x8a7   : > { %1430 = vmatprep.mubr.msk.f32.mxu0 %vm1478_vm0, %v1477_v0 }
 0x979   : > { %v1067_v25 = vpop.f32.mrb[8].mxu0 }
 0x97a   : > { %v1068_v26 = vadd.f32 %v1067_v25, %v521_v7  ;;  %v1422_v27 = vpop.f32.mrb[9].mxu0 }
 0x97c   : > { %1424 = vmatpush3.msra.mxu1 %v1068_v26 }
 0x97d   : > { %1426 = vmatmul.mubr.msk.f32.vlgmr.msra.gmra.mrb[10].mxu1 %vm341_vm2, %v1480_v9 }
 0xa50   : > { %v1137_v28 = vpop.f32.mrb[10].mxu1 }
 0xa51   : > { %v1141_v29 = vmul.f32 0.125, %v1137_v28  ;;  %v1427_v30 = vpop.f32.mrb[11].mxu1 }
 0xa53   : > { %v1145_v31 = vrot.slane %v1141_v29, %v1560_v14 }
 0xa55   : > { %v1146_v32 = vsub.f32 %v1068_v26, %v1145_v31 }
 0xa57   : > { %v1147_v33 = vmul.f32 %v1146_v32, %v1146_v32 }
 0xa59   : > { %1429 = vmatpush3.msra.mxu0 %v1147_v33 }
 0xa5a   : > { %1431 = vmatmul.mubr.msk.f32.vlgmr.msra.gmra.mrb[10].mxu0 %vm341_vm2, %v1480_v9  ;;  %v1244_v9 = vsub.s32 %v1241_v45, %v1557_v13 }
 0xb2d   : > { %v1214_v34 = vpop.f32.mrb[10].mxu0 }
 0xb2e   : > { %v1218_v0 = vmul.f32 0.125, %v1214_v34  ;;  %v1432_v35 = vpop.f32.mrb[11].mxu0 }
 0xb30   : > { %v1219_v36 = vadd.f32 1e-05, %v1218_v0 }
 0xb32   : > { %1465 = vrsqrt.f32 %v1219_v36 }
 0xb3c   : > { %v1466_v38 = vpop.eup %1465 }
 0xb3d   : > { %v1224_v39 = vrot.slane %v1466_v38, %v1560_v14 }
 0xb3f   : > { %v1225_v40 = vmul.f32 %v1224_v39, %v1146_v32 }
 0xb41   : > { %v1230_v42 = vmul.f32 %v1228_v37, %v1225_v40 }
 0xb43   : > { %v1234_v43 = vadd.f32 %v1232_v41, %v1230_v42 }
 0xb45   : > { %1467 = vtanh.f32 %v1234_v43 }
 0xb4f   : > { %v1468_v44 = vpop.eup %1467 }
 0xb50   : > { %1238 = vperm.xlu0 %1452, %v1468_v44  }
 0xbcf   : > { %v1239_v46 = vpop.permute.xlu0 %1238 }
 0xbd0   : > { %v1245_v47 = vrot.slane %v1239_v46, %v1244_v9 }
 0xbd2   : > { %1248 = vst.msk [vmem:[%s255_s28] sm:$0x1] %vm1247_vm3, %v1245_v47 }
 0xbd3 PF: > { %s17_s21 = sadd.s32 1, %s1475_s21  }
 0xbd4   : > { %p14_p4 = scmp.ge.s32.totalorder %s17_s21, 4  }
 0xbd6   :  { %16 = sbr.rel (!%p14_p4) target bundleno = 1 (0x1), region = 82 }

// kernel: dense_gnn_diffpool_forward.8
= control target key start
LH: loop header
LB: loop body
LE: loop exit
PB: predicated region body
PF: predicated region fallthrough
CT: control target
= control target key end

     0   :  { %s3005_s13 = smov 0   ;;  %s3253_s0 = inlined_call_operand.vmem [shape: f32[2,8,8], index: 0, kind: input, shape index: {}]   ;;  %s3254_s1 = inlined_call_operand.vmem [shape: bf16[2,8,8], index: 1, kind: input, shape index: {}]   ;;  %s3255_s2 = inlined_call_operand.vmem [shape: f32[2,1,8], index: 2, kind: input, shape index: {}]   ;;  %s3256_s3 = inlined_call_operand.vmem [shape: f32[8,32], index: 3, kind: input, shape index: {}]   ;;  %s3257_s4 = inlined_call_operand.vmem [shape: f32[3,8,8], index: 4, kind: input, shape index: {}]   ;;  %s3258_s5 = inlined_call_operand.vmem [shape: f32[4,8,3], index: 5, kind: input, shape index: {}]   ;;  %s3259_s6 = inlined_call_operand.vmem [shape: f32[3,8,8], index: 6, kind: input, shape index: {}]   ;;  %s3260_s7 = inlined_call_operand.vmem [shape: f32[3,8,3], index: 7, kind: input, shape index: {}]   ;;  %s3261_s8 = inlined_call_operand.vmem [shape: f32[2,8,8], index: 8, kind: output, shape index: {0}]   ;;  %s3262_s9 = inlined_call_operand.vmem [shape: f32[2,8,8], index: 9, kind: output, shape index: {1}]   ;;  %s3263_s10 = inlined_call_operand.vmem [shape: f32[2,1,8], index: 10, kind: output, shape index: {2}]  }
   0x1 LB: > { %s2650_s14 = sadd.s32 4294967295, %s2937_s13   ;;  %p2654_p0 = scmp.ge.s32.totalorder %s2937_s13, 1  ;;  %s2937_s13 = sphi %s3005_s13, %s21_s13  }
   0x2   : > { %p333_p1 = scmp.lt.s32.totalorder %s2937_s13, 3 }
   0x4   : > { %p334_p2 = pnand %p2654_p0, %p333_p1 }
   0x5   : > { %p383_p3 = scmp.lt.s32.totalorder (!%p334_p2), %s2650_s14, 1  ;;  %v416_v0 = vld [vmem:[%s3256_s3] sm:$0xff] (!%p334_p2)  ;;  %v2939_v1 = vmov (!%p334_p2), 0.0   ;;  %vm2940_vm0 = vmmov (!%p334_p2), 0   ;;  %s2941_s17 = smov (!%p334_p2), 120   ;;  %vm424_vm1 = vcmask (!%p334_p2), 64512   ;;  %v953_v34 = vlaneseq (!%p334_p2) }
   0x6   : > { %337 = sbr.rel (%p334_p2) target bundleno = 5423 (0x152f), region = 52  ;;  %2741 = vmatprep.subr.mxu0 (!%p334_p2), %v2939_v1  ;;  %2746 = vmatprep.subr.mxu1 (!%p334_p2), %v2939_v1  ;;  %s2942_s29 = smov (!%p334_p2), 112   ;;  %v2944_v14 = vmov (!%p334_p2), 0   ;;  %v420_v15 = vld [vmem:[%s3258_s5] sm:$0xff] (!%p334_p2)  ;;  %v2945_v30 = vmov (!%p334_p2), 1.0   ;;  %v2946_v31 = vmov (!%p334_p2), 2  }
   0x7   : > { %2743 = vmatprep.mubr.msk.f32.mxu0 (!%p334_p2), %vm2940_vm0, %v2939_v1  ;;  %2748 = vmatprep.mubr.msk.f32.mxu1 (!%p334_p2), %vm2940_vm0, %v2939_v1  ;;  %s2943_s30 = smov (!%p334_p2), 104   ;;  %v2947_v32 = vmov (!%p334_p2), 1   ;;  %v421_v33 = vld [vmem:[%s3258_s5 + $0x8] sm:$0xff] (!%p334_p2)  ;;  %v3086_v35 = vshrl.u32 (!%p334_p2), %v953_v34, 7  ;;  %v417_v54 = vld [vmem:[%s3257_s4] sm:$0xff] (!%p334_p2)  ;;  %s2948_s20 = smov (!%p334_p2), 127  }
   0x8   : > { %572 = vrot.lane.b32.xlu1 (!%p334_p2), %v416_v0, %s2941_s17  ;;  %2890 = vset.pattern.permute.xlu0 (!%p334_p2), %v2944_v14  ;;  %s2949_s21 = smov (!%p334_p2), 126   ;;  %vm2518_vm2 = vcmask (!%p334_p2), 57344  }
   0x9   : > { %2891 = vset.pattern.permute.xlu1 (!%p334_p2), %v2944_v14  ;;  %v3089_v36 = vsub.s32 (!%p334_p2), 0, %v3086_v35 }
   0xc   : > { %718 = vrot.lane.b32.xlu1 (!%p334_p2), %v416_v0, %s2942_s29 }
   0xd   : > { %s3265_s14 = smov (!%p383_p3, %s2650_s14), 1 }
   0xe   : > { %s2656_s18 = sshll.u32 %s3265_s14, 2  ;;  %s3026_s19 = sshll.u32 %s3265_s14, 3 }
   0xf   : > { %s390_s22 = scalar_lea.vmem %s3254_s1, %s2656_s18  ;;  %s386_s25 = scalar_lea.vmem %s3253_s0, %s3026_s19 }
  0x10   : > { %v406_v2 = vld [vmem:[%s390_s22] sm:$0xf]  ;;  %s393_s28 = scalar_lea.vmem %s3255_s2, %s3265_s14  ;;  %875 = vperm.xlu1 %2891, %v420_v15   ;;  %s401_s15 = scalar_lea.vmem %s3262_s9, %s3026_s19 }
  0x11   : > { %v407_v3 = vunpack.c.l.bf16 %v406_v2  ;;  %v3035_v4 = vld [vmem:[%s386_s25] sm:$0xff]  ;;  %s404_s12 = scalar_lea.vmem %s3263_s10, %s3265_s14 }
  0x12   : > { %v2659_v5 = vld [vmem:[%s393_s28] ss:$0 sm:$0xff] }
  0x13   : > { %2742 = vmatpush3.msra.mxu0 %v407_v3  ;;  %2747 = vmatpush3.xpose.msk.msra.mxu1 %vm424_vm1, %v407_v3  ;;  %v422_v3 = vld [vmem:[%s3258_s5 + $0x10] sm:$0xff] }
  0x14   : > { %2744 = vmatmul.mubr.msk.f32.vlgmr.msra.gmra.mrb[0].mxu0 %vm424_vm1, %v3035_v4  ;;  %414 = vbcast.lane.b32.xlu0 %v2659_v5, 256 }
  0x15   : > { %2756 = vmatprep.subr.mxu1 %v2939_v1  ;;  %2751 = vmatprep.subr.mxu0 %v2939_v1 }
  0x16   : > { %2749 = vmatmul.mubr.msk.f32.vlgmr.msra.gmra.mrb[0].mxu1 %vm424_vm1, %v3035_v4  ;;  %2753 = vmatprep.mubr.msk.f32.mxu0 %vm2940_vm0, %v2939_v1 }
  0x17   : > { %2758 = vmatprep.mubr.msk.f32.mxu1 %vm2940_vm0, %v2939_v1  ;;  %2892 = vset.pattern.permute.xlu1 %v2947_v32 }
  0x18   : > { %793 = vrot.lane.b32.xlu0 %v416_v0, %s2943_s30  ;;  %1038 = vperm.xlu1 %2892, %v420_v15   ;;  %s397_s30 = scalar_lea.vmem %s3261_s8, %s3026_s19 }
  0x1c   : > { %2894 = vset.pattern.permute.xlu1 %v2944_v14 }
  0x1d   : > { %1050 = vperm.xlu1 %2894, %v421_v33  }
  0x21   : > { %2895 = vset.pattern.permute.xlu1 %v2947_v32 }
  0x22   : > { %1282 = vperm.xlu1 %2895, %v421_v33  }
  0x26   : > { %2896 = vset.pattern.permute.xlu1 %v2944_v14 }
  0x27   : > { %1294 = vperm.xlu1 %2896, %v422_v3  }
  0x2b   : > { %2898 = vset.pattern.permute.xlu1 %v2946_v31 }
  0x2c   : > { %1531 = vperm.xlu1 %2898, %v422_v3  }
  0x30   : > { %2899 = vset.pattern.permute.xlu1 %v2944_v14 }
  0x7a   : > { %v573_v7 = vpop.permute.xlu1 %572 }
  0x7e   : > { %v719_v13 = vpop.permute.xlu1 %718 }
  0x86   : > { %v415_v6 = vpop.permute.xlu0 %414 }
  0x8a   : > { %v794_v11 = vpop.permute.xlu0 %793 }
  0x8f   : > { %v876_v27 = vpop.permute.xlu1 %875 }
  0x97   : > { %v1039_v49 = vpop.permute.xlu1 %1038 }
  0x9c   : > { %v1051_v56 = vpop.permute.xlu1 %1050 }
  0xe7   : > { %v494_v8 = vpop.f32.mrb[0].mxu0 }
  0xe8   : > { %v2745_v9 = vpop.f32.mrb[1].mxu0  ;;  %2757 = vmatpush3.msra.mxu1 %v494_v8 }
  0xe9   : > { %v567_v10 = vpop.f32.mrb[0].mxu1  ;;  %2759 = vmatmul.mubr.msk.f32.vlgmr.msra.gmra.mrb[2].mxu1 %vm424_vm1, %v416_v0  ;;  %2766 = vmatprep.subr.mxu1 %v2939_v1 }
  0xea   : > { %2752 = vmatpush3.msra.mxu0 %v567_v10  ;;  %2767 = vmatpush3.msra.mxu1 %v415_v6  ;;  %v2750_v12 = vpop.f32.mrb[1].mxu1 }
  0xeb   : > { %2754 = vmatmul.mubr.msk.f32.vlgmr.msra.gmra.mrb[2].mxu0 %vm424_vm1, %v573_v7  ;;  %2768 = vmatprep.mubr.msk.f32.mxu1 %vm2940_vm0, %v2939_v1 }
  0xec   : > { %2761 = vmatprep.subr.mxu0 %v2939_v1  ;;  %2763 = vmatprep.mubr.msk.f32.mxu0 %vm2940_vm0, %v2939_v1 }
  0xed   : > { %2769 = vmatmul.mubr.msk.f32.vlgmr.msra.gmra.mrb[4].mxu1 %vm424_vm1, %v794_v11  ;;  %2762 = vmatpush3.msra.mxu0 %v3035_v4  ;;  %v1283_v11 = vpop.permute.xlu1 %1282 }
  0xee   : > { %2771 = vmatprep.subr.mxu0 %v2939_v1  ;;  %2776 = vmatprep.subr.mxu1 %v2939_v1 }
  0xef   : > { %2764 = vmatmul.mubr.msk.f32.vlgmr.msra.gmra.mrb[4].mxu0 %vm424_vm1, %v719_v13  ;;  %2778 = vmatprep.mubr.msk.f32.mxu1 %vm2940_vm0, %v2939_v1 }
  0xf0   : > { %2773 = vmatprep.mubr.msk.f32.mxu0 %vm2940_vm0, %v2939_v1 }
 0x1bc   : > { %v714_v16 = vpop.f32.mrb[2].mxu1 }
 0x1bd   : > { %v2760_v17 = vpop.f32.mrb[3].mxu1 }
 0x1be   : > { %v642_v18 = vpop.f32.mrb[2].mxu0  ;;  %v418_v17 = vld [vmem:[%s3257_s4 + $0x8] sm:$0xff] }
 0x1bf   : > { %v715_v19 = vadd.f32 %v714_v16, %v642_v18  ;;  %v2755_v20 = vpop.f32.mrb[3].mxu0 }
 0x1c0   : > { %v863_v21 = vpop.f32.mrb[4].mxu1 }
 0x1c1   : > { %869 = vperm.xlu0 %2890, %v863_v21   ;;  %v2770_v22 = vpop.f32.mrb[5].mxu1 }
 0x1c2   : > { %v788_v23 = vpop.f32.mrb[4].mxu0 }
 0x1c3   : > { %v792_v24 = vadd.f32 %v788_v23, %v715_v19  ;;  %v2765_v25 = vpop.f32.mrb[5].mxu0  ;;  %v1295_v19 = vpop.permute.xlu1 %1294  ;;  %v423_v23 = vld [vmem:[%s3258_s5 + $0x18] sm:$0xff] }
 0x1c4   : > { %1538 = vperm.xlu1 %2899, %v423_v23  }
 0x1c5   : > { %2893 = vset.pattern.permute.xlu0 %v2946_v31 }
 0x1c6   : > { %1043 = vperm.xlu0 %2893, %v420_v15  }
 0x1c8   : > { %2900 = vset.pattern.permute.xlu1 %v2946_v31 }
 0x1c9   : > { %1775 = vperm.xlu1 %2900, %v423_v23  }
 0x1ca   : > { %1287 = vperm.xlu0 %2893, %v421_v33  }
 0x1cd   : > { %2901 = vset.pattern.permute.xlu1 %v2944_v14 }
 0x1ce   : > { %2897 = vset.pattern.permute.xlu0 %v2947_v32 }
 0x1cf   : > { %1526 = vperm.xlu0 %2897, %v422_v3  }
 0x1d3   : > { %1770 = vperm.xlu0 %2897, %v423_v23  }
 0x1d7   : > { %2902 = vset.pattern.permute.xlu0 %v2944_v14 }
 0x240   : > { %v870_v26 = vpop.permute.xlu0 %869 }
 0x241   : > { %v872_v28 = vadd.f32 %v870_v26, %v792_v24 }
 0x243   : > { %v878_v29 = vadd.f32 %v876_v27, %v872_v28 }
 0x245   : > { %2772 = vmatpush3.msra.mxu0 %v878_v29  ;;  %v1044_v52 = vpop.permute.xlu0 %1043 }
 0x246   : > { %2774 = vmatmul.mubr.msk.f32.vlgmr.msra.gmra.mrb[6].mxu0 %vm424_vm1, %v2945_v30  ;;  %2781 = vmatprep.subr.mxu0 %v2939_v1 }
 0x247   : > { %2783 = vmatprep.mubr.msk.f32.mxu0 %vm2940_vm0, %v2939_v1 }
 0x249   : > { %v1288_v15 = vpop.permute.xlu0 %1287 }
 0x319   : > { %v948_v37 = vpop.f32.mrb[6].mxu0 }
 0x31a   : > { %v952_v38 = vmul.f32 0.125, %v948_v37  ;;  %v2775_v39 = vpop.f32.mrb[7].mxu0 }
 0x31c   : > { %v956_v40 = vrot.slane %v952_v38, %v3089_v36 }
 0x31e   : > { %v957_v41 = vsub.f32 %v878_v29, %v956_v40  ;;  %v1527_v40 = vpop.permute.xlu0 %1526 }
 0x320   : > { %v958_v42 = vmul.f32 %v957_v41, %v957_v41 }
 0x322   : > { %2777 = vmatpush3.msra.mxu1 %v958_v42 }
 0x323   : > { %2779 = vmatmul.mubr.msk.f32.vlgmr.msra.gmra.mrb[6].mxu1 %vm424_vm1, %v2945_v30  ;;  %2786 = vmatprep.subr.mxu1 %v2939_v1 }
 0x324   : > { %2788 = vmatprep.mubr.msk.f32.mxu1 %vm2940_vm0, %v2939_v1 }
 0x3f6   : > { %v1025_v43 = vpop.f32.mrb[6].mxu1 }
 0x3f7   : > { %v1029_v44 = vmul.f32 0.125, %v1025_v43  ;;  %v2780_v45 = vpop.f32.mrb[7].mxu1 }
 0x3f9   : > { %v1030_v46 = vadd.f32 1e-05, %v1029_v44  ;;  %v419_v44 = vld [vmem:[%s3257_s4 + $0x10] sm:$0xff] }
 0x3fb   : > { %2903 = vrsqrt.f32 %v1030_v46 }
 0x405   : > { %v2904_v47 = vpop.eup %2903 }
 0x406   : > { %v1035_v48 = vrot.slane %v2904_v47, %v3089_v36 }
 0x408   : > { %v1036_v50 = vmul.f32 %v1035_v48, %v957_v41  ;;  %v1532_v41 = vpop.permute.xlu1 %1531 }
 0x40a   : > { %v1041_v51 = vmul.f32 %v1039_v49, %v1036_v50 }
 0x40c   : > { %v1046_v53 = vadd.f32 %v1044_v52, %v1041_v51  ;;  %v1539_v46 = vpop.permute.xlu1 %1538 }
 0x40e   : > { %2905 = vtanh.f32 %v1046_v53 }
 0x418   : > { %v2906_v55 = vpop.eup %2905 }
 0x419   : > { %2782 = vmatpush3.msra.mxu0 %v2906_v55 }
 0x41a   : > { %2784 = vmatmul.mubr.msk.f32.vlgmr.msra.gmra.mrb[8].mxu0 %vm424_vm1, %v417_v54  ;;  %2791 = vmatprep.subr.mxu0 %v2939_v1 }
 0x41b   : > { %2793 = vmatprep.mubr.msk.f32.mxu0 %vm2940_vm0, %v2939_v1 }
 0x4ed   : > { %v1122_v57 = vpop.f32.mrb[8].mxu0 }
 0x4ee   : > { %v1123_v58 = vadd.f32 %v1122_v57, %v1051_v56  ;;  %v2785_v59 = vpop.f32.mrb[9].mxu0 }
 0x4f0   : > { %2787 = vmatpush3.msra.mxu1 %v1123_v58 }
 0x4f1   : > { %2789 = vmatmul.mubr.msk.f32.vlgmr.msra.gmra.mrb[8].mxu1 %vm424_vm1, %v2945_v30  ;;  %2796 = vmatprep.subr.mxu1 %v2939_v1 }
 0x4f2   : > { %2798 = vmatprep.mubr.msk.f32.mxu1 %vm2940_vm0, %v2939_v1 }
 0x5c4   : > { %v1192_v60 = vpop.f32.mrb[8].mxu1 }
 0x5c5   : > { %v1196_v61 = vmul.f32 0.125, %v1192_v60  ;;  %v2790_v62 = vpop.f32.mrb[9].mxu1 }
 0x5c7   : > { %v1200_v63 = vrot.slane %v1196_v61, %v3089_v36 }
 0x5c9   : > { %v1201_v0 = vsub.f32 %v1123_v58, %v1200_v63  ;;  %v1771_v63 = vpop.permute.xlu0 %1770 }
 0x5cb   : > { %v1202_v2 = vmul.f32 %v1201_v0, %v1201_v0 }
 0x5cd   : > { %2792 = vmatpush3.msra.mxu0 %v1202_v2 }
 0x5ce   : > { %2794 = vmatmul.mubr.msk.f32.vlgmr.msra.gmra.mrb[10].mxu0 %vm424_vm1, %v2945_v30  ;;  %2801 = vmatprep.subr.mxu0 %v2939_v1 }
 0x5cf   : > { %2803 = vmatprep.mubr.msk.f32.mxu0 %vm2940_vm0, %v2939_v1 }
 0x6a1   : > { %v1269_v5 = vpop.f32.mrb[10].mxu0 }
 0x6a2   : > { %v1273_v6 = vmul.f32 0.125, %v1269_v5  ;;  %v2795_v7 = vpop.f32.mrb[11].mxu0 }
 0x6a4   : > { %v1274_v8 = vadd.f32 1e-05, %v1273_v6 }
 0x6a6   : > { %2907 = vrsqrt.f32 %v1274_v8 }
 0x6b0   : > { %v2908_v9 = vpop.eup %2907 }
 0x6b1   : > { %v1279_v10 = vrot.slane %v2908_v9, %v3089_v36 }
 0x6b3   : > { %v1280_v12 = vmul.f32 %v1279_v10, %v1201_v0  ;;  %v1776_v0 = vpop.permute.xlu1 %1775  ;;  %v1787_v10 = vld [vmem:[%s3259_s6] sm:$0xff] }
 0x6b5   : > { %v1285_v13 = vmul.f32 %v1283_v11, %v1280_v12 }
 0x6b7   : > { %v1290_v16 = vadd.f32 %v1288_v15, %v1285_v13 }
 0x6b9   : > { %2909 = vtanh.f32 %v1290_v16 }
 0x6c3   : > { %v2910_v18 = vpop.eup %2909 }
 0x6c4   : > { %2797 = vmatpush3.msra.mxu1 %v2910_v18 }
 0x6c5   : > { %2799 = vmatmul.mubr.msk.f32.vlgmr.msra.gmra.mrb[10].mxu1 %vm424_vm1, %v418_v17  ;;  %2806 = vmatprep.subr.mxu1 %v2939_v1 }
 0x6c6   : > { %2808 = vmatprep.mubr.msk.f32.mxu1 %vm2940_vm0, %v2939_v1 }
 0x798   : > { %v1366_v20 = vpop.f32.mrb[10].mxu1 }
 0x799   : > { %v1367_v21 = vadd.f32 %v1366_v20, %v1295_v19  ;;  %v2800_v22 = vpop.f32.mrb[11].mxu1 }
 0x79b   : > { %2802 = vmatpush3.msra.mxu0 %v1367_v21 }
 0x79c   : > { %2804 = vmatmul.mubr.msk.f32.vlgmr.msra.gmra.mrb[12].mxu0 %vm424_vm1, %v2945_v30  ;;  %2811 = vmatprep.subr.mxu0 %v2939_v1 }
 0x79d   : > { %2813 = vmatprep.mubr.msk.f32.mxu0 %vm2940_vm0, %v2939_v1 }
 0x86f   : > { %v1436_v24 = vpop.f32.mrb[12].mxu0 }
 0x870   : > { %v1440_v25 = vmul.f32 0.125, %v1436_v24  ;;  %v2805_v26 = vpop.f32.mrb[13].mxu0 }
 0x872   : > { %v1444_v27 = vrot.slane %v1440_v25, %v3089_v36 }
 0x874   : > { %v1445_v28 = vsub.f32 %v1367_v21, %v1444_v27  ;;  %v1791_v21 = vld [vmem:[%s3260_s7 + $0x8] sm:$0xff] }
 0x876   : > { %v1446_v29 = vmul.f32 %v1445_v28, %v1445_v28 }
 0x878   : > { %2807 = vmatpush3.msra.mxu1 %v1446_v29 }
 0x879   : > { %2809 = vmatmul.mubr.msk.f32.vlgmr.msra.gmra.mrb[12].mxu1 %vm424_vm1, %v2945_v30  ;;  %2816 = vmatprep.subr.mxu1 %v2939_v1 }
 0x87a   : > { %2818 = vmatprep.mubr.msk.f32.mxu1 %vm2940_vm0, %v2939_v1 }
 0x94c   : > { %v1513_v31 = vpop.f32.mrb[12].mxu1 }
 0x94d   : > { %v1517_v32 = vmul.f32 0.125, %v1513_v31  ;;  %v2810_v33 = vpop.f32.mrb[13].mxu1 }
 0x94f   : > { %v1518_v14 = vadd.f32 1e-05, %v1517_v32 }
 0x951   : > { %2911 = vrsqrt.f32 %v1518_v14  ;;  %v1788_v14 = vld [vmem:[%s3259_s6 + $0x8] sm:$0xff] }
 0x95b   : > { %v2912_v37 = vpop.eup %2911 }
 0x95c   : > { %v1523_v38 = vrot.slane %v2912_v37, %v3089_v36 }
 0x95e   : > { %v1524_v39 = vmul.f32 %v1523_v38, %v1445_v28 }
 0x960   : > { %v1529_v42 = vmul.f32 %v1527_v40, %v1524_v39 }
 0x962   : > { %v1534_v43 = vadd.f32 %v1532_v41, %v1529_v42 }
 0x964   : > { %2913 = vtanh.f32 %v1534_v43 }
 0x96e   : > { %v2914_v45 = vpop.eup %2913 }
 0x96f   : > { %2812 = vmatpush3.msra.mxu0 %v2914_v45 }
 0x970   : > { %2814 = vmatmul.mubr.msk.f32.vlgmr.msra.gmra.mrb[14].mxu0 %vm424_vm1, %v419_v44  ;;  %2821 = vmatprep.subr.mxu0 %v2939_v1 }
 0x971   : > { %2823 = vmatprep.mubr.msk.f32.mxu0 %vm2940_vm0, %v2939_v1 }
 0xa43   : > { %v1610_v47 = vpop.f32.mrb[14].mxu0 }
 0xa44   : > { %v1611_v48 = vadd.f32 %v1610_v47, %v1539_v46  ;;  %v2815_v49 = vpop.f32.mrb[15].mxu0  ;;  %v1792_v47 = vld [vmem:[%s3260_s7 + $0x10] sm:$0xff] }
 0xa46   : > { %2817 = vmatpush3.msra.mxu1 %v1611_v48 }
 0xa47   : > { %2819 = vmatmul.mubr.msk.f32.vlgmr.msra.gmra.mrb[14].mxu1 %vm424_vm1, %v2945_v30  ;;  %2826 = vmatprep.subr.mxu1 %v2939_v1 }
 0xa48   : > { %2828 = vmatprep.mubr.msk.f32.mxu1 %vm2940_vm0, %v2939_v1 }
 0xb1a   : > { %v1680_v50 = vpop.f32.mrb[14].mxu1 }
 0xb1b   : > { %v1684_v51 = vmul.f32 0.125, %v1680_v50  ;;  %v2820_v52 = vpop.f32.mrb[15].mxu1 }
 0xb1d   : > { %v1688_v53 = vrot.slane %v1684_v51, %v3089_v36 }
 0xb1f   : > { %v1689_v54 = vsub.f32 %v1611_v48, %v1688_v53 }
 0xb21   : > { %v1690_v55 = vmul.f32 %v1689_v54, %v1689_v54 }
 0xb23   : > { %2822 = vmatpush3.msra.mxu0 %v1690_v55 }
 0xb24   : > { %2824 = vmatmul.mubr.msk.f32.vlgmr.msra.gmra.mrb[16].mxu0 %vm424_vm1, %v2945_v30  ;;  %2831 = vmatprep.subr.mxu0 %v2939_v1 }
 0xb25   : > { %2833 = vmatprep.mubr.msk.f32.mxu0 %vm2940_vm0, %v2939_v1 }
 0xbf7   : > { %v1757_v56 = vpop.f32.mrb[16].mxu0 }
 0xbf8   : > { %v1761_v57 = vmul.f32 0.125, %v1757_v56  ;;  %v2825_v58 = vpop.f32.mrb[17].mxu0 }
 0xbfa   : > { %v1762_v59 = vadd.f32 1e-05, %v1761_v57 }
 0xbfc   : > { %2915 = vrsqrt.f32 %v1762_v59  ;;  %v1789_v59 = vld [vmem:[%s3259_s6 + $0x10] sm:$0xff] }
 0xc06   : > { %v2916_v60 = vpop.eup %2915 }
 0xc07   : > { %v1767_v61 = vrot.slane %v2916_v60, %v3089_v36 }
 0xc09   : > { %v1768_v62 = vmul.f32 %v1767_v61, %v1689_v54 }
 0xc0b   : > { %v1773_v2 = vmul.f32 %v1771_v63, %v1768_v62 }
 0xc0d   : > { %v1778_v3 = vadd.f32 %v1776_v0, %v1773_v2 }
 0xc0f   : > { %2917 = vtanh.f32 %v1778_v3 }
 0xc19   : > { %v2918_v5 = vpop.eup %2917 }
 0xc1a   : > { %1780 = vst.msk [vmem:[%s397_s30] sm:$0xff] %vm424_vm1, %v2918_v5  ;;  %v1781_v6 = vadd.f32 %v2918_v5, %v3035_v4  ;;  %v1783_v7 = vsel %vm424_vm1, %v2918_v5, 0.0  ;;  %v1790_v4 = vld [vmem:[%s3260_s7] sm:$0xff] }
 0xc1b   : > { %1784 = vadd.xlane.f32.xlu0 %v1783_v7  ;;  %2022 = vrot.lane.b32.xlu1 %v1790_v4, %s2948_s20 }
 0xc1c   : > { %1782 = vst.msk [vmem:[%s401_s15] sm:$0xff] %vm424_vm1, %v1781_v6 }
 0xc1f   : > { %2026 = vrot.lane.b32.xlu1 %v1790_v4, %s2949_s21 }
 0xc23   : > { %2260 = vrot.lane.b32.xlu1 %v1791_v21, %s2948_s20 }
 0xc27   : > { %2264 = vrot.lane.b32.xlu1 %v1791_v21, %s2949_s21 }
 0xc2b   : > { %2498 = vrot.lane.b32.xlu1 %v1792_v47, %s2948_s20 }
 0xc2f   : > { %2502 = vrot.lane.b32.xlu1 %v1792_v47, %s2949_s21 }
 0xc8d   : > { %v2023_v26 = vpop.permute.xlu1 %2022 }
 0xc91   : > { %v2027_v31 = vpop.permute.xlu1 %2026 }
 0xc95   : > { %v2261_v52 = vpop.permute.xlu1 %2260 }
 0xc99   : > { %v2265_v56 = vpop.permute.xlu1 %2264 }
 0xca8   : > { %v1785_v8 = vpop.xlane.xlu0 %1784 }
 0xca9   : > { %v1786_v9 = vmul.f32 0.125, %v1785_v8 }
 0xcab   : > { %2827 = vmatpush3.msra.mxu1 %v1786_v9 }
 0xcac   : > { %2829 = vmatmul.mubr.msk.f32.vlgmr.msra.gmra.mrb[16].mxu1 %vm424_vm1, %v1787_v10  ;;  %2836 = vmatprep.subr.mxu1 %v2939_v1 }
 0xcad   : > { %2838 = vmatprep.mubr.msk.f32.mxu1 %vm2940_vm0, %v2939_v1 }
 0xd7f   : > { %v1862_v11 = vpop.f32.mrb[16].mxu1 }
 0xd80   : > { %v1863_v12 = vadd.f32 %v1862_v11, %v1790_v4  ;;  %v2830_v13 = vpop.f32.mrb[17].mxu1  ;;  %v2499_v4 = vpop.permute.xlu1 %2498 }
 0xd82   : > { %2832 = vmatpush3.msra.mxu0 %v1863_v12 }
 0xd83   : > { %2834 = vmatmul.mubr.msk.f32.vlgmr.msra.gmra.mrb[18].mxu0 %vm424_vm1, %v2945_v30  ;;  %2841 = vmatprep.subr.mxu0 %v2939_v1 }
 0xd84   : > { %2843 = vmatprep.mubr.msk.f32.mxu0 %vm2940_vm0, %v2939_v1 }
 0xe56   : > { %v1932_v15 = vpop.f32.mrb[18].mxu0 }
 0xe57   : > { %v1936_v16 = vmul.f32 0.125, %v1932_v15  ;;  %v2835_v17 = vpop.f32.mrb[19].mxu0  ;;  %v2503_v15 = vpop.permute.xlu1 %2502 }
 0xe59   : > { %v1940_v18 = vrot.slane %v1936_v16, %v3089_v36 }
 0xe5b   : > { %v1941_v19 = vsub.f32 %v1863_v12, %v1940_v18 }
 0xe5d   : > { %v1942_v20 = vmul.f32 %v1941_v19, %v1941_v19 }
 0xe5f   : > { %2837 = vmatpush3.msra.mxu1 %v1942_v20 }
 0xe60   : > { %2839 = vmatmul.mubr.msk.f32.vlgmr.msra.gmra.mrb[18].mxu1 %vm424_vm1, %v2945_v30  ;;  %2846 = vmatprep.subr.mxu1 %v2939_v1 }
 0xe61   : > { %2848 = vmatprep.mubr.msk.f32.mxu1 %vm2940_vm0, %v2939_v1 }
 0xf33   : > { %v2009_v22 = vpop.f32.mrb[18].mxu1 }
 0xf34   : > { %v2013_v23 = vmul.f32 0.125, %v2009_v22  ;;  %v2840_v24 = vpop.f32.mrb[19].mxu1 }
 0xf36   : > { %v2014_v25 = vadd.f32 1e-05, %v2013_v23 }
 0xf38   : > { %2919 = vrsqrt.f32 %v2014_v25 }
 0xf42   : > { %v2920_v27 = vpop.eup %2919 }
 0xf43   : > { %v2019_v28 = vrot.slane %v2920_v27, %v3089_v36 }
 0xf45   : > { %v2020_v29 = vmul.f32 %v2019_v28, %v1941_v19  ;;  %v2512_v19 = vand.u32 127, %v953_v34 }
 0xf47   : > { %v2025_v32 = vmul.f32 %v2023_v26, %v2020_v29 }
 0xf49   : > { %v2029_v33 = vadd.f32 %v2027_v31, %v2025_v32 }
 0xf4b   : > { %2921 = vtanh.f32 %v2029_v33 }
 0xf55   : > { %v2922_v37 = vpop.eup %2921 }
 0xf56   : > { %2842 = vmatpush3.msra.mxu0 %v2922_v37 }
 0xf57   : > { %2844 = vmatmul.mubr.msk.f32.vlgmr.msra.gmra.mrb[20].mxu0 %vm424_vm1, %v1788_v14  ;;  %2851 = vmatprep.subr.mxu0 %v2939_v1 }
 0xf58   : > { %2853 = vmatprep.mubr.msk.f32.mxu0 %vm2940_vm0, %v2939_v1 }
0x102a   : > { %v2100_v38 = vpop.f32.mrb[20].mxu0 }
0x102b   : > { %v2101_v39 = vadd.f32 %v2100_v38, %v1791_v21  ;;  %v2845_v40 = vpop.f32.mrb[21].mxu0 }
0x102d   : > { %2847 = vmatpush3.msra.mxu1 %v2101_v39 }
0x102e   : > { %2849 = vmatmul.mubr.msk.f32.vlgmr.msra.gmra.mrb[20].mxu1 %vm424_vm1, %v2945_v30  ;;  %2856 = vmatprep.subr.mxu1 %v2939_v1 }
0x102f   : > { %2858 = vmatprep.mubr.msk.f32.mxu1 %vm2940_vm0, %v2939_v1 }
0x1101   : > { %v2170_v41 = vpop.f32.mrb[20].mxu1 }
0x1102   : > { %v2174_v42 = vmul.f32 0.125, %v2170_v41  ;;  %v2850_v43 = vpop.f32.mrb[21].mxu1 }
0x1104   : > { %v2178_v44 = vrot.slane %v2174_v42, %v3089_v36 }
0x1106   : > { %v2179_v45 = vsub.f32 %v2101_v39, %v2178_v44 }
0x1108   : > { %v2180_v46 = vmul.f32 %v2179_v45, %v2179_v45 }
0x110a   : > { %2852 = vmatpush3.msra.mxu0 %v2180_v46 }
0x110b   : > { %2854 = vmatmul.mubr.msk.f32.vlgmr.msra.gmra.mrb[22].mxu0 %vm424_vm1, %v2945_v30  ;;  %2861 = vmatprep.subr.mxu0 %v2939_v1 }
0x110c   : > { %2863 = vmatprep.mubr.msk.f32.mxu0 %vm2940_vm0, %v2939_v1 }
0x11de   : > { %v2247_v48 = vpop.f32.mrb[22].mxu0 }
0x11df   : > { %v2251_v49 = vmul.f32 0.125, %v2247_v48  ;;  %v2855_v50 = vpop.f32.mrb[23].mxu0 }
0x11e1   : > { %v2252_v51 = vadd.f32 1e-05, %v2251_v49 }
0x11e3   : > { %2923 = vrsqrt.f32 %v2252_v51 }
0x11ed   : > { %v2924_v53 = vpop.eup %2923 }
0x11ee   : > { %v2257_v54 = vrot.slane %v2924_v53, %v3089_v36 }
0x11f0   : > { %v2258_v55 = vmul.f32 %v2257_v54, %v2179_v45 }
0x11f2   : > { %v2263_v57 = vmul.f32 %v2261_v52, %v2258_v55 }
0x11f4   : > { %v2267_v58 = vadd.f32 %v2265_v56, %v2263_v57 }
0x11f6   : > { %2925 = vtanh.f32 %v2267_v58 }
0x1200   : > { %v2926_v60 = vpop.eup %2925 }
0x1201   : > { %2857 = vmatpush3.msra.mxu1 %v2926_v60 }
0x1202   : > { %2859 = vmatmul.mubr.msk.f32.vlgmr.msra.gmra.mrb[22].mxu1 %vm424_vm1, %v1789_v59  ;;  %2866 = vmatprep.subr.mxu1 %v2939_v1 }
0x1203   : > { %2868 = vmatprep.mubr.msk.f32.mxu1 %vm2940_vm0, %v2939_v1 }
0x12d5   : > { %v2338_v61 = vpop.f32.mrb[22].mxu1 }
0x12d6   : > { %v2339_v62 = vadd.f32 %v2338_v61, %v1792_v47  ;;  %v2860_v63 = vpop.f32.mrb[23].mxu1 }
0x12d8   : > { %2862 = vmatpush3.msra.mxu0 %v2339_v62 }
0x12d9   : > { %2864 = vmatmul.mubr.msk.f32.vlgmr.msra.gmra.mrb[24].mxu0 %vm424_vm1, %v2945_v30 }
0x13ac   : > { %v2408_v0 = vpop.f32.mrb[24].mxu0 }
0x13ad   : > { %v2412_v2 = vmul.f32 0.125, %v2408_v0  ;;  %v2865_v3 = vpop.f32.mrb[25].mxu0 }
0x13af   : > { %v2416_v5 = vrot.slane %v2412_v2, %v3089_v36 }
0x13b1   : > { %v2417_v6 = vsub.f32 %v2339_v62, %v2416_v5 }
0x13b3   : > { %v2418_v7 = vmul.f32 %v2417_v6, %v2417_v6 }
0x13b5   : > { %2867 = vmatpush3.msra.mxu1 %v2418_v7 }
0x13b6   : > { %2869 = vmatmul.mubr.msk.f32.vlgmr.msra.gmra.mrb[24].mxu1 %vm424_vm1, %v2945_v30  ;;  %v2515_v30 = vsub.s32 %v2512_v19, %v3086_v35 }
0x1489   : > { %v2485_v8 = vpop.f32.mrb[24].mxu1 }
0x148a   : > { %v2489_v1 = vmul.f32 0.125, %v2485_v8  ;;  %v2870_v9 = vpop.f32.mrb[25].mxu1 }
0x148c   : > { %v2490_v10 = vadd.f32 1e-05, %v2489_v1 }
0x148e   : > { %2927 = vrsqrt.f32 %v2490_v10 }
0x1498   : > { %v2928_v11 = vpop.eup %2927 }
0x1499   : > { %v2495_v12 = vrot.slane %v2928_v11, %v3089_v36 }
0x149b   : > { %v2496_v13 = vmul.f32 %v2495_v12, %v2417_v6 }
0x149d   : > { %v2501_v16 = vmul.f32 %v2499_v4, %v2496_v13 }
0x149f   : > { %v2505_v17 = vadd.f32 %v2503_v15, %v2501_v16 }
0x14a1   : > { %2929 = vtanh.f32 %v2505_v17 }
0x14ab   : > { %v2930_v18 = vpop.eup %2929 }
0x14ac   : > { %2509 = vperm.xlu1 %2901, %v2930_v18  }
0x152b   : > { %v2510_v20 = vpop.permute.xlu1 %2509 }
0x152c   : > { %v2516_v21 = vrot.slane %v2510_v20, %v2515_v30 }
0x152e   : > { %2519 = vst.msk [vmem:[%s404_s12] sm:$0x1] %vm2518_vm2, %v2516_v21 }
0x152f PF: > { %s21_s13 = sadd.s32 1, %s2937_s13  }
0x1530   : > { %p18_p4 = scmp.ge.s32.totalorder %s21_s13, 4  }
0x1532   :  { %20 = sbr.rel (!%p18_p4) target bundleno = 1 (0x1), region = 112 }

// kernel: dense_gnn_diffpool_forward.9
= control target key start
LH: loop header
LB: loop body
LE: loop exit
PB: predicated region body
PF: predicated region fallthrough
CT: control target
= control target key end

     0   :  { %s3817_s21 = smov 0   ;;  %s3819_s22 = smov 0   ;;  %s4056_s0 = inlined_call_operand.vmem [shape: f32[2,8,8], index: 0, kind: input, shape index: {}]   ;;  %s4057_s1 = inlined_call_operand.vmem [shape: bf16[2,8,8], index: 1, kind: input, shape index: {}]   ;;  %s4058_s2 = inlined_call_operand.vmem [shape: f32[2,1,8], index: 2, kind: input, shape index: {}]   ;;  %s4059_s3 = inlined_call_operand.vmem [shape: f32[8,25], index: 3, kind: input, shape index: {}]   ;;  %s4060_s4 = inlined_call_operand.vmem [shape: f32[3,8,8], index: 4, kind: input, shape index: {}]   ;;  %s4061_s5 = inlined_call_operand.vmem [shape: f32[8,8], index: 5, kind: input, shape index: {}]   ;;  %s4062_s6 = inlined_call_operand.vmem [shape: bf16[2,8,8], index: 6, kind: output, shape index: {}]  }
   0x1   :  { %s3821_s23 = smov 0  }
   0x2 LB: > { %s28_s24 = sadd.s32 1, %s3764_s22  ;;  %p3294_p0 = scmp.ge.s32.totalorder %s3768_s23, 1  ;;  %s3768_s23 = sphi %s3821_s23, %s16_s23   ;;  %s3764_s22 = sphi %s3819_s22, %s4064_s22   ;;  %s3760_s21 = sphi %s3817_s21, %s4063_s21  }
   0x3   : > { %p30_p1 = scmp.ge.s32.totalorder %s28_s24, 2  ;;  %p247_p2 = scmp.lt.s32.totalorder %s3768_s23, 3 }
   0x5   : > { %s4066_s24 = smov (%p30_p1, %s28_s24), 0  ;;  %p248_p3 = pnand %p3294_p0, %p247_p2 }
   0x6   : > { %p288_p4 = scmp.lt.s32.totalorder (!%p248_p3), %s3760_s21, 1  ;;  %v313_v0 = vld [vmem:[%s4059_s3] sm:$0xff] (!%p248_p3)  ;;  %s3770_s27 = smov (!%p248_p3), 112   ;;  %v3771_v1 = vmov (!%p248_p3), 0.0   ;;  %vm3772_vm0 = vmmov (!%p248_p3), 0   ;;  %vm318_vm1 = vcmask (!%p248_p3), 64512   ;;  %v398_v12 = vlaneseq (!%p248_p3) }
   0x7   : > { %251 = sbr.rel (%p248_p3) target bundleno = 1444 (0x5a4), region = 44  ;;  %392 = vrot.lane.b32.xlu0 (!%p248_p3), %v313_v0, %s3770_s27  ;;  %3431 = vmatprep.subr.mxu0 (!%p248_p3), %v3771_v1  ;;  %s3773_s8 = smov (!%p248_p3), 120   ;;  %v3774_v3 = vmov (!%p248_p3), 24   ;;  %v3857_v4 = vld [vmem:[%s4061_s5] sm:$0xff] (!%p248_p3)  ;;  %v3775_v5 = vmov (!%p248_p3), 0   ;;  %v3776_v41 = vmov (!%p248_p3), 1  }
   0x8   : > { %3436 = vmatprep.subr.mxu1 (!%p248_p3), %v3771_v1  ;;  %3433 = vmatprep.mubr.msk.f32.mxu0 (!%p248_p3), %vm3772_vm0, %v3771_v1  ;;  %v399_v13 = vand.u32 (!%p248_p3), 127, %v398_v12  ;;  %v401_v14 = vshrl.u32 (!%p248_p3), %v398_v12, 7  ;;  %v3777_v42 = vmov (!%p248_p3), 1966171168   ;;  %vm3171_vm2 = vcmask (!%p248_p3), 1041409  }
   0x9   : > { %3438 = vmatprep.mubr.msk.f32.mxu1 (!%p248_p3), %vm3772_vm0, %v3771_v1  ;;  %3645 = vset.pattern.permute.xlu0 (!%p248_p3), %v3774_v3  ;;  %v660_v43 = vunpack.c.l.s4 (!%p248_p3), %v3777_v42  ;;  %vm3174_vm3 = vcmask (!%p248_p3), 1042434   ;;  %vm3177_vm4 = vcmask (!%p248_p3), 1043459   ;;  %vm3180_vm5 = vcmask (!%p248_p3), 1044484  }
   0xa   : > { %v3876_v17 = vsub.s32 (!%p248_p3), %v399_v13, %v401_v14  ;;  %v3879_v21 = vsub.s32 (!%p248_p3), 0, %v401_v14  ;;  %v630_v23 = vsub.s32 (!%p248_p3), 5, %v401_v14  ;;  %v644_v29 = vsub.s32 (!%p248_p3), 7, %v401_v14 }
   0xb   : > { %516 = vrot.lane.b32.xlu0 (!%p248_p3), %v313_v0, %s3773_s8  ;;  %v602_v30 = vsub.s32 (!%p248_p3), 1, %v401_v14  ;;  %v609_v33 = vsub.s32 (!%p248_p3), 2, %v401_v14  ;;  %v616_v35 = vsub.s32 (!%p248_p3), 3, %v401_v14  ;;  %v623_v37 = vsub.s32 (!%p248_p3), 4, %v401_v14 }
   0xc   : > { %v637_v39 = vsub.s32 (!%p248_p3), 6, %v401_v14  ;;  %v661_v46 = vunpack.c.0.s8 (!%p248_p3), %v660_v43  ;;  %vm3183_vm6 = vcmask (!%p248_p3), 1045509   ;;  %vm3186_vm7 = vcmask (!%p248_p3), 1046534  }
   0xd   : > { %vm3189_vm8 = vcmask (!%p248_p3), 1047559   ;;  %vm3193_vm9 = vcmask (!%p248_p3), 60416  }
   0xe   : > { %s4068_s21 = smov (!%p288_p4, %s3760_s21), 1  ;;  %v664_v48 = vsub.s32 %v661_v46, %v401_v14 }
   0xf   : > { %s3295_s28 = sshll.u32 %s4068_s21, 3  ;;  %748 = vperm.xlu0 %3645, %v313_v0   ;;  %s301_s13 = scalar_lea.vmem %s4058_s2, %s4068_s21 }
  0x10   : > { %s291_s7 = scalar_lea.vmem %s4056_s0, %s3295_s28  ;;  %v312_v7 = vld [vmem:[%s301_s13] sm:$0x1]  ;;  %s3296_s14 = sshll.u32 %s4068_s21, 2 }
  0x11   : > { %v309_v2 = vld [vmem:[%s291_s7] sm:$0xff]  ;;  %s298_s17 = scalar_lea.vmem %s4057_s1, %s3296_s14  ;;  %s3781_s28 = smov 123  }
  0x12   : > { %480 = vxpose.xlu1.b32.start.end [1/1] (short) (narrow) %v309_v2, 8  ;;  %3432 = vmatpush3.msra.mxu0 %v309_v2  ;;  %v310_v44 = vld [vmem:[%s298_s17] sm:$0xf]  ;;  %s308_s8 = scalar_lea.vmem %s4062_s6, %s3296_s14 }
  0x13   : > { %3434 = vmatmul.mubr.msk.f32.vlgmr.msra.gmra.mrb[0].mxu0 %vm318_vm1, %v313_v0  ;;  %3441 = vmatprep.subr.mxu0 %v3771_v1  ;;  %v311_v45 = vunpack.c.l.bf16 %v310_v44 }
  0x14   : > { %3443 = vmatprep.mubr.msk.f32.mxu0 %vm3772_vm0, %v3771_v1  ;;  %3646 = vset.pattern.permute.xlu0 %v3776_v41 }
  0x15   : > { %v658_v47 = vcombine.high %v311_v45, %v311_v45  ;;  %v665_v51 = vrot.slane %v311_v45, %v664_v48 }
  0x17   : > { %v672_v49 = vrot.slane %v658_v47, %v664_v48  ;;  %v681_v54 = vrot.slane %v665_v51, %v664_v48  ;;  %v673_v55 = vcombine.high %v665_v51, %v665_v51 }
  0x19   : > { %v674_v50 = vcombine.high %v672_v49, %v672_v49  ;;  %v710_v58 = vrot.slane %v681_v54, %v3879_v21  ;;  %v695_v59 = vrot.slane %v673_v55, %v664_v48  ;;  %v703_v0 = vcombine.high %v681_v54, %v681_v54 }
  0x1b   : > { %v702_v52 = vrot.slane %v674_v50, %v664_v48  ;;  %v718_v12 = vrot.slane %v703_v0, %v3879_v21  ;;  %v705_v13 = vcombine.high %v695_v59, %v695_v59  ;;  %v3778_v50 = vmov 2   ;;  %v315_v0 = vld [vmem:[%s4060_s4 + $0x8] sm:$0xff] }
  0x1d   : > { %v730_v56 = vrot.slane %v702_v52, %v3879_v21  ;;  %v706_v57 = vcombine.high %v702_v52, %v702_v52 }
  0x1f   : > { %v738_v63 = vrot.slane %v706_v57, %v3879_v21 }
  0x30   : > { %3644 = vset.pattern.permute.xlu1 %v3775_v5 }
  0x31   : > { %396 = vperm.xlu1 %3644, %v3857_v4  }
  0x35   : > { %3647 = vset.pattern.permute.xlu1 %v3778_v50 }
  0x79   : > { %v393_v6 = vpop.permute.xlu0 %392 }
  0x7a   : > { %3437 = vmatpush3.xpose.msk.msra.mxu1 %vm318_vm1, %v393_v6  ;;  %v714_v6 = vrot.slane %v695_v59, %v3879_v21 }
  0x7b   : > { %3446 = vmatprep.subr.mxu1 %v3771_v1 }
  0x7d   : > { %3439 = vmatmul.mubr.msk.f32.vlgmr.msra.gmra.mrb[0].mxu1 %vm318_vm1, %v312_v7  ;;  %v517_v8 = vpop.permute.xlu0 %516 }
  0x7e   : > { %3442 = vmatpush3.xpose.msk.msra.mxu0 %vm318_vm1, %v517_v8  ;;  %3448 = vmatprep.mubr.msk.f32.mxu1 %vm3772_vm0, %v3771_v1 }
  0x7f   : > { %3451 = vmatprep.subr.mxu0 %v3771_v1 }
  0x8e   : > { %v749_v53 = vpop.permute.xlu0 %748 }
  0x8f   : > { %v756_v60 = vmul.f32 %v749_v53, %v730_v56  ;;  %v751_v3 = vmul.f32 %v749_v53, %v710_v58  ;;  %v758_v14 = vmul.f32 %v749_v53, %v738_v63 }
  0x92   : > { %v496_v9 = vpop.trf.xlu1 }
  0x93   : > { %3444 = vmatmul.mubr.msk.f32.vlgmr.msra.gmra.mrb[2].mxu0 %vm318_vm1, %v496_v9 }
  0x94   : > { %3453 = vmatprep.mubr.msk.f32.mxu0 %vm3772_vm0, %v3771_v1 }
  0xb0   : > { %v397_v18 = vpop.permute.xlu1 %396 }
  0xb1   : > { %v403_v19 = vrot.slane %v397_v18, %v3876_v17 }
  0xe6   : > { %v3874_v10 = vpop.f32.mrb[0].mxu0 }
  0xe7   : > { %v3435_v11 = vpop.f32.mrb[1].mxu0 }
 0x150   : > { %v476_v15 = vpop.f32.mrb[0].mxu1 }
 0x151   : > { %v3440_v16 = vpop.f32.mrb[1].mxu1  ;;  %v477_v20 = vadd.f32 %v476_v15, %v403_v19 }
 0x152   : > { %v752_v16 = vmul.f32 %v749_v53, %v714_v6 }
 0x153   : > { %v515_v22 = vrot.slane %v477_v20, %v3879_v21 }
 0x166   : > { %v589_v24 = vpop.f32.mrb[2].mxu0 }
 0x167   : > { %v590_v25 = vadd.f32 %v589_v24, %v515_v22  ;;  %v3445_v26 = vpop.f32.mrb[3].mxu0  ;;  %v753_v24 = vmul.f32 %v749_v53, %v718_v12 }
 0x168   : > { %v722_v26 = vrot.slane %v705_v13, %v3879_v21 }
 0x169   : > { %v631_v27 = vrot.slane %v590_v25, %v630_v23  ;;  %v596_v28 = vrot.slane %v590_v25, %v3879_v21  ;;  %v645_v31 = vrot.slane %v590_v25, %v644_v29  ;;  %v603_v32 = vrot.slane %v590_v25, %v602_v30 }
 0x16a   : > { %v610_v34 = vrot.slane %v590_v25, %v609_v33  ;;  %v617_v36 = vrot.slane %v590_v25, %v616_v35  ;;  %v624_v38 = vrot.slane %v590_v25, %v623_v37  ;;  %v638_v40 = vrot.slane %v590_v25, %v637_v39 }
 0x16b   : > { %633 = vbcast.lane.b32.xlu1 %v631_v27, 256  ;;  %598 = vbcast.lane.b32.xlu0 %v596_v28, 256  ;;  %v688_v23 = vrot.slane %v672_v49, %v664_v48  ;;  %v754_v30 = vmul.f32 %v749_v53, %v722_v26  ;;  %v3779_v26 = vmov 3  }
 0x16d   : > { %v704_v29 = vcombine.high %v688_v23, %v688_v23 }
 0x16f   : > { %647 = vbcast.lane.b32.xlu1 %v645_v31, 256  ;;  %605 = vbcast.lane.b32.xlu0 %v603_v32, 256  ;;  %v726_v32 = vrot.slane %v688_v23, %v3879_v21  ;;  %v734_v39 = vrot.slane %v704_v29, %v3879_v21 }
 0x171   : > { %v755_v37 = vmul.f32 %v749_v53, %v726_v32  ;;  %v757_v43 = vmul.f32 %v749_v53, %v734_v39 }
 0x173   : > { %612 = vbcast.lane.b32.xlu0 %v610_v34, 256  ;;  %v314_v34 = vld [vmem:[%s4060_s4] sm:$0xff]  ;;  %1351 = vperm.xlu1 %3647, %v3857_v4  }
 0x177   : > { %619 = vbcast.lane.b32.xlu0 %v617_v36, 256  ;;  %3648 = vset.pattern.permute.xlu1 %v3779_v26 }
 0x178   : > { %1926 = vperm.xlu1 %3648, %v3857_v4  }
 0x17b   : > { %626 = vbcast.lane.b32.xlu0 %v624_v38, 256 }
 0x17c   : > { %3069 = vrot.lane.b32.xlu1 %v3857_v4, %s3781_s28 }
 0x17f   : > { %640 = vbcast.lane.b32.xlu0 %v638_v40, 256 }
 0x183   : > { %776 = vperm.xlu0 %3646, %v3857_v4  }
 0x1dd   : > { %v634_v61 = vpop.permute.xlu1 %633  ;;  %v599_v62 = vpop.permute.xlu0 %598 }
 0x1de   : > { %v654_v2 = vadd.f32 %v634_v61, %v3874_v10  ;;  %v649_v5 = vadd.f32 %v599_v62, %v3874_v10 }
 0x1e0   : > { %v764_v7 = vadd.f32 %v756_v60, %v654_v2  ;;  %v759_v8 = vadd.f32 %v751_v3, %v649_v5 }
 0x1e1   : > { %v648_v9 = vpop.permute.xlu1 %647  ;;  %v606_v11 = vpop.permute.xlu0 %605 }
 0x1e2   : > { %v656_v15 = vadd.f32 %v648_v9, %v3874_v10  ;;  %v650_v18 = vadd.f32 %v606_v11, %v3874_v10  ;;  %3650 = vtanh.f32 %v759_v8 }
 0x1e4   : > { %v766_v19 = vadd.f32 %v758_v14, %v656_v15  ;;  %v760_v20 = vadd.f32 %v752_v16, %v650_v18 }
 0x1e5   : > { %v613_v22 = vpop.permute.xlu0 %612 }
 0x1e6   : > { %v651_v25 = vadd.f32 %v613_v22, %v3874_v10  ;;  %3652 = vtanh.f32 %v760_v20 }
 0x1e8   : > { %v761_v27 = vadd.f32 %v753_v24, %v651_v25 }
 0x1e9   : > { %v620_v28 = vpop.permute.xlu0 %619 }
 0x1ea   : > { %3654 = vtanh.f32 %v761_v27  ;;  %v652_v31 = vadd.f32 %v620_v28, %v3874_v10  ;;  %v3780_v27 = vmov 4  }
 0x1eb   : > { %3649 = vset.pattern.permute.xlu0 %v3780_v27 }
 0x1ec   : > { %v762_v33 = vadd.f32 %v754_v30, %v652_v31  ;;  %v3651_v35 = vpop.eup %3650  ;;  %2501 = vperm.xlu0 %3649, %v3857_v4  }
 0x1ed   : > { %v627_v36 = vpop.permute.xlu0 %626  ;;  %3447 = vmatpush3.msra.mxu1 %v3651_v35 }
 0x1ee   : > { %3656 = vtanh.f32 %v762_v33  ;;  %v653_v38 = vadd.f32 %v627_v36, %v3874_v10  ;;  %3449 = vmatmul.mubr.msk.f32.vlgmr.msra.gmra.mrb[2].mxu1 %vm318_vm1, %v314_v34  ;;  %3456 = vmatprep.subr.mxu1 %v3771_v1 }
 0x1ef   : > { %3658 = vtanh.f32 %v764_v7  ;;  %3458 = vmatprep.mubr.msk.f32.mxu1 %vm3772_vm0, %v3771_v1 }
 0x1f0   : > { %v763_v40 = vadd.f32 %v755_v37, %v653_v38  ;;  %v3653_v41 = vpop.eup %3652 }
 0x1f1   : > { %v641_v42 = vpop.permute.xlu0 %640  ;;  %3452 = vmatpush3.msra.mxu0 %v3653_v41  ;;  %v316_v41 = vld [vmem:[%s4060_s4 + $0x10] sm:$0xff] }
 0x1f2   : > { %3660 = vtanh.f32 %v763_v40  ;;  %v655_v44 = vadd.f32 %v641_v42, %v3874_v10  ;;  %3454 = vmatmul.mubr.msk.f32.vlgmr.msra.gmra.mrb[4].mxu0 %vm318_vm1, %v314_v34  ;;  %3461 = vmatprep.subr.mxu0 %v3771_v1  ;;  %v1352_v28 = vpop.permute.xlu1 %1351 }
 0x1f3   : > { %3662 = vtanh.f32 %v766_v19  ;;  %3463 = vmatprep.mubr.msk.f32.mxu0 %vm3772_vm0, %v3771_v1 }
 0x1f4   : > { %v3655_v21 = vpop.eup %3654  ;;  %v765_v45 = vadd.f32 %v757_v43, %v655_v44 }
 0x1f5   : > { %3457 = vmatpush3.msra.mxu1 %v3655_v21 }
 0x1f6   : > { %3664 = vtanh.f32 %v765_v45  ;;  %3459 = vmatmul.mubr.msk.f32.vlgmr.msra.gmra.mrb[4].mxu1 %vm318_vm1, %v314_v34  ;;  %3466 = vmatprep.subr.mxu1 %v3771_v1 }
 0x1f7   : > { %3468 = vmatprep.mubr.msk.f32.mxu1 %vm3772_vm0, %v3771_v1 }
 0x1f8   : > { %v3657_v10 = vpop.eup %3656 }
 0x1f9   : > { %3462 = vmatpush3.msra.mxu0 %v3657_v10  ;;  %v3659_v46 = vpop.eup %3658 }
 0x1fa   : > { %3464 = vmatmul.mubr.msk.f32.vlgmr.msra.gmra.mrb[6].mxu0 %vm318_vm1, %v314_v34  ;;  %3471 = vmatprep.subr.mxu0 %v3771_v1 }
 0x1fb   : > { %3472 = vmatpush3.msra.mxu0 %v3659_v46  ;;  %3473 = vmatprep.mubr.msk.f32.mxu0 %vm3772_vm0, %v3771_v1 }
 0x1fc   : > { %v3661_v47 = vpop.eup %3660  ;;  %3481 = vmatprep.subr.mxu0 %v3771_v1 }
 0x1fd   : > { %3467 = vmatpush3.msra.mxu1 %v3661_v47  ;;  %v3663_v48 = vpop.eup %3662 }
 0x1fe   : > { %3469 = vmatmul.mubr.msk.f32.vlgmr.msra.gmra.mrb[6].mxu1 %vm318_vm1, %v314_v34  ;;  %3474 = vmatmul.mubr.msk.f32.vlgmr.msra.gmra.mrb[8].mxu0 %vm318_vm1, %v314_v34 }
 0x1ff   : > { %3482 = vmatpush3.msra.mxu0 %v3663_v48  ;;  %3476 = vmatprep.subr.mxu1 %v3771_v1 }
 0x200   : > { %v3665_v49 = vpop.eup %3664  ;;  %3478 = vmatprep.mubr.msk.f32.mxu1 %vm3772_vm0, %v3771_v1  ;;  %3483 = vmatprep.mubr.msk.f32.mxu0 %vm3772_vm0, %v3771_v1 }
 0x201   : > { %3477 = vmatpush3.msra.mxu1 %v3665_v49  ;;  %3491 = vmatprep.subr.mxu0 %v3771_v1 }
 0x202   : > { %3479 = vmatmul.mubr.msk.f32.vlgmr.msra.gmra.mrb[8].mxu1 %vm318_vm1, %v314_v34  ;;  %3484 = vmatmul.mubr.msk.f32.vlgmr.msra.gmra.mrb[10].mxu0 %vm318_vm1, %v314_v34  ;;  %v777_v51 = vpop.permute.xlu0 %776 }
 0x203   : > { %3486 = vmatprep.subr.mxu1 %v3771_v1  ;;  %3488 = vmatprep.mubr.msk.f32.mxu1 %vm3772_vm0, %v3771_v1 }
 0x204   : > { %3493 = vmatprep.mubr.msk.f32.mxu0 %vm3772_vm0, %v3771_v1 }
 0x2c1   : > { %v848_v52 = vpop.f32.mrb[2].mxu1 }
 0x2c2   : > { %v849_v53 = vadd.f32 %v848_v52, %v777_v51  ;;  %v3450_v54 = vpop.f32.mrb[3].mxu1 }
 0x2c4   : > { %3666 = vtanh.f32 %v849_v53 }
 0x2c5   : > { %v918_v55 = vpop.f32.mrb[4].mxu0 }
 0x2c6   : > { %v919_v56 = vadd.f32 %v918_v55, %v777_v51  ;;  %v3455_v57 = vpop.f32.mrb[5].mxu0 }
 0x2c8   : > { %3668 = vtanh.f32 %v919_v56 }
 0x2c9   : > { %v988_v58 = vpop.f32.mrb[4].mxu1 }
 0x2ca   : > { %v989_v59 = vadd.f32 %v988_v58, %v777_v51  ;;  %v3460_v60 = vpop.f32.mrb[5].mxu1 }
 0x2cb   : > { %v1927_v60 = vpop.permute.xlu1 %1926 }
 0x2cc   : > { %3670 = vtanh.f32 %v989_v59 }
 0x2cd   : > { %v1058_v61 = vpop.f32.mrb[6].mxu0 }
 0x2ce   : > { %v1059_v62 = vadd.f32 %v1058_v61, %v777_v51  ;;  %v3465_v63 = vpop.f32.mrb[7].mxu0  ;;  %v3667_v2 = vpop.eup %3666 }
 0x2cf   : > { %3487 = vmatpush3.msra.mxu1 %v3667_v2 }
 0x2d0   : > { %3672 = vtanh.f32 %v1059_v62  ;;  %3489 = vmatmul.mubr.msk.f32.vlgmr.msra.gmra.mrb[10].mxu1 %vm318_vm1, %v315_v0  ;;  %3496 = vmatprep.subr.mxu1 %v3771_v1 }
 0x2d1   : > { %v1128_v3 = vpop.f32.mrb[6].mxu1  ;;  %v1198_v5 = vpop.f32.mrb[8].mxu0  ;;  %3498 = vmatprep.mubr.msk.f32.mxu1 %vm3772_vm0, %v3771_v1 }
 0x2d2   : > { %v1129_v6 = vadd.f32 %v1128_v3, %v777_v51  ;;  %v1199_v7 = vadd.f32 %v1198_v5, %v777_v51  ;;  %v3470_v8 = vpop.f32.mrb[7].mxu1  ;;  %v3475_v9 = vpop.f32.mrb[9].mxu0 }
 0x2d3   : > { %v3669_v11 = vpop.eup %3668  ;;  %v2502_v8 = vpop.permute.xlu0 %2501 }
 0x2d4   : > { %3674 = vtanh.f32 %v1129_v6  ;;  %3492 = vmatpush3.msra.mxu0 %v3669_v11  ;;  %v2506_v11 = vrot.slane %v2502_v8, %v3876_v17 }
 0x2d5   : > { %3676 = vtanh.f32 %v1199_v7  ;;  %v1268_v12 = vpop.f32.mrb[8].mxu1  ;;  %v1338_v13 = vpop.f32.mrb[10].mxu0  ;;  %3494 = vmatmul.mubr.msk.f32.vlgmr.msra.gmra.mrb[12].mxu0 %vm318_vm1, %v315_v0  ;;  %3501 = vmatprep.subr.mxu0 %v3771_v1 }
 0x2d6   : > { %v3671_v14 = vpop.eup %3670  ;;  %v1269_v15 = vadd.f32 %v1268_v12, %v777_v51  ;;  %v1339_v16 = vadd.f32 %v1338_v13, %v777_v51  ;;  %v3480_v18 = vpop.f32.mrb[9].mxu1  ;;  %3503 = vmatprep.mubr.msk.f32.mxu0 %vm3772_vm0, %v3771_v1 }
 0x2d7   : > { %v3485_v19 = vpop.f32.mrb[11].mxu0  ;;  %3497 = vmatpush3.msra.mxu1 %v3671_v14 }
 0x2d8   : > { %3678 = vtanh.f32 %v1269_v15  ;;  %3499 = vmatmul.mubr.msk.f32.vlgmr.msra.gmra.mrb[12].mxu1 %vm318_vm1, %v315_v0  ;;  %3506 = vmatprep.subr.mxu1 %v3771_v1 }
 0x2d9   : > { %3680 = vtanh.f32 %v1339_v16  ;;  %3508 = vmatprep.mubr.msk.f32.mxu1 %vm3772_vm0, %v3771_v1 }
 0x2da   : > { %v3673_v20 = vpop.eup %3672 }
 0x2db   : > { %3502 = vmatpush3.msra.mxu0 %v3673_v20 }
 0x2dc   : > { %3504 = vmatmul.mubr.msk.f32.vlgmr.msra.gmra.mrb[14].mxu0 %vm318_vm1, %v315_v0  ;;  %3511 = vmatprep.subr.mxu0 %v3771_v1 }
 0x2dd   : > { %3513 = vmatprep.mubr.msk.f32.mxu0 %vm3772_vm0, %v3771_v1 }
 0x2de   : > { %v3675_v22 = vpop.eup %3674 }
 0x2df   : > { %v3677_v23 = vpop.eup %3676  ;;  %3507 = vmatpush3.msra.mxu1 %v3675_v22 }
 0x2e0   : > { %3512 = vmatpush3.msra.mxu0 %v3677_v23  ;;  %3509 = vmatmul.mubr.msk.f32.vlgmr.msra.gmra.mrb[14].mxu1 %vm318_vm1, %v315_v0 }
 0x2e1   : > { %3514 = vmatmul.mubr.msk.f32.vlgmr.msra.gmra.mrb[16].mxu0 %vm318_vm1, %v315_v0  ;;  %3516 = vmatprep.subr.mxu1 %v3771_v1 }
 0x2e2   : > { %v3679_v24 = vpop.eup %3678  ;;  %3521 = vmatprep.subr.mxu0 %v3771_v1  ;;  %3518 = vmatprep.mubr.msk.f32.mxu1 %vm3772_vm0, %v3771_v1 }
 0x2e3   : > { %v3681_v25 = vpop.eup %3680  ;;  %3517 = vmatpush3.msra.mxu1 %v3679_v24  ;;  %3523 = vmatprep.mubr.msk.f32.mxu0 %vm3772_vm0, %v3771_v1 }
 0x2e4   : > { %3522 = vmatpush3.msra.mxu0 %v3681_v25  ;;  %3519 = vmatmul.mubr.msk.f32.vlgmr.msra.gmra.mrb[16].mxu1 %vm318_vm1, %v315_v0 }
 0x2e5   : > { %3524 = vmatmul.mubr.msk.f32.vlgmr.msra.gmra.mrb[18].mxu0 %vm318_vm1, %v315_v0  ;;  %3526 = vmatprep.subr.mxu1 %v3771_v1 }
 0x2e6   : > { %3528 = vmatprep.mubr.msk.f32.mxu1 %vm3772_vm0, %v3771_v1  ;;  %3531 = vmatprep.subr.mxu0 %v3771_v1 }
 0x2e7   : > { %3533 = vmatprep.mubr.msk.f32.mxu0 %vm3772_vm0, %v3771_v1 }
 0x3a3   : > { %v1423_v29 = vpop.f32.mrb[10].mxu1 }
 0x3a4   : > { %v1424_v30 = vadd.f32 %v1423_v29, %v1352_v28  ;;  %v3490_v31 = vpop.f32.mrb[11].mxu1  ;;  %v3070_v29 = vpop.permute.xlu1 %3069 }
 0x3a5   : > { %3606 = vpush %v3070_v29 }
 0x3a6   : > { %3682 = vtanh.f32 %v1424_v30 }
 0x3a8   : > { %v1493_v32 = vpop.f32.mrb[12].mxu0 }
 0x3a9   : > { %v1494_v33 = vadd.f32 %v1493_v32, %v1352_v28  ;;  %v3495_v34 = vpop.f32.mrb[13].mxu0 }
 0x3ab   : > { %3684 = vtanh.f32 %v1494_v33  ;;  %v1563_v35 = vpop.f32.mrb[12].mxu1 }
 0x3ac   : > { %v1564_v36 = vadd.f32 %v1563_v35, %v1352_v28  ;;  %v3500_v37 = vpop.f32.mrb[13].mxu1 }
 0x3ae   : > { %3686 = vtanh.f32 %v1564_v36 }
 0x3af   : > { %v1633_v38 = vpop.f32.mrb[14].mxu0 }
 0x3b0   : > { %v1634_v39 = vadd.f32 %v1633_v38, %v1352_v28  ;;  %v3505_v40 = vpop.f32.mrb[15].mxu0  ;;  %v3683_v42 = vpop.eup %3682 }
 0x3b1   : > { %3527 = vmatpush3.msra.mxu1 %v3683_v42 }
 0x3b2   : > { %3688 = vtanh.f32 %v1634_v39  ;;  %3529 = vmatmul.mubr.msk.f32.vlgmr.msra.gmra.mrb[18].mxu1 %vm318_vm1, %v316_v41  ;;  %3536 = vmatprep.subr.mxu1 %v3771_v1 }
 0x3b3   : > { %v1703_v43 = vpop.f32.mrb[14].mxu1  ;;  %3538 = vmatprep.mubr.msk.f32.mxu1 %vm3772_vm0, %v3771_v1 }
 0x3b4   : > { %v1704_v44 = vadd.f32 %v1703_v43, %v1352_v28  ;;  %v1773_v21 = vpop.f32.mrb[16].mxu0  ;;  %v3510_v45 = vpop.f32.mrb[15].mxu1 }
 0x3b5   : > { %v3685_v10 = vpop.eup %3684  ;;  %v1774_v46 = vadd.f32 %v1773_v21, %v1352_v28  ;;  %v3515_v47 = vpop.f32.mrb[17].mxu0 }
 0x3b6   : > { %3690 = vtanh.f32 %v1704_v44  ;;  %3532 = vmatpush3.msra.mxu0 %v3685_v10 }
 0x3b7   : > { %3692 = vtanh.f32 %v1774_v46  ;;  %v1843_v48 = vpop.f32.mrb[16].mxu1  ;;  %3534 = vmatmul.mubr.msk.f32.vlgmr.msra.gmra.mrb[20].mxu0 %vm318_vm1, %v316_v41  ;;  %3541 = vmatprep.subr.mxu0 %v3771_v1 }
 0x3b8   : > { %v3687_v49 = vpop.eup %3686  ;;  %v1844_v50 = vadd.f32 %v1843_v48, %v1352_v28  ;;  %v1913_v51 = vpop.f32.mrb[18].mxu0  ;;  %3543 = vmatprep.mubr.msk.f32.mxu0 %vm3772_vm0, %v3771_v1 }
 0x3b9   : > { %v3520_v52 = vpop.f32.mrb[17].mxu1  ;;  %v1914_v53 = vadd.f32 %v1913_v51, %v1352_v28  ;;  %v3525_v54 = vpop.f32.mrb[19].mxu0  ;;  %3537 = vmatpush3.msra.mxu1 %v3687_v49 }
 0x3ba   : > { %3694 = vtanh.f32 %v1844_v50  ;;  %3539 = vmatmul.mubr.msk.f32.vlgmr.msra.gmra.mrb[20].mxu1 %vm318_vm1, %v316_v41  ;;  %3546 = vmatprep.subr.mxu1 %v3771_v1 }
 0x3bb   : > { %3696 = vtanh.f32 %v1914_v53  ;;  %3548 = vmatprep.mubr.msk.f32.mxu1 %vm3772_vm0, %v3771_v1 }
 0x3bc   : > { %v3689_v55 = vpop.eup %3688 }
 0x3bd   : > { %3542 = vmatpush3.msra.mxu0 %v3689_v55 }
 0x3be   : > { %3544 = vmatmul.mubr.msk.f32.vlgmr.msra.gmra.mrb[22].mxu0 %vm318_vm1, %v316_v41  ;;  %3551 = vmatprep.subr.mxu0 %v3771_v1 }
 0x3bf   : > { %3553 = vmatprep.mubr.msk.f32.mxu0 %vm3772_vm0, %v3771_v1 }
 0x3c0   : > { %v3691_v56 = vpop.eup %3690 }
 0x3c1   : > { %v3693_v57 = vpop.eup %3692  ;;  %3547 = vmatpush3.msra.mxu1 %v3691_v56 }
 0x3c2   : > { %3552 = vmatpush3.msra.mxu0 %v3693_v57  ;;  %3549 = vmatmul.mubr.msk.f32.vlgmr.msra.gmra.mrb[22].mxu1 %vm318_vm1, %v316_v41 }
 0x3c3   : > { %3554 = vmatmul.mubr.msk.f32.vlgmr.msra.gmra.mrb[24].mxu0 %vm318_vm1, %v316_v41  ;;  %3556 = vmatprep.subr.mxu1 %v3771_v1 }
 0x3c4   : > { %v3695_v58 = vpop.eup %3694  ;;  %3561 = vmatprep.subr.mxu0 %v3771_v1  ;;  %3558 = vmatprep.mubr.msk.f32.mxu1 %vm3772_vm0, %v3771_v1 }
 0x3c5   : > { %v3697_v59 = vpop.eup %3696  ;;  %3557 = vmatpush3.msra.mxu1 %v3695_v58  ;;  %3563 = vmatprep.mubr.msk.f32.mxu0 %vm3772_vm0, %v3771_v1 }
 0x3c6   : > { %3562 = vmatpush3.msra.mxu0 %v3697_v59  ;;  %3559 = vmatmul.mubr.msk.f32.vlgmr.msra.gmra.mrb[24].mxu1 %vm318_vm1, %v316_v41 }
 0x3c7   : > { %3564 = vmatmul.mubr.msk.f32.vlgmr.msra.gmra.mrb[26].mxu0 %vm318_vm1, %v316_v41  ;;  %3566 = vmatprep.subr.mxu1 %v3771_v1 }
 0x3c8   : > { %3568 = vmatprep.mubr.msk.f32.mxu1 %vm3772_vm0, %v3771_v1  ;;  %3571 = vmatprep.subr.mxu0 %v3771_v1 }
 0x3c9   : > { %3573 = vmatprep.mubr.msk.f32.mxu0 %vm3772_vm0, %v3771_v1 }
 0x3d6   : > { %s3607_s29 = spop %3606 }
 0x3d7   : > { %v3072_v36 = vstv %s3607_s29 }
 0x485   : > { %v1998_v61 = vpop.f32.mrb[18].mxu1 }
 0x486   : > { %v1999_v62 = vadd.f32 %v1998_v61, %v1927_v60  ;;  %v3530_v63 = vpop.f32.mrb[19].mxu1 }
 0x488   : > { %3698 = vtanh.f32 %v1999_v62 }
 0x48a   : > { %v2068_v0 = vpop.f32.mrb[20].mxu0 }
 0x48b   : > { %v2069_v2 = vadd.f32 %v2068_v0, %v1927_v60  ;;  %v3535_v3 = vpop.f32.mrb[21].mxu0 }
 0x48d   : > { %3700 = vtanh.f32 %v2069_v2  ;;  %v2138_v5 = vpop.f32.mrb[20].mxu1 }
 0x48e   : > { %v2139_v6 = vadd.f32 %v2138_v5, %v1927_v60  ;;  %v3540_v7 = vpop.f32.mrb[21].mxu1 }
 0x490   : > { %3702 = vtanh.f32 %v2139_v6 }
 0x491   : > { %v2208_v9 = vpop.f32.mrb[22].mxu0 }
 0x492   : > { %v2209_v12 = vadd.f32 %v2208_v9, %v1927_v60  ;;  %v3545_v13 = vpop.f32.mrb[23].mxu0  ;;  %v3699_v4 = vpop.eup %3698 }
 0x493   : > { %3567 = vmatpush3.msra.mxu1 %v3699_v4 }
 0x494   : > { %3704 = vtanh.f32 %v2209_v12  ;;  %3569 = vmatmul.mubr.msk.f32.vlgmr.msra.gmra.mrb[26].mxu1 %vm318_vm1, %v2506_v11  ;;  %3576 = vmatprep.subr.mxu1 %v3771_v1 }
 0x495   : > { %v2278_v14 = vpop.f32.mrb[22].mxu1  ;;  %3578 = vmatprep.mubr.msk.f32.mxu1 %vm3772_vm0, %v3771_v1 }
 0x496   : > { %v2279_v15 = vadd.f32 %v2278_v14, %v1927_v60  ;;  %v2348_v16 = vpop.f32.mrb[24].mxu0  ;;  %v3550_v18 = vpop.f32.mrb[23].mxu1 }
 0x497   : > { %v3701_v19 = vpop.eup %3700  ;;  %v2349_v20 = vadd.f32 %v2348_v16, %v1927_v60  ;;  %v3555_v22 = vpop.f32.mrb[25].mxu0 }
 0x498   : > { %3706 = vtanh.f32 %v2279_v15  ;;  %3572 = vmatpush3.msra.mxu0 %v3701_v19 }
 0x499   : > { %3708 = vtanh.f32 %v2349_v20  ;;  %v2418_v17 = vpop.f32.mrb[24].mxu1  ;;  %3574 = vmatmul.mubr.msk.f32.vlgmr.msra.gmra.mrb[28].mxu0 %vm318_vm1, %v2506_v11  ;;  %3581 = vmatprep.subr.mxu0 %v3771_v1 }
 0x49a   : > { %v3703_v23 = vpop.eup %3702  ;;  %v2419_v24 = vadd.f32 %v2418_v17, %v1927_v60  ;;  %v2488_v25 = vpop.f32.mrb[26].mxu0  ;;  %3583 = vmatprep.mubr.msk.f32.mxu0 %vm3772_vm0, %v3771_v1 }
 0x49b   : > { %v3560_v26 = vpop.f32.mrb[25].mxu1  ;;  %v2489_v27 = vadd.f32 %v2488_v25, %v1927_v60  ;;  %v3565_v28 = vpop.f32.mrb[27].mxu0  ;;  %3577 = vmatpush3.msra.mxu1 %v3703_v23 }
 0x49c   : > { %3710 = vtanh.f32 %v2419_v24  ;;  %3579 = vmatmul.mubr.msk.f32.vlgmr.msra.gmra.mrb[28].mxu1 %vm318_vm1, %v2506_v11  ;;  %3586 = vmatprep.subr.mxu1 %v3771_v1 }
 0x49d   : > { %3712 = vtanh.f32 %v2489_v27  ;;  %3588 = vmatprep.mubr.msk.f32.mxu1 %vm3772_vm0, %v3771_v1 }
 0x49e   : > { %v3705_v30 = vpop.eup %3704 }
 0x49f   : > { %3582 = vmatpush3.msra.mxu0 %v3705_v30 }
 0x4a0   : > { %3584 = vmatmul.mubr.msk.f32.vlgmr.msra.gmra.mrb[30].mxu0 %vm318_vm1, %v2506_v11  ;;  %3591 = vmatprep.subr.mxu0 %v3771_v1 }
 0x4a1   : > { %3593 = vmatprep.mubr.msk.f32.mxu0 %vm3772_vm0, %v3771_v1 }
 0x4a2   : > { %v3707_v31 = vpop.eup %3706 }
 0x4a3   : > { %v3709_v32 = vpop.eup %3708  ;;  %3587 = vmatpush3.msra.mxu1 %v3707_v31 }
 0x4a4   : > { %3592 = vmatpush3.msra.mxu0 %v3709_v32  ;;  %3589 = vmatmul.mubr.msk.f32.vlgmr.msra.gmra.mrb[30].mxu1 %vm318_vm1, %v2506_v11 }
 0x4a5   : > { %3594 = vmatmul.mubr.msk.f32.vlgmr.msra.gmra.mrb[32].mxu0 %vm318_vm1, %v2506_v11  ;;  %3596 = vmatprep.subr.mxu1 %v3771_v1 }
 0x4a6   : > { %v3711_v33 = vpop.eup %3710  ;;  %3601 = vmatprep.subr.mxu0 %v3771_v1  ;;  %3598 = vmatprep.mubr.msk.f32.mxu1 %vm3772_vm0, %v3771_v1 }
 0x4a7   : > { %v3713_v34 = vpop.eup %3712  ;;  %3597 = vmatpush3.msra.mxu1 %v3711_v33  ;;  %3603 = vmatprep.mubr.msk.f32.mxu0 %vm3772_vm0, %v3771_v1 }
 0x4a8   : > { %3602 = vmatpush3.msra.mxu0 %v3713_v34  ;;  %3599 = vmatmul.mubr.msk.f32.vlgmr.msra.gmra.mrb[32].mxu1 %vm318_vm1, %v2506_v11 }
 0x4a9   : > { %3604 = vmatmul.mubr.msk.f32.vlgmr.msra.gmra.mrb[34].mxu0 %vm318_vm1, %v2506_v11 }
 0x567   : > { %v2575_v35 = vpop.f32.mrb[26].mxu1 }
 0x568   : > { %v3074_v37 = vadd.f32 %v3072_v36, %v2575_v35  ;;  %v3570_v38 = vpop.f32.mrb[27].mxu1 }
 0x56a   : > { %v3335_v39 = vmul.f32 -1.442695, %v3074_v37 }
 0x56c   : > { %v2645_v40 = vpop.f32.mrb[28].mxu0  ;;  %3714 = vpow2.f32 %v3335_v39 }
 0x56d   : > { %v3075_v41 = vadd.f32 %v3072_v36, %v2645_v40  ;;  %v3575_v42 = vpop.f32.mrb[29].mxu0 }
 0x56f   : > { %v3336_v43 = vmul.f32 -1.442695, %v3075_v41  ;;  %v2715_v44 = vpop.f32.mrb[28].mxu1 }
 0x570   : > { %v3076_v21 = vadd.f32 %v3072_v36, %v2715_v44  ;;  %v3580_v45 = vpop.f32.mrb[29].mxu1 }
 0x571   : > { %3716 = vpow2.f32 %v3336_v43 }
 0x572   : > { %v3337_v1 = vmul.f32 -1.442695, %v3076_v21 }
 0x573   : > { %v2785_v10 = vpop.f32.mrb[30].mxu0 }
 0x574   : > { %3718 = vpow2.f32 %v3337_v1  ;;  %v3077_v46 = vadd.f32 %v3072_v36, %v2785_v10  ;;  %v3585_v47 = vpop.f32.mrb[31].mxu0 }
 0x576   : > { %v3338_v48 = vmul.f32 -1.442695, %v3077_v46  ;;  %v3715_v49 = vpop.eup %3714 }
 0x577   : > { %v2855_v50 = vpop.f32.mrb[30].mxu1  ;;  %v3106_v51 = vadd.f32 1.0, %v3715_v49 }
 0x578   : > { %3720 = vpow2.f32 %v3338_v48  ;;  %v3078_v52 = vadd.f32 %v3072_v36, %v2855_v50  ;;  %v2925_v53 = vpop.f32.mrb[32].mxu0  ;;  %v3590_v54 = vpop.f32.mrb[31].mxu1 }
 0x579   : > { %v3079_v55 = vadd.f32 %v3072_v36, %v2925_v53  ;;  %v3595_v56 = vpop.f32.mrb[33].mxu0  ;;  %3722 = vrcp.f32 %v3106_v51 }
 0x57a   : > { %v3339_v57 = vmul.f32 -1.442695, %v3078_v52 }
 0x57b   : > { %v3717_v58 = vpop.eup %3716  ;;  %v3340_v59 = vmul.f32 -1.442695, %v3079_v55  ;;  %v2995_v60 = vpop.f32.mrb[32].mxu1 }
 0x57c   : > { %v3107_v61 = vadd.f32 1.0, %v3717_v58  ;;  %3724 = vpow2.f32 %v3339_v57  ;;  %v3080_v62 = vadd.f32 %v3072_v36, %v2995_v60  ;;  %v3065_v63 = vpop.f32.mrb[34].mxu0  ;;  %v3600_v0 = vpop.f32.mrb[33].mxu1 }
 0x57d   : > { %3726 = vpow2.f32 %v3340_v59  ;;  %v3081_v2 = vadd.f32 %v3072_v36, %v3065_v63  ;;  %v3605_v3 = vpop.f32.mrb[35].mxu0 }
 0x57e   : > { %v3719_v5 = vpop.eup %3718  ;;  %3728 = vrcp.f32 %v3107_v61  ;;  %v3341_v6 = vmul.f32 -1.442695, %v3080_v62 }
 0x57f   : > { %v3108_v7 = vadd.f32 1.0, %v3719_v5  ;;  %v3342_v8 = vmul.f32 -1.442695, %v3081_v2 }
 0x580   : > { %3730 = vpow2.f32 %v3341_v6 }
 0x581   : > { %3732 = vrcp.f32 %v3108_v7 }
 0x582   : > { %v3721_v9 = vpop.eup %3720  ;;  %3734 = vpow2.f32 %v3342_v8 }
 0x583   : > { %v3109_v11 = vadd.f32 1.0, %v3721_v9  ;;  %v3723_v12 = vpop.eup %3722 }
 0x584   : > { %v3353_v14 = vpack.c.bf16 %v3723_v12, %v3723_v12 }
 0x585   : > { %3736 = vrcp.f32 %v3109_v11 }
 0x586   : > { %v3725_v13 = vpop.eup %3724  ;;  %v3162_v17 = vunpack.c.l.b16 %v3353_v14 }
 0x587   : > { %v3727_v4 = vpop.eup %3726  ;;  %v3110_v15 = vadd.f32 1.0, %v3725_v13 }
 0x588   : > { %v3729_v16 = vpop.eup %3728  ;;  %v3111_v18 = vadd.f32 1.0, %v3727_v4 }
 0x589   : > { %v3354_v19 = vpack.c.bf16 %v3729_v16, %v3729_v16  ;;  %3738 = vrcp.f32 %v3110_v15 }
 0x58a   : > { %v3731_v20 = vpop.eup %3730  ;;  %3740 = vrcp.f32 %v3111_v18 }
 0x58b   : > { %v3733_v22 = vpop.eup %3732  ;;  %v3163_v23 = vunpack.c.l.b16 %v3354_v19  ;;  %v3112_v24 = vadd.f32 1.0, %v3731_v20 }
 0x58c   : > { %v3735_v25 = vpop.eup %3734  ;;  %v3355_v26 = vpack.c.bf16 %v3733_v22, %v3733_v22 }
 0x58d   : > { %v3170_v27 = vrot.slane %v3163_v23, 7  ;;  %3742 = vrcp.f32 %v3112_v24  ;;  %v3113_v28 = vadd.f32 1.0, %v3735_v25 }
 0x58e   : > { %v3164_v29 = vunpack.c.l.b16 %v3355_v26 }
 0x58f   : > { %v3737_v30 = vpop.eup %3736  ;;  %v3172_v31 = vsel %vm3171_vm2, %v3170_v27, %v3162_v17  ;;  %3744 = vrcp.f32 %v3113_v28 }
 0x590   : > { %v3173_v32 = vrot.slane %v3164_v29, 6  ;;  %v3356_v33 = vpack.c.bf16 %v3737_v30, %v3737_v30 }
 0x592   : > { %v3175_v34 = vsel %vm3174_vm3, %v3173_v32, %v3172_v31  ;;  %v3165_v35 = vunpack.c.l.b16 %v3356_v33 }
 0x593   : > { %v3739_v36 = vpop.eup %3738 }
 0x594   : > { %v3741_v37 = vpop.eup %3740  ;;  %v3176_v38 = vrot.slane %v3165_v35, 5  ;;  %v3357_v39 = vpack.c.bf16 %v3739_v36, %v3739_v36 }
 0x595   : > { %v3358_v40 = vpack.c.bf16 %v3741_v37, %v3741_v37 }
 0x596   : > { %v3178_v41 = vsel %vm3177_vm4, %v3176_v38, %v3175_v34  ;;  %v3166_v42 = vunpack.c.l.b16 %v3357_v39 }
 0x597   : > { %v3743_v43 = vpop.eup %3742  ;;  %v3167_v44 = vunpack.c.l.b16 %v3358_v40 }
 0x598   : > { %v3179_v21 = vrot.slane %v3166_v42, 4  ;;  %v3359_v45 = vpack.c.bf16 %v3743_v43, %v3743_v43 }
 0x599   : > { %v3745_v1 = vpop.eup %3744  ;;  %v3182_v10 = vrot.slane %v3167_v44, 3 }
 0x59a   : > { %v3181_v46 = vsel %vm3180_vm5, %v3179_v21, %v3178_v41  ;;  %v3168_v47 = vunpack.c.l.b16 %v3359_v45  ;;  %v3360_v48 = vpack.c.bf16 %v3745_v1, %v3745_v1 }
 0x59b   : > { %v3184_v49 = vsel %vm3183_vm6, %v3182_v10, %v3181_v46 }
 0x59c   : > { %v3185_v50 = vrot.slane %v3168_v47, 2  ;;  %v3169_v51 = vunpack.c.l.b16 %v3360_v48 }
 0x59e   : > { %v3187_v52 = vsel %vm3186_vm7, %v3185_v50, %v3184_v49  ;;  %v3188_v53 = vrot.slane %v3169_v51, 1 }
 0x5a0   : > { %v3190_v54 = vsel %vm3189_vm8, %v3188_v53, %v3187_v52 }
 0x5a1   : > { %v3191_v55 = vpack.c.b16 %v3190_v54, %v3190_v54 }
 0x5a3   : > { %3194 = vst.msk [vmem:[%s308_s8] sm:$0xf] %vm3193_vm9, %v3191_v55 }
 0x5a4 PF: > { %s16_s23 = sadd.s32 1, %s3768_s23   ;;  %s4063_s21 = smov %s3764_s22 }
 0x5a5   : > { %p13_p5 = scmp.ge.s32.totalorder %s16_s23, 4   ;;  %s4064_s22 = smov %s4066_s24 }
 0x5a7   :  { %15 = sbr.rel (!%p13_p5) target bundleno = 2 (0x2), region = 80 }

// kernel: dense_gnn_diffpool_forward.12
= control target key start
LH: loop header
LB: loop body
LE: loop exit
PB: predicated region body
PF: predicated region fallthrough
CT: control target
= control target key end

     0   :  { %s3440_s0 = inlined_call_operand.vmem [shape: f32[2,8,8], index: 0, kind: input, shape index: {}]   ;;  %s3441_s1 = inlined_call_operand.vmem [shape: bf16[2,8,8], index: 1, kind: input, shape index: {}]   ;;  %s3442_s2 = inlined_call_operand.vmem [shape: f32[2,1,8], index: 2, kind: input, shape index: {}]   ;;  %s3443_s3 = inlined_call_operand.vmem [shape: f32[8,32], index: 3, kind: input, shape index: {}]   ;;  %s3444_s4 = inlined_call_operand.vmem [shape: f32[3,8,8], index: 4, kind: input, shape index: {}]   ;;  %s3445_s5 = inlined_call_operand.vmem [shape: f32[4,8,3], index: 5, kind: input, shape index: {}]   ;;  %s3446_s6 = inlined_call_operand.vmem [shape: f32[3,8,8], index: 6, kind: input, shape index: {}]   ;;  %s3447_s7 = inlined_call_operand.vmem [shape: f32[3,8,3], index: 7, kind: input, shape index: {}]   ;;  %s3448_s8 = inlined_call_operand.vmem [shape: f32[2,8,8], index: 8, kind: output, shape index: {0}]   ;;  %s3449_s9 = inlined_call_operand.vmem [shape: f32[2,8,8], index: 9, kind: output, shape index: {1}]   ;;  %s3450_s10 = inlined_call_operand.hbm [shape: f32[2,1,8], index: 10, kind: output, shape index: {2}]  }
   0x1   :  { %3451 = sst [smem:[#allocation6_spill]] %s3443_s3 }
   0x2   :  { %16 = vsyncpa [#allocation3], 0 }
   0x3   :  { %18 = vsyncpa [#allocation3 + $0x1], 0  ;;  %s3115_s13 = smov 0   ;;  %s3117_s14 = smov 0  }
   0x4   :  { %s3119_s15 = smov 0   ;;  %s3121_s16 = smov 0  }
   0x5 LB: > { %s3136_s17 = sadd.s32 4294967295, %s3046_s16   ;;  %s2672_s18 = sadd.s32 4294967294, %s3046_s16   ;;  %s3046_s16 = sphi %s3121_s16, %s3460_s16   ;;  %s3042_s15 = sphi %s3119_s15, %s3459_s15   ;;  %s3038_s14 = sphi %s3117_s14, %s3458_s14   ;;  %s3034_s13 = sphi %s3115_s13, %s3457_s13  }
   0x6   : > { %s3140_s19 = sadd.s32 1, %s3046_s16   ;;  %s266_s20 = sadd.s32 1, %s3042_s15 }
   0x7   : > { %s263_s21 = ssub.s32 %s3046_s16, %s3140_s19  ;;  %p276_p0 = scmp.ne.s32.totalorder %s3042_s15, %s3038_s14 }
   0x8   : > { %p264_p1 = scmp.eq.s32.totalorder %s263_s21, 0  ;;  %p277_p2 = scmp.eq.s32.totalorder %s3136_s17, 1 }
   0x9   : > { %p282_p3 = scmp.ne.s32.totalorder %s3038_s14, %s3034_s13  ;;  %p283_p4 = scmp.eq.s32.totalorder %s2672_s18, 1 }
   0xa   : > { %s3151_s22 = scalar_select %p264_p1, %s3042_s15, %s266_s20  }
   0xb   : > { %p3153_p5 = por %p277_p2, %p276_p0  ;;  %p3157_p6 = por %p283_p4, %p282_p3 }
   0xc   : > { %3452 = sst [smem:[#allocation5_spill]] %s3151_s22  ;;  %p2675_p7 = scmp.ge.s32.totalorder %s3046_s16, 1 }
   0xd   : > { %p336_p8 = scmp.lt.s32.totalorder %s3046_s16, 3 }
   0xf   : > { %p337_p9 = pnand %p2675_p7, %p336_p8 }
  0x10   : > { %p387_p10 = scmp.lt.s32.totalorder (!%p337_p9), %s3136_s17, 1  ;;  %s3455_s3 = sld [smem:[#allocation6_spill]] (!%p337_p9)  ;;  %v3048_v1 = vmov (!%p337_p9), 0.0   ;;  %vm3049_vm0 = vmmov (!%p337_p9), 0   ;;  %vm425_vm1 = vcmask (!%p337_p9), 64512   ;;  %v3053_v14 = vmov (!%p337_p9), 0  }
  0x11   : > { %340 = sbr.rel (%p337_p9) target bundleno = 5448 (0x1548), region = 52  ;;  %2763 = vmatprep.subr.mxu0 (!%p337_p9), %v3048_v1  ;;  %2768 = vmatprep.subr.mxu1 (!%p337_p9), %v3048_v1  ;;  %s3050_s28 = smov (!%p337_p9), 120   ;;  %v421_v15 = vld [vmem:[%s3445_s5] sm:$0xff] (!%p337_p9)  ;;  %v3054_v30 = vmov (!%p337_p9), 1.0   ;;  %v3055_v31 = vmov (!%p337_p9), 2   ;;  %v3056_v32 = vmov (!%p337_p9), 1   ;;  %v954_v34 = vlaneseq (!%p337_p9) }
  0x12   : > { %2765 = vmatprep.mubr.msk.f32.mxu0 (!%p337_p9), %vm3049_vm0, %v3048_v1  ;;  %2770 = vmatprep.mubr.msk.f32.mxu1 (!%p337_p9), %vm3049_vm0, %v3048_v1  ;;  %s3051_s22 = smov (!%p337_p9), 112   ;;  %v422_v33 = vld [vmem:[%s3445_s5 + $0x8] sm:$0xff] (!%p337_p9)  ;;  %v418_v54 = vld [vmem:[%s3444_s4] sm:$0xff] (!%p337_p9)  ;;  %s385_s26 = sand.u32 (!%p337_p9), 1, %s3038_s14   ;;  %vm2519_vm2 = vcmask (!%p337_p9), 57344  }
  0x13   : > { %2943 = vset.pattern.permute.xlu0 (!%p337_p9), %v3053_v14  ;;  %2944 = vset.pattern.permute.xlu1 (!%p337_p9), %v3053_v14  ;;  %v3233_v35 = vshrl.u32 (!%p337_p9), %v954_v34, 7  ;;  %s2530_s11 = scalar_lea.sflag (!%p337_p9), [#allocation3], %s385_s26 }
  0x15   : > { %v3236_v36 = vsub.s32 (!%p337_p9), 0, %v3233_v35 }
  0x16   : > { %v417_v0 = vld [vmem:[%s3455_s3] sm:$0xff] (!%p337_p9)  ;;  %s3052_s3 = smov (!%p337_p9), 104  }
  0x17   : > { %573 = vrot.lane.b32.xlu1 (!%p337_p9), %v417_v0, %s3050_s28 }
  0x18   : > { %s388_s27 = scalar_select %p387_p10, %s3136_s17, 1 }
  0x1a   : > { %s2677_s29 = sshll.u32 %s388_s27, 2  ;;  %s3174_s30 = sshll.u32 %s388_s27, 3 }
  0x1b   : > { %s394_s18 = scalar_lea.vmem %s3441_s1, %s2677_s29  ;;  %s390_s25 = scalar_lea.vmem %s3440_s0, %s3174_s30  ;;  %719 = vrot.lane.b32.xlu1 %v417_v0, %s3051_s22 }
  0x1c   : > { %v407_v2 = vld [vmem:[%s394_s18] sm:$0xf]  ;;  %s397_s28 = scalar_lea.vmem %s3442_s2, %s388_s27  ;;  %s401_s12 = scalar_lea.vmem %s3448_s8, %s3174_s30 }
  0x1d   : > { %v408_v3 = vunpack.c.l.bf16 %v407_v2  ;;  %v3183_v4 = vld [vmem:[%s390_s25] sm:$0xff]  ;;  %s405_s21 = scalar_lea.vmem %s3449_s9, %s3174_s30  ;;  %s3058_s22 = smov 126  }
  0x1e   : > { %v2680_v5 = vld [vmem:[%s397_s28] ss:$0 sm:$0xff]  ;;  %s2708_s30 = sshll.u32 %s3136_s17, 4  ;;  %s386_s28 = scalar_lea.vmem [#allocation2], %s385_s26 }
  0x1f   : > { %2764 = vmatpush3.msra.mxu0 %v408_v3  ;;  %2769 = vmatpush3.xpose.msk.msra.mxu1 %vm425_vm1, %v408_v3  ;;  %v423_v3 = vld [vmem:[%s3445_s5 + $0x10] sm:$0xff]  ;;  %s3398_s29 = scalar_lea.hbm %s3450_s10, %s2708_s30  ;;  %s3059_s17 = smov [#allocation2]  }
  0x20   : > { %2766 = vmatmul.mubr.msk.f32.vlgmr.msra.gmra.mrb[0].mxu0 %vm425_vm1, %v3183_v4  ;;  %415 = vbcast.lane.b32.xlu0 %v2680_v5, 256  ;;  %s2988_s18 = sshll.u32 %s3059_s17, 4  ;;  %s2989_s18 = int_to_ptr.vmem [resolvable:$false] %s2988_s18 }
  0x21   : > { %2778 = vmatprep.subr.mxu1 %v3048_v1  ;;  %2773 = vmatprep.subr.mxu0 %v3048_v1  ;;  %s2990_s20 = scalar_lea.vmem %s2989_s18, 32 }
  0x22   : > { %2771 = vmatmul.mubr.msk.f32.vlgmr.msra.gmra.mrb[0].mxu1 %vm425_vm1, %v3183_v4  ;;  %2775 = vmatprep.mubr.msk.f32.mxu0 %vm3049_vm0, %v3048_v1 }
  0x23   : > { %2780 = vmatprep.mubr.msk.f32.mxu1 %vm3049_vm0, %v3048_v1  ;;  %876 = vperm.xlu1 %2944, %v421_v15  }
  0x24   : > { %794 = vrot.lane.b32.xlu0 %v417_v0, %s3052_s3  ;;  %s3057_s3 = smov 127  }
  0x27   : > { %2945 = vset.pattern.permute.xlu1 %v3056_v32 }
  0x28   : > { %1039 = vperm.xlu1 %2945, %v421_v15  }
  0x2c   : > { %2947 = vset.pattern.permute.xlu1 %v3053_v14 }
  0x2d   : > { %1051 = vperm.xlu1 %2947, %v422_v33  }
  0x31   : > { %2948 = vset.pattern.permute.xlu1 %v3056_v32 }
  0x32   : > { %1283 = vperm.xlu1 %2948, %v422_v33  }
  0x36   : > { %2949 = vset.pattern.permute.xlu1 %v3053_v14 }
  0x37   : > { %1295 = vperm.xlu1 %2949, %v423_v3  }
  0x3b   : > { %2951 = vset.pattern.permute.xlu1 %v3055_v31 }
  0x3c   : > { %1532 = vperm.xlu1 %2951, %v423_v3  }
  0x40   : > { %2952 = vset.pattern.permute.xlu1 %v3053_v14 }
  0x89   : > { %v574_v7 = vpop.permute.xlu1 %573 }
  0x8d   : > { %v720_v13 = vpop.permute.xlu1 %719 }
  0x92   : > { %v416_v6 = vpop.permute.xlu0 %415 }
  0x96   : > { %v795_v11 = vpop.permute.xlu0 %794 }
  0xa2   : > { %v877_v27 = vpop.permute.xlu1 %876 }
  0xa7   : > { %v1040_v49 = vpop.permute.xlu1 %1039 }
  0xac   : > { %v1052_v56 = vpop.permute.xlu1 %1051 }
  0xf3   : > { %v495_v8 = vpop.f32.mrb[0].mxu0 }
  0xf4   : > { %v2767_v9 = vpop.f32.mrb[1].mxu0  ;;  %2779 = vmatpush3.msra.mxu1 %v495_v8 }
  0xf5   : > { %v568_v10 = vpop.f32.mrb[0].mxu1  ;;  %2781 = vmatmul.mubr.msk.f32.vlgmr.msra.gmra.mrb[2].mxu1 %vm425_vm1, %v417_v0  ;;  %2788 = vmatprep.subr.mxu1 %v3048_v1 }
  0xf6   : > { %2774 = vmatpush3.msra.mxu0 %v568_v10  ;;  %2789 = vmatpush3.msra.mxu1 %v416_v6  ;;  %v2772_v12 = vpop.f32.mrb[1].mxu1 }
  0xf7   : > { %2776 = vmatmul.mubr.msk.f32.vlgmr.msra.gmra.mrb[2].mxu0 %vm425_vm1, %v574_v7  ;;  %2790 = vmatprep.mubr.msk.f32.mxu1 %vm3049_vm0, %v3048_v1 }
  0xf8   : > { %2783 = vmatprep.subr.mxu0 %v3048_v1  ;;  %2785 = vmatprep.mubr.msk.f32.mxu0 %vm3049_vm0, %v3048_v1 }
  0xf9   : > { %2791 = vmatmul.mubr.msk.f32.vlgmr.msra.gmra.mrb[4].mxu1 %vm425_vm1, %v795_v11  ;;  %2784 = vmatpush3.msra.mxu0 %v3183_v4  ;;  %v1284_v11 = vpop.permute.xlu1 %1283 }
  0xfa   : > { %2793 = vmatprep.subr.mxu0 %v3048_v1  ;;  %2798 = vmatprep.subr.mxu1 %v3048_v1 }
  0xfb   : > { %2786 = vmatmul.mubr.msk.f32.vlgmr.msra.gmra.mrb[4].mxu0 %vm425_vm1, %v720_v13  ;;  %2800 = vmatprep.mubr.msk.f32.mxu1 %vm3049_vm0, %v3048_v1 }
  0xfc   : > { %2795 = vmatprep.mubr.msk.f32.mxu0 %vm3049_vm0, %v3048_v1 }
 0x1c8   : > { %v715_v16 = vpop.f32.mrb[2].mxu1 }
 0x1c9   : > { %v2782_v17 = vpop.f32.mrb[3].mxu1 }
 0x1ca   : > { %v643_v18 = vpop.f32.mrb[2].mxu0  ;;  %v419_v17 = vld [vmem:[%s3444_s4 + $0x8] sm:$0xff] }
 0x1cb   : > { %v716_v19 = vadd.f32 %v715_v16, %v643_v18  ;;  %v2777_v20 = vpop.f32.mrb[3].mxu0 }
 0x1cc   : > { %v864_v21 = vpop.f32.mrb[4].mxu1 }
 0x1cd   : > { %870 = vperm.xlu0 %2943, %v864_v21   ;;  %v2792_v22 = vpop.f32.mrb[5].mxu1 }
 0x1ce   : > { %v789_v23 = vpop.f32.mrb[4].mxu0 }
 0x1cf   : > { %v793_v24 = vadd.f32 %v789_v23, %v716_v19  ;;  %v2787_v25 = vpop.f32.mrb[5].mxu0  ;;  %v1296_v19 = vpop.permute.xlu1 %1295  ;;  %v424_v23 = vld [vmem:[%s3445_s5 + $0x18] sm:$0xff] }
 0x1d0   : > { %1539 = vperm.xlu1 %2952, %v424_v23  }
 0x1d1   : > { %2946 = vset.pattern.permute.xlu0 %v3055_v31 }
 0x1d2   : > { %1044 = vperm.xlu0 %2946, %v421_v15  }
 0x1d4   : > { %2953 = vset.pattern.permute.xlu1 %v3055_v31 }
 0x1d5   : > { %1776 = vperm.xlu1 %2953, %v424_v23  }
 0x1d6   : > { %1288 = vperm.xlu0 %2946, %v422_v33  }
 0x1d9   : > { %2954 = vset.pattern.permute.xlu1 %v3053_v14 }
 0x1da   : > { %2950 = vset.pattern.permute.xlu0 %v3056_v32 }
 0x1db   : > { %1527 = vperm.xlu0 %2950, %v423_v3  }
 0x1df   : > { %1771 = vperm.xlu0 %2950, %v424_v23  }
 0x1e3   : > { %2955 = vset.pattern.permute.xlu0 %v3053_v14 }
 0x24c   : > { %v871_v26 = vpop.permute.xlu0 %870 }
 0x24d   : > { %v873_v28 = vadd.f32 %v871_v26, %v793_v24 }
 0x24f   : > { %v879_v29 = vadd.f32 %v877_v27, %v873_v28 }
 0x251   : > { %2794 = vmatpush3.msra.mxu0 %v879_v29  ;;  %v1045_v52 = vpop.permute.xlu0 %1044 }
 0x252   : > { %2796 = vmatmul.mubr.msk.f32.vlgmr.msra.gmra.mrb[6].mxu0 %vm425_vm1, %v3054_v30  ;;  %2803 = vmatprep.subr.mxu0 %v3048_v1 }
 0x253   : > { %2805 = vmatprep.mubr.msk.f32.mxu0 %vm3049_vm0, %v3048_v1 }
 0x255   : > { %v1289_v15 = vpop.permute.xlu0 %1288 }
 0x325   : > { %v949_v37 = vpop.f32.mrb[6].mxu0 }
 0x326   : > { %v953_v38 = vmul.f32 0.125, %v949_v37  ;;  %v2797_v39 = vpop.f32.mrb[7].mxu0 }
 0x328   : > { %v957_v40 = vrot.slane %v953_v38, %v3236_v36 }
 0x32a   : > { %v958_v41 = vsub.f32 %v879_v29, %v957_v40  ;;  %v1528_v40 = vpop.permute.xlu0 %1527 }
 0x32c   : > { %v959_v42 = vmul.f32 %v958_v41, %v958_v41 }
 0x32e   : > { %2799 = vmatpush3.msra.mxu1 %v959_v42 }
 0x32f   : > { %2801 = vmatmul.mubr.msk.f32.vlgmr.msra.gmra.mrb[6].mxu1 %vm425_vm1, %v3054_v30  ;;  %2808 = vmatprep.subr.mxu1 %v3048_v1 }
 0x330   : > { %2810 = vmatprep.mubr.msk.f32.mxu1 %vm3049_vm0, %v3048_v1 }
 0x402   : > { %v1026_v43 = vpop.f32.mrb[6].mxu1 }
 0x403   : > { %v1030_v44 = vmul.f32 0.125, %v1026_v43  ;;  %v2802_v45 = vpop.f32.mrb[7].mxu1 }
 0x405   : > { %v1031_v46 = vadd.f32 1e-05, %v1030_v44  ;;  %v420_v44 = vld [vmem:[%s3444_s4 + $0x10] sm:$0xff] }
 0x407   : > { %2956 = vrsqrt.f32 %v1031_v46 }
 0x411   : > { %v2957_v47 = vpop.eup %2956 }
 0x412   : > { %v1036_v48 = vrot.slane %v2957_v47, %v3236_v36 }
 0x414   : > { %v1037_v50 = vmul.f32 %v1036_v48, %v958_v41  ;;  %v1533_v41 = vpop.permute.xlu1 %1532 }
 0x416   : > { %v1042_v51 = vmul.f32 %v1040_v49, %v1037_v50 }
 0x418   : > { %v1047_v53 = vadd.f32 %v1045_v52, %v1042_v51  ;;  %v1540_v46 = vpop.permute.xlu1 %1539 }
 0x41a   : > { %2958 = vtanh.f32 %v1047_v53 }
 0x424   : > { %v2959_v55 = vpop.eup %2958 }
 0x425   : > { %2804 = vmatpush3.msra.mxu0 %v2959_v55 }
 0x426   : > { %2806 = vmatmul.mubr.msk.f32.vlgmr.msra.gmra.mrb[8].mxu0 %vm425_vm1, %v418_v54  ;;  %2813 = vmatprep.subr.mxu0 %v3048_v1 }
 0x427   : > { %2815 = vmatprep.mubr.msk.f32.mxu0 %vm3049_vm0, %v3048_v1 }
 0x4f9   : > { %v1123_v57 = vpop.f32.mrb[8].mxu0 }
 0x4fa   : > { %v1124_v58 = vadd.f32 %v1123_v57, %v1052_v56  ;;  %v2807_v59 = vpop.f32.mrb[9].mxu0 }
 0x4fc   : > { %2809 = vmatpush3.msra.mxu1 %v1124_v58 }
 0x4fd   : > { %2811 = vmatmul.mubr.msk.f32.vlgmr.msra.gmra.mrb[8].mxu1 %vm425_vm1, %v3054_v30  ;;  %2818 = vmatprep.subr.mxu1 %v3048_v1 }
 0x4fe   : > { %2820 = vmatprep.mubr.msk.f32.mxu1 %vm3049_vm0, %v3048_v1 }
 0x5d0   : > { %v1193_v60 = vpop.f32.mrb[8].mxu1 }
 0x5d1   : > { %v1197_v61 = vmul.f32 0.125, %v1193_v60  ;;  %v2812_v62 = vpop.f32.mrb[9].mxu1 }
 0x5d3   : > { %v1201_v63 = vrot.slane %v1197_v61, %v3236_v36 }
 0x5d5   : > { %v1202_v0 = vsub.f32 %v1124_v58, %v1201_v63  ;;  %v1772_v63 = vpop.permute.xlu0 %1771 }
 0x5d7   : > { %v1203_v2 = vmul.f32 %v1202_v0, %v1202_v0 }
 0x5d9   : > { %2814 = vmatpush3.msra.mxu0 %v1203_v2 }
 0x5da   : > { %2816 = vmatmul.mubr.msk.f32.vlgmr.msra.gmra.mrb[10].mxu0 %vm425_vm1, %v3054_v30  ;;  %2823 = vmatprep.subr.mxu0 %v3048_v1 }
 0x5db   : > { %2825 = vmatprep.mubr.msk.f32.mxu0 %vm3049_vm0, %v3048_v1 }
 0x6ad   : > { %v1270_v5 = vpop.f32.mrb[10].mxu0 }
 0x6ae   : > { %v1274_v6 = vmul.f32 0.125, %v1270_v5  ;;  %v2817_v7 = vpop.f32.mrb[11].mxu0 }
 0x6b0   : > { %v1275_v8 = vadd.f32 1e-05, %v1274_v6 }
 0x6b2   : > { %2960 = vrsqrt.f32 %v1275_v8 }
 0x6bc   : > { %v2961_v9 = vpop.eup %2960 }
 0x6bd   : > { %v1280_v10 = vrot.slane %v2961_v9, %v3236_v36 }
 0x6bf   : > { %v1281_v12 = vmul.f32 %v1280_v10, %v1202_v0  ;;  %v1777_v0 = vpop.permute.xlu1 %1776  ;;  %v1788_v10 = vld [vmem:[%s3446_s6] sm:$0xff] }
 0x6c1   : > { %v1286_v13 = vmul.f32 %v1284_v11, %v1281_v12 }
 0x6c3   : > { %v1291_v16 = vadd.f32 %v1289_v15, %v1286_v13 }
 0x6c5   : > { %2962 = vtanh.f32 %v1291_v16 }
 0x6cf   : > { %v2963_v18 = vpop.eup %2962 }
 0x6d0   : > { %2819 = vmatpush3.msra.mxu1 %v2963_v18 }
 0x6d1   : > { %2821 = vmatmul.mubr.msk.f32.vlgmr.msra.gmra.mrb[10].mxu1 %vm425_vm1, %v419_v17  ;;  %2828 = vmatprep.subr.mxu1 %v3048_v1 }
 0x6d2   : > { %2830 = vmatprep.mubr.msk.f32.mxu1 %vm3049_vm0, %v3048_v1 }
 0x7a4   : > { %v1367_v20 = vpop.f32.mrb[10].mxu1 }
 0x7a5   : > { %v1368_v21 = vadd.f32 %v1367_v20, %v1296_v19  ;;  %v2822_v22 = vpop.f32.mrb[11].mxu1 }
 0x7a7   : > { %2824 = vmatpush3.msra.mxu0 %v1368_v21 }
 0x7a8   : > { %2826 = vmatmul.mubr.msk.f32.vlgmr.msra.gmra.mrb[12].mxu0 %vm425_vm1, %v3054_v30  ;;  %2833 = vmatprep.subr.mxu0 %v3048_v1 }
 0x7a9   : > { %2835 = vmatprep.mubr.msk.f32.mxu0 %vm3049_vm0, %v3048_v1 }
 0x87b   : > { %v1437_v24 = vpop.f32.mrb[12].mxu0 }
 0x87c   : > { %v1441_v25 = vmul.f32 0.125, %v1437_v24  ;;  %v2827_v26 = vpop.f32.mrb[13].mxu0 }
 0x87e   : > { %v1445_v27 = vrot.slane %v1441_v25, %v3236_v36 }
 0x880   : > { %v1446_v28 = vsub.f32 %v1368_v21, %v1445_v27  ;;  %v1792_v21 = vld [vmem:[%s3447_s7 + $0x8] sm:$0xff] }
 0x882   : > { %v1447_v29 = vmul.f32 %v1446_v28, %v1446_v28 }
 0x884   : > { %2829 = vmatpush3.msra.mxu1 %v1447_v29 }
 0x885   : > { %2831 = vmatmul.mubr.msk.f32.vlgmr.msra.gmra.mrb[12].mxu1 %vm425_vm1, %v3054_v30  ;;  %2838 = vmatprep.subr.mxu1 %v3048_v1 }
 0x886   : > { %2840 = vmatprep.mubr.msk.f32.mxu1 %vm3049_vm0, %v3048_v1 }
 0x958   : > { %v1514_v31 = vpop.f32.mrb[12].mxu1 }
 0x959   : > { %v1518_v32 = vmul.f32 0.125, %v1514_v31  ;;  %v2832_v33 = vpop.f32.mrb[13].mxu1 }
 0x95b   : > { %v1519_v14 = vadd.f32 1e-05, %v1518_v32 }
 0x95d   : > { %2964 = vrsqrt.f32 %v1519_v14  ;;  %v1789_v14 = vld [vmem:[%s3446_s6 + $0x8] sm:$0xff] }
 0x967   : > { %v2965_v37 = vpop.eup %2964 }
 0x968   : > { %v1524_v38 = vrot.slane %v2965_v37, %v3236_v36 }
 0x96a   : > { %v1525_v39 = vmul.f32 %v1524_v38, %v1446_v28 }
 0x96c   : > { %v1530_v42 = vmul.f32 %v1528_v40, %v1525_v39 }
 0x96e   : > { %v1535_v43 = vadd.f32 %v1533_v41, %v1530_v42 }
 0x970   : > { %2966 = vtanh.f32 %v1535_v43 }
 0x97a   : > { %v2967_v45 = vpop.eup %2966 }
 0x97b   : > { %2834 = vmatpush3.msra.mxu0 %v2967_v45 }
 0x97c   : > { %2836 = vmatmul.mubr.msk.f32.vlgmr.msra.gmra.mrb[14].mxu0 %vm425_vm1, %v420_v44  ;;  %2843 = vmatprep.subr.mxu0 %v3048_v1 }
 0x97d   : > { %2845 = vmatprep.mubr.msk.f32.mxu0 %vm3049_vm0, %v3048_v1 }
 0xa4f   : > { %v1611_v47 = vpop.f32.mrb[14].mxu0 }
 0xa50   : > { %v1612_v48 = vadd.f32 %v1611_v47, %v1540_v46  ;;  %v2837_v49 = vpop.f32.mrb[15].mxu0  ;;  %v1793_v47 = vld [vmem:[%s3447_s7 + $0x10] sm:$0xff] }
 0xa52   : > { %2839 = vmatpush3.msra.mxu1 %v1612_v48 }
 0xa53   : > { %2841 = vmatmul.mubr.msk.f32.vlgmr.msra.gmra.mrb[14].mxu1 %vm425_vm1, %v3054_v30  ;;  %2848 = vmatprep.subr.mxu1 %v3048_v1 }
 0xa54   : > { %2850 = vmatprep.mubr.msk.f32.mxu1 %vm3049_vm0, %v3048_v1 }
 0xb26   : > { %v1681_v50 = vpop.f32.mrb[14].mxu1 }
 0xb27   : > { %v1685_v51 = vmul.f32 0.125, %v1681_v50  ;;  %v2842_v52 = vpop.f32.mrb[15].mxu1 }
 0xb29   : > { %v1689_v53 = vrot.slane %v1685_v51, %v3236_v36 }
 0xb2b   : > { %v1690_v54 = vsub.f32 %v1612_v48, %v1689_v53 }
 0xb2d   : > { %v1691_v55 = vmul.f32 %v1690_v54, %v1690_v54 }
 0xb2f   : > { %2844 = vmatpush3.msra.mxu0 %v1691_v55 }
 0xb30   : > { %2846 = vmatmul.mubr.msk.f32.vlgmr.msra.gmra.mrb[16].mxu0 %vm425_vm1, %v3054_v30  ;;  %2853 = vmatprep.subr.mxu0 %v3048_v1 }
 0xb31   : > { %2855 = vmatprep.mubr.msk.f32.mxu0 %vm3049_vm0, %v3048_v1 }
 0xc03   : > { %v1758_v56 = vpop.f32.mrb[16].mxu0 }
 0xc04   : > { %v1762_v57 = vmul.f32 0.125, %v1758_v56  ;;  %v2847_v58 = vpop.f32.mrb[17].mxu0 }
 0xc06   : > { %v1763_v59 = vadd.f32 1e-05, %v1762_v57 }
 0xc08   : > { %2968 = vrsqrt.f32 %v1763_v59  ;;  %v1790_v59 = vld [vmem:[%s3446_s6 + $0x10] sm:$0xff] }
 0xc12   : > { %v2969_v60 = vpop.eup %2968 }
 0xc13   : > { %v1768_v61 = vrot.slane %v2969_v60, %v3236_v36 }
 0xc15   : > { %v1769_v62 = vmul.f32 %v1768_v61, %v1690_v54 }
 0xc17   : > { %v1774_v2 = vmul.f32 %v1772_v63, %v1769_v62 }
 0xc19   : > { %v1779_v3 = vadd.f32 %v1777_v0, %v1774_v2 }
 0xc1b   : > { %2970 = vtanh.f32 %v1779_v3 }
 0xc25   : > { %v2971_v5 = vpop.eup %2970 }
 0xc26   : > { %1781 = vst.msk [vmem:[%s401_s12] sm:$0xff] %vm425_vm1, %v2971_v5  ;;  %v1782_v6 = vadd.f32 %v2971_v5, %v3183_v4  ;;  %v1784_v7 = vsel %vm425_vm1, %v2971_v5, 0.0  ;;  %v1791_v4 = vld [vmem:[%s3447_s7] sm:$0xff] }
 0xc27   : > { %1785 = vadd.xlane.f32.xlu0 %v1784_v7  ;;  %2023 = vrot.lane.b32.xlu1 %v1791_v4, %s3057_s3 }
 0xc28   : > { %1783 = vst.msk [vmem:[%s405_s21] sm:$0xff] %vm425_vm1, %v1782_v6 }
 0xc2b   : > { %2027 = vrot.lane.b32.xlu1 %v1791_v4, %s3058_s22 }
 0xc2f   : > { %2261 = vrot.lane.b32.xlu1 %v1792_v21, %s3057_s3 }
 0xc33   : > { %2265 = vrot.lane.b32.xlu1 %v1792_v21, %s3058_s22 }
 0xc37   : > { %2499 = vrot.lane.b32.xlu1 %v1793_v47, %s3057_s3  ;;  %s2548_s3 = sshll.u32 %s386_s28, 4  ;;  %s3400_s3 = int_to_ptr.vmem [resolvable:$true] %s2548_s3 }
 0xc38   : > { %s2984_s12 = scalar_lea.vmem %s3400_s3, 16  ;;  %p2991_p0 = scmp.lt.s32.totalorder %s3400_s3, %s2989_s18 }
 0xc39   : > { %p2985_p11 = scmp.ne.s32.totalorder %s3400_s3, %s2984_s12  ;;  %p2992_p1 = scmp.lt.s32.totalorder %s2990_s20, %s2984_s12 }
 0xc3b   : > { %2503 = vrot.lane.b32.xlu1 %v1793_v47, %s3058_s22  ;;  %p2986_p12 = pnand %p2985_p11, %p3153_p5  ;;  %p2993_p2 = por %p2992_p1, %p2991_p0 }
 0xc3d   : > { %p2987_p13 = pneg %p2986_p12 }
 0xc3f   : > { %p2994_p3 = pnand %p2993_p2, %p2987_p13 }
 0xc99   : > { %v2024_v26 = vpop.permute.xlu1 %2023 }
 0xc9d   : > { %v2028_v31 = vpop.permute.xlu1 %2027 }
 0xca1   : > { %v2262_v52 = vpop.permute.xlu1 %2261 }
 0xca5   : > { %v2266_v56 = vpop.permute.xlu1 %2265 }
 0xcb4   : > { %v1786_v8 = vpop.xlane.xlu0 %1785 }
 0xcb5   : > { %v1787_v9 = vmul.f32 0.125, %v1786_v8 }
 0xcb7   : > { %2849 = vmatpush3.msra.mxu1 %v1787_v9 }
 0xcb8   : > { %2851 = vmatmul.mubr.msk.f32.vlgmr.msra.gmra.mrb[16].mxu1 %vm425_vm1, %v1788_v10  ;;  %2858 = vmatprep.subr.mxu1 %v3048_v1 }
 0xcb9   : > { %2860 = vmatprep.mubr.msk.f32.mxu1 %vm3049_vm0, %v3048_v1 }
 0xd8b   : > { %v1863_v11 = vpop.f32.mrb[16].mxu1 }
 0xd8c   : > { %v1864_v12 = vadd.f32 %v1863_v11, %v1791_v4  ;;  %v2852_v13 = vpop.f32.mrb[17].mxu1  ;;  %v2500_v4 = vpop.permute.xlu1 %2499 }
 0xd8e   : > { %2854 = vmatpush3.msra.mxu0 %v1864_v12 }
 0xd8f   : > { %2856 = vmatmul.mubr.msk.f32.vlgmr.msra.gmra.mrb[18].mxu0 %vm425_vm1, %v3054_v30  ;;  %2863 = vmatprep.subr.mxu0 %v3048_v1 }
 0xd90   : > { %2865 = vmatprep.mubr.msk.f32.mxu0 %vm3049_vm0, %v3048_v1 }
 0xe62   : > { %v1933_v15 = vpop.f32.mrb[18].mxu0 }
 0xe63   : > { %v1937_v16 = vmul.f32 0.125, %v1933_v15  ;;  %v2857_v17 = vpop.f32.mrb[19].mxu0  ;;  %v2504_v15 = vpop.permute.xlu1 %2503 }
 0xe65   : > { %v1941_v18 = vrot.slane %v1937_v16, %v3236_v36 }
 0xe67   : > { %v1942_v19 = vsub.f32 %v1864_v12, %v1941_v18 }
 0xe69   : > { %v1943_v20 = vmul.f32 %v1942_v19, %v1942_v19 }
 0xe6b   : > { %2859 = vmatpush3.msra.mxu1 %v1943_v20 }
 0xe6c   : > { %2861 = vmatmul.mubr.msk.f32.vlgmr.msra.gmra.mrb[18].mxu1 %vm425_vm1, %v3054_v30  ;;  %2868 = vmatprep.subr.mxu1 %v3048_v1 }
 0xe6d   : > { %2870 = vmatprep.mubr.msk.f32.mxu1 %vm3049_vm0, %v3048_v1 }
 0xf3f   : > { %v2010_v22 = vpop.f32.mrb[18].mxu1 }
 0xf40   : > { %v2014_v23 = vmul.f32 0.125, %v2010_v22  ;;  %v2862_v24 = vpop.f32.mrb[19].mxu1 }
 0xf42   : > { %v2015_v25 = vadd.f32 1e-05, %v2014_v23 }
 0xf44   : > { %2972 = vrsqrt.f32 %v2015_v25 }
 0xf4e   : > { %v2973_v27 = vpop.eup %2972 }
 0xf4f   : > { %v2020_v28 = vrot.slane %v2973_v27, %v3236_v36 }
 0xf51   : > { %v2021_v29 = vmul.f32 %v2020_v28, %v1942_v19 }
 0xf53   : > { %v2026_v32 = vmul.f32 %v2024_v26, %v2021_v29 }
 0xf55   : > { %v2030_v33 = vadd.f32 %v2028_v31, %v2026_v32 }
 0xf57   : > { %2974 = vtanh.f32 %v2030_v33 }
 0xf61   : > { %v2975_v37 = vpop.eup %2974 }
 0xf62   : > { %2864 = vmatpush3.msra.mxu0 %v2975_v37 }
 0xf63   : > { %2866 = vmatmul.mubr.msk.f32.vlgmr.msra.gmra.mrb[20].mxu0 %vm425_vm1, %v1789_v14  ;;  %2873 = vmatprep.subr.mxu0 %v3048_v1 }
 0xf64   : > { %2875 = vmatprep.mubr.msk.f32.mxu0 %vm3049_vm0, %v3048_v1 }
0x1036   : > { %v2101_v38 = vpop.f32.mrb[20].mxu0 }
0x1037   : > { %v2102_v39 = vadd.f32 %v2101_v38, %v1792_v21  ;;  %v2867_v40 = vpop.f32.mrb[21].mxu0 }
0x1039   : > { %2869 = vmatpush3.msra.mxu1 %v2102_v39 }
0x103a   : > { %2871 = vmatmul.mubr.msk.f32.vlgmr.msra.gmra.mrb[20].mxu1 %vm425_vm1, %v3054_v30  ;;  %2878 = vmatprep.subr.mxu1 %v3048_v1 }
0x103b   : > { %2880 = vmatprep.mubr.msk.f32.mxu1 %vm3049_vm0, %v3048_v1 }
0x110d   : > { %v2171_v41 = vpop.f32.mrb[20].mxu1 }
0x110e   : > { %v2175_v42 = vmul.f32 0.125, %v2171_v41  ;;  %v2872_v43 = vpop.f32.mrb[21].mxu1 }
0x1110   : > { %v2179_v44 = vrot.slane %v2175_v42, %v3236_v36 }
0x1112   : > { %v2180_v45 = vsub.f32 %v2102_v39, %v2179_v44 }
0x1114   : > { %v2181_v46 = vmul.f32 %v2180_v45, %v2180_v45 }
0x1116   : > { %2874 = vmatpush3.msra.mxu0 %v2181_v46 }
0x1117   : > { %2876 = vmatmul.mubr.msk.f32.vlgmr.msra.gmra.mrb[22].mxu0 %vm425_vm1, %v3054_v30  ;;  %2883 = vmatprep.subr.mxu0 %v3048_v1 }
0x1118   : > { %2885 = vmatprep.mubr.msk.f32.mxu0 %vm3049_vm0, %v3048_v1 }
0x11ea   : > { %v2248_v48 = vpop.f32.mrb[22].mxu0 }
0x11eb   : > { %v2252_v49 = vmul.f32 0.125, %v2248_v48  ;;  %v2877_v50 = vpop.f32.mrb[23].mxu0 }
0x11ed   : > { %v2253_v51 = vadd.f32 1e-05, %v2252_v49 }
0x11ef   : > { %2976 = vrsqrt.f32 %v2253_v51 }
0x11f9   : > { %v2977_v53 = vpop.eup %2976 }
0x11fa   : > { %v2258_v54 = vrot.slane %v2977_v53, %v3236_v36 }
0x11fc   : > { %v2259_v55 = vmul.f32 %v2258_v54, %v2180_v45 }
0x11fe   : > { %v2264_v57 = vmul.f32 %v2262_v52, %v2259_v55 }
0x1200   : > { %v2268_v58 = vadd.f32 %v2266_v56, %v2264_v57 }
0x1202   : > { %2978 = vtanh.f32 %v2268_v58 }
0x120c   : > { %v2979_v60 = vpop.eup %2978 }
0x120d   : > { %2879 = vmatpush3.msra.mxu1 %v2979_v60 }
0x120e   : > { %2881 = vmatmul.mubr.msk.f32.vlgmr.msra.gmra.mrb[22].mxu1 %vm425_vm1, %v1790_v59  ;;  %2888 = vmatprep.subr.mxu1 %v3048_v1 }
0x120f   : > { %2890 = vmatprep.mubr.msk.f32.mxu1 %vm3049_vm0, %v3048_v1 }
0x12e1   : > { %v2339_v61 = vpop.f32.mrb[22].mxu1 }
0x12e2   : > { %v2340_v62 = vadd.f32 %v2339_v61, %v1793_v47  ;;  %v2882_v63 = vpop.f32.mrb[23].mxu1 }
0x12e4   : > { %2884 = vmatpush3.msra.mxu0 %v2340_v62 }
0x12e5   : > { %2886 = vmatmul.mubr.msk.f32.vlgmr.msra.gmra.mrb[24].mxu0 %vm425_vm1, %v3054_v30 }
0x13b8   : > { %v2409_v0 = vpop.f32.mrb[24].mxu0 }
0x13b9   : > { %v2413_v2 = vmul.f32 0.125, %v2409_v0  ;;  %v2887_v3 = vpop.f32.mrb[25].mxu0 }
0x13bb   : > { %v2417_v5 = vrot.slane %v2413_v2, %v3236_v36 }
0x13bd   : > { %v2418_v6 = vsub.f32 %v2340_v62, %v2417_v5 }
0x13bf   : > { %v2419_v7 = vmul.f32 %v2418_v6, %v2418_v6 }
0x13c1   : > { %2889 = vmatpush3.msra.mxu1 %v2419_v7 }
0x13c2   : > { %2891 = vmatmul.mubr.msk.f32.vlgmr.msra.gmra.mrb[24].mxu1 %vm425_vm1, %v3054_v30  ;;  %v2513_v30 = vand.u32 127, %v954_v34 }
0x13c4   : > { %v2516_v19 = vsub.s32 %v2513_v30, %v3233_v35 }
0x1495   : > { %v2486_v1 = vpop.f32.mrb[24].mxu1 }
0x1496   : > { %v2490_v8 = vmul.f32 0.125, %v2486_v1  ;;  %v2892_v9 = vpop.f32.mrb[25].mxu1 }
0x1498   : > { %v2491_v10 = vadd.f32 1e-05, %v2490_v8 }
0x149a   : > { %2980 = vrsqrt.f32 %v2491_v10 }
0x14a4   : > { %v2981_v11 = vpop.eup %2980 }
0x14a5   : > { %v2496_v12 = vrot.slane %v2981_v11, %v3236_v36 }
0x14a7   : > { %v2497_v13 = vmul.f32 %v2496_v12, %v2418_v6 }
0x14a9   : > { %v2502_v16 = vmul.f32 %v2500_v4, %v2497_v13 }
0x14ab   : > { %v2506_v17 = vadd.f32 %v2504_v15, %v2502_v16 }
0x14ad   : > { %2982 = vtanh.f32 %v2506_v17 }
0x14b7   : > { %v2983_v18 = vpop.eup %2982 }
0x14b8   : > { %2510 = vperm.xlu1 %2954, %v2983_v18  }
0x1537   : > { %v2511_v20 = vpop.permute.xlu1 %2510 }
0x1538   : > { %v2517_v21 = vrot.slane %v2511_v20, %v2516_v19 }
0x153a   : > { %2520 = vst.msk [vmem:[%s386_s28] sm:$0x1] %vm2519_vm2, %v2517_v21 }
0x153b   : > { %2997 = shalt.err (!%p2994_p3)
}
0x153c   : > { %s2998_s21 = scalar_lea.hbm %s3398_s29, 16  ;;  %s3002_s30 = scalar_lea.hbm %s3450_s10, 32 }
0x153d   : > { %p2999_p4 = scmp.ne.s32.totalorder %s3398_s29, %s2998_s21  ;;  %p3003_p9 = scmp.lt.u32.totalorder %s3398_s29, %s3450_s10 }
0x153e   : > { %p3004_p10 = scmp.lt.u32.totalorder %s3002_s30, %s2998_s21  ;;  %p3006_p12 = scmp.lt.u32.totalorder %s2998_s21, %s3398_s29 }
0x153f   : > { %p3000_p7 = pnand %p2999_p4, %p3153_p5 }
0x1540   : > { %p3005_p11 = por %p3004_p10, %p3003_p9 }
0x1541   : > { %p3001_p8 = pneg %p3000_p7 }
0x1542   : > { %p3007_p13 = por %p3006_p12, %p3005_p11 }
0x1544   : > { %p3008_p0 = pnand %p3007_p13, %p3001_p8 }
0x1546   : > { %3011 = shalt.err (!%p3008_p0)
}
0x1547   : > { %2893 = dma.vmem_to_hbm [thread:$0]  (%p3153_p5), %s3400_s3, 16, %s3398_s29, %s2530_s11  }
0x1548 PF: > { %p2899_p1 = scmp.ge.s32.totalorder %s3046_s16, 2  ;;  %s2574_s27 = sand.u32 1, %s3034_s13  }
0x1549   : > { %s2575_s12 = scalar_lea.sflag [#allocation3], %s2574_s27 }
0x154a   : > { %p2896_p2 = pnand %p2899_p1, %p3157_p6 }
0x154c   : > { %3029 = dma.done.wait (!%p2896_p2), %s2575_s12, 16  }
0x154d   : > { %3031 = vsyncadd (!%p2896_p2), %s2575_s12, 4294967280  ;;  %s3456_s17 = sld [smem:[#allocation5_spill]]  ;;  %p21_p3 = scmp.ge.s32.totalorder %s3140_s19, 4  }
0x154e   : > { %s3457_s13 = smov %s3038_s14  ;;  %s3458_s14 = smov %s3042_s15 }
0x154f   : > { %s3460_s16 = smov %s3140_s19  ;;  %23 = sbr.rel (!%p21_p3) target bundleno = 5 (0x5), region = 117 }
0x1553   : > { %s3459_s15 = smov %s3456_s17 }
0x1556   :  { %2579 = vsyncpa [#allocation3], 1 }
0x1557   :  { %2581 = vsyncpa [#allocation3 + $0x1], 1 }

</bundles_post_ra>
